<compile_context>
chip_gen: v6e
topology: v6e:2x2x1
jax: 0.10.0
libtpu: 0.0.40
codegen_flags: <defaults>
</compile_context>

<pallas_src>
import functools
import math

import jax
import jax.numpy as jnp
from jax.experimental import pallas as pl
from jax.experimental.pallas import tpu as pltpu


# ----------------------------- Pallas kernel -------------------------------

def _dual_attention_kernel(x_ref, eca_ref, wmask_ref, b_sp_ref, o_ref, *,
                           B_BLK, KS, W, inv_hw, inv_c):
    """Fused ECA + spatial attention for a (B_BLK, C, H*W) slab.

    x_ref     : (B_BLK, C, HW) f32 VMEM  -- input slab (lane-dense)
    eca_ref   : (C, C)         f32 VMEM  -- banded ECA Conv1d as a matrix
    wmask_ref : (KS*KS, 2, HW) f32 VMEM  -- per-tap weight*validity masks
                                            (row 0 = avg channel, row 1 = max)
    b_sp_ref  : (1,)           f32 SMEM  -- spatial conv bias
    o_ref     : (B_BLK, C, HW) f32 VMEM  -- output slab
    """
    _, C, HW = x_ref.shape
    pad_s = KS // 2

    eca_mat = eca_ref[...]                                   # (C, C)
    bias = b_sp_ref[0]
    ch_ones = jnp.full((1, C), inv_c, dtype=jnp.float32)     # mean-over-C lhs

    for b in range(B_BLK):
        x = x_ref[b]                                         # (C, HW)

        # ---------------- ECA: GAP + banded channel conv + sigmoid ----------
        pooled = jnp.sum(x, axis=1, keepdims=True) * inv_hw  # (C, 1), exact
        y = jnp.dot(eca_mat, pooled,
                    preferred_element_type=jnp.float32)      # (C, 1)  MXU
        ch_scale = jax.nn.sigmoid(y)                         # (C, 1)
        x_eca = x * ch_scale                                 # lane broadcast
        # Park the scaled slab in the output VMEM block: bounds vreg live
        # ranges across the 49-tap loop; reloaded for the final multiply.
        o_ref[b] = x_eca

        # ---------------- channel stats: mean (MXU) + max (XLU) -------------
        avg = jnp.dot(ch_ones, x_eca,
                      preferred_element_type=jnp.float32)    # (1, HW)  MXU
        mx = jnp.max(x_eca, axis=0, keepdims=True)           # (1, HW)  XLU
        stats = jnp.concatenate([avg, mx], axis=0)           # (2, HW)

        # ------------- KSxKS "same" conv on the flattened map --------------
        # One lane-roll + one FMA per tap; weights & edge masks pre-folded
        # into wmask_ref.  Two accumulators break the add dependency chain.
        acc0 = jnp.zeros((2, HW), jnp.float32)
        acc1 = jnp.zeros((2, HW), jnp.float32)
        tap = 0
        for di in range(KS):
            for dj in range(KS):
                off = (di - pad_s) * W + (dj - pad_s)
                sh = (-off) % HW                              # static, >= 0
                shifted = stats if sh == 0 else pltpu.roll(stats, shift=sh,
                                                           axis=1)
                contrib = shifted * wmask_ref[tap]            # (2, HW)
                if tap % 2 == 0:
                    acc0 = acc0 + contrib
                else:
                    acc1 = acc1 + contrib
                tap += 1
        acc = acc0 + acc1                                     # (2, HW)
        att_lin = jnp.sum(acc, axis=0, keepdims=True) + bias  # (1, HW)
        att = jax.nn.sigmoid(att_lin)

        o_ref[b] = o_ref[b] * att                             # sublane bcast


# -------------------------------- wrapper -----------------------------------

def eca_kernel_size(channels, gamma=2, b=1):
    t = int(abs(math.log(channels, 2) + b) / gamma)
    return t if t % 2 else t + 1


def make_dual_attention_params(key, channels, spatial_kernel=7):
    """Deterministic synthetic parameters matching DualAttention shapes."""
    k_eca = eca_kernel_size(channels)
    k1, k2, k3 = jax.random.split(key, 3)
    w_eca = 0.5 * jax.random.normal(k1, (k_eca,), jnp.float32)
    w_sp = 0.2 * jax.random.normal(
        k2, (2, spatial_kernel, spatial_kernel), jnp.float32)
    b_sp = 0.1 * jax.random.normal(k3, (1,), jnp.float32)
    return dict(w_eca=w_eca, w_sp=w_sp, b_sp=b_sp,
                k_eca=k_eca, ks=spatial_kernel)


def _pick_batch_block(n, c, hw, max_block_bytes=2 << 20, max_unroll=4):
    """Largest divisor of n with slab <= ~2 MiB and bounded kernel unroll."""
    slab = c * hw * 4
    limit = max(1, min(max_unroll, max_block_bytes // max(slab, 1)))
    for b in range(min(limit, n), 0, -1):
        if n % b == 0:
            return b
    return 1


def dual_attention_forward(x, params):
    """x: (N, C, H, W) f32 NCHW. Returns (N, C, H, W)."""
    N, C, H, W = x.shape
    HW = H * W
    k_eca, ks = params["k_eca"], params["ks"]
    pad_e, pad_s = k_eca // 2, ks // 2
    w_eca = params["w_eca"].astype(jnp.float32)
    w_sp = params["w_sp"].astype(jnp.float32)      # (2, ks, ks)
    b_sp = params["b_sp"].astype(jnp.float32)      # (1,)

    # Free (metadata-only) reshape to the lane-dense (N, C, H*W) view.
    x_flat = x.reshape(N, C, HW)

    # Banded (C, C) matrix implementing the ECA Conv1d(1, 1, k, pad=k//2,
    # bias=False) as a single MXU matmul: M[c, c'] = w[c'-c+pad] on the band.
    ch = jnp.arange(C)
    off = ch[None, :] - ch[:, None] + pad_e
    eca_mat = jnp.where((off >= 0) & (off < k_eca),
                        w_eca[jnp.clip(off, 0, k_eca - 1)],
                        0.0).astype(jnp.float32)

    # Per-tap weight * validity-mask table for the flattened KSxKS conv:
    # wmask[tap, 0, p] = w_avg[tap] * valid(tap, p);  [tap, 1, p] for the max
    # channel.  "valid" encodes the same zero-padding as the reference conv.
    row = jnp.repeat(jnp.arange(H, dtype=jnp.int32), W)
    col = jnp.tile(jnp.arange(W, dtype=jnp.int32), H)
    taps = []
    for di in range(ks):
        oi = di - pad_s
        rok = (row + oi >= 0) & (row + oi < H)
        for dj in range(ks):
            oj = dj - pad_s
            ok = (rok & (col + oj >= 0) & (col + oj < W)).astype(jnp.float32)
            taps.append(jnp.stack([ok * w_sp[0, di, dj],
                                   ok * w_sp[1, di, dj]], axis=0))
    wmask = jnp.stack(taps, axis=0)                 # (ks*ks, 2, HW)

    B_BLK = _pick_batch_block(N, C, HW)

    block_bytes = B_BLK * C * HW * 4
    table_bytes = ks * ks * 2 * HW * 4 + C * C * 4
    vmem_needed = 4 * block_bytes + 2 * table_bytes + (4 << 20)
    # Explicit VMEM budget: above the 32 MiB scoped default when useful,
    # below v7x's 64 MiB physical ceiling.
    vmem_limit = int(min(max(vmem_needed, 32 << 20), 60 << 20))

    kernel = functools.partial(_dual_attention_kernel,
                               B_BLK=B_BLK, KS=ks, W=W,
                               inv_hw=1.0 / HW, inv_c=1.0 / C)
    out_flat = pl.pallas_call(
        kernel,
        out_shape=jax.ShapeDtypeStruct((N, C, HW), jnp.float32),
        grid=(N // B_BLK,),
        in_specs=[
            pl.BlockSpec((B_BLK, C, HW), lambda n: (n, 0, 0)),
            pl.BlockSpec((C, C), lambda n: (0, 0)),
            pl.BlockSpec((ks * ks, 2, HW), lambda n: (0, 0, 0)),
            pl.BlockSpec(memory_space=pltpu.MemorySpace.SMEM),   # bias
        ],
        out_specs=pl.BlockSpec((B_BLK, C, HW), lambda n: (n, 0, 0)),
        compiler_params=pltpu.CompilerParams(
            dimension_semantics=("parallel",),
            vmem_limit_bytes=vmem_limit),
    )(x_flat, eca_mat, wmask, b_sp)
    return out_flat.reshape(N, C, H, W)


# --------------------------- pure-JAX reference -----------------------------

def dual_attention_ref(x, params):
    N, C, H, W = x.shape
    k_eca, ks = params["k_eca"], params["ks"]
    pad_e, pad_s = k_eca // 2, ks // 2

    # ECA
    pooled = jnp.mean(x, axis=(2, 3))                          # (N, C)
    pp = jnp.pad(pooled, ((0, 0), (pad_e, pad_e)))
    y = jnp.zeros((N, C), jnp.float32)
    for i in range(k_eca):
        y = y + pp[:, i:i + C] * params["w_eca"][i]
    x_eca = x * jax.nn.sigmoid(y)[:, :, None, None]

    # Spatial attention
    avg = jnp.mean(x_eca, axis=1, keepdims=True)
    mx = jnp.max(x_eca, axis=1, keepdims=True)
    stats = jnp.concatenate([avg, mx], axis=1)                 # (N, 2, H, W)
    sp = jnp.pad(stats, ((0, 0), (0, 0), (pad_s, pad_s), (pad_s, pad_s)))
    w2 = params["w_sp"]                                        # (2, ks, ks)
    acc = jnp.zeros((N, H, W), jnp.float32)
    for ci in range(2):
        for di in range(ks):
            for dj in range(ks):
                acc = acc + sp[:, ci, di:di + H, dj:dj + W] * w2[ci, di, dj]
    att = jax.nn.sigmoid(acc + params["b_sp"][0])[:, None, :, :]
    return x_eca * att


# --------------------------------- main --------------------------------------

if __name__ == "__main__":
    key = jax.random.PRNGKey(0)
    kx, kp = jax.random.split(key)

    N, C, H, W = 2, 32, 16, 16
    x = jax.random.normal(kx, (N, C, H, W), jnp.float32)
    params = make_dual_attention_params(kp, channels=C)

    out = jax.jit(lambda a: dual_attention_forward(a, params))(x)
    out = jax.block_until_ready(out)

    ref = dual_attention_ref(x, params)
    assert out.shape == (N, C, H, W), out.shape
    max_err = float(jnp.max(jnp.abs(out - ref)))
    assert jnp.allclose(out, ref, rtol=1e-4, atol=1e-4), max_err

    print("KERNEL_OK")
</pallas_src>

<mosaic_0001>
module attributes {stable_mosaic.version = 11 : i64} {
  func.func @_dual_attention_kernel(%arg0: i32, %arg1: memref<2x32x256xf32, #tpu.memory_space<vmem>>, %arg2: memref<32x32xf32, #tpu.memory_space<vmem>>, %arg3: memref<49x2x256xf32, #tpu.memory_space<vmem>>, %arg4: memref<1xf32, #tpu.memory_space<smem>>, %arg5: memref<2x32x256xf32, #tpu.memory_space<vmem>>) attributes {dimension_semantics = [#tpu.dimension_semantics<parallel>], iteration_bounds = array<i64: 1>, scalar_prefetch = 0 : i64, scratch_operands = 0 : i64, tpu.core_type = #tpu.core_type<tc>, window_params = [{transform_indices = @transform_0, window_bounds = array<i64: 2, 32, 256>}, {pipeline_mode = #tpu.pipeline_mode<synchronous>, transform_indices = @transform_1, window_bounds = array<i64: 32, 32>}, {pipeline_mode = #tpu.pipeline_mode<synchronous>, transform_indices = @transform_2, window_bounds = array<i64: 49, 2, 256>}, {transform_indices = @transform_3, window_bounds = array<i64: 1>}, {transform_indices = @transform_4, window_bounds = array<i64: 2, 32, 256>}]} {
    %c0 = arith.constant 0 : index
    %c0_0 = arith.constant 0 : index
    %0 = vector.load %arg2[%c0, %c0_0] : memref<32x32xf32, #tpu.memory_space<vmem>>, vector<32x32xf32>
    %c0_1 = arith.constant 0 : index
    %1 = memref.load %arg4[%c0_1] : memref<1xf32, #tpu.memory_space<smem>>
    %cst = arith.constant 3.125000e-02 : f32
    %2 = vector.broadcast %cst : f32 to vector<1x32xf32>
    %c0_2 = arith.constant 0 : index
    %c0_3 = arith.constant 0 : index
    %c0_4 = arith.constant 0 : index
    %3 = vector.load %arg1[%c0_2, %c0_3, %c0_4] : memref<2x32x256xf32, #tpu.memory_space<vmem>>, vector<1x32x256xf32>
    %4 = vector.shape_cast %3 : vector<1x32x256xf32> to vector<32x256xf32>
    %cst_5 = arith.constant dense<0.000000e+00> : vector<32xf32>
    %5 = vector.multi_reduction <add>, %4, %cst_5 [1] : vector<32x256xf32> to vector<32xf32>
    %6 = vector.shape_cast %5 : vector<32xf32> to vector<32x1xf32>
    %cst_6 = arith.constant 3.906250e-03 : f32
    %7 = vector.broadcast %cst_6 : f32 to vector<32x1xf32>
    %8 = arith.mulf %6, %7 : vector<32x1xf32>
    %cst_7 = arith.constant dense<0.000000e+00> : vector<32x1xf32>
    %9 = tpu.matmul %0, %8, %cst_7 {dimension_numbers = #tpu.dot_dimension_numbers<[1], [0], [0], [1], [0, 0, 1, 1], [], []>} : vector<32x32xf32>, vector<32x1xf32>, vector<32x1xf32> -> vector<32x1xf32>
    %10 = arith.negf %9 : vector<32x1xf32>
    %11 = math.exp %10 : vector<32x1xf32>
    %cst_8 = arith.constant 1.000000e+00 : f32
    %12 = vector.broadcast %cst_8 : f32 to vector<32x1xf32>
    %13 = arith.addf %12, %11 : vector<32x1xf32>
    %14 = arith.divf %12, %13 : vector<32x1xf32>
    %15 = vector.broadcast %14 : vector<32x1xf32> to vector<32x256xf32>
    %16 = arith.mulf %4, %15 : vector<32x256xf32>
    %c0_9 = arith.constant 0 : index
    %c0_10 = arith.constant 0 : index
    %c0_11 = arith.constant 0 : index
    %17 = vector.load %arg5[%c0_9, %c0_10, %c0_11] : memref<2x32x256xf32, #tpu.memory_space<vmem>>, vector<1x32x256xf32>
    %18 = vector.shape_cast %17 : vector<1x32x256xf32> to vector<32x256xf32>
    %19 = vector.shape_cast %16 : vector<32x256xf32> to vector<1x32x256xf32>
    tpu.vector_store %arg5[%c0_9, %c0_10, %c0_11], %19 {strides = array<i32>} : memref<2x32x256xf32, #tpu.memory_space<vmem>>, vector<1x32x256xf32>,
    %cst_12 = arith.constant dense<0.000000e+00> : vector<1x256xf32>
    %20 = tpu.matmul %2, %16, %cst_12 {dimension_numbers = #tpu.dot_dimension_numbers<[1], [0], [0], [1], [0, 0, 1, 1], [], []>} : vector<1x32xf32>, vector<32x256xf32>, vector<1x256xf32> -> vector<1x256xf32>
    %cst_13 = arith.constant dense<0xFF800000> : vector<256xf32>
    %21 = vector.multi_reduction <maximumf>, %16, %cst_13 [0] : vector<32x256xf32> to vector<256xf32>
    %22 = vector.shape_cast %21 : vector<256xf32> to vector<1x256xf32>
    %23 = tpu.concatenate %20, %22 in 0 : vector<1x256xf32>, vector<1x256xf32> -> vector<2x256xf32>
    %cst_14 = arith.constant 0.000000e+00 : f32
    %24 = vector.broadcast %cst_14 : f32 to vector<2x256xf32>
    %cst_15 = arith.constant 0.000000e+00 : f32
    %25 = vector.broadcast %cst_15 : f32 to vector<2x256xf32>
    %c51_i32 = arith.constant 51 : i32
    %26 = tpu.dynamic_rotate %23 by %c51_i32 dim 1 : vector<2x256xf32>, i32 -> vector<2x256xf32>
    %c0_16 = arith.constant 0 : index
    %c0_17 = arith.constant 0 : index
    %c0_18 = arith.constant 0 : index
    %27 = vector.load %arg3[%c0_16, %c0_17, %c0_18] : memref<49x2x256xf32, #tpu.memory_space<vmem>>, vector<1x2x256xf32>
    %28 = vector.shape_cast %27 : vector<1x2x256xf32> to vector<2x256xf32>
    %29 = arith.mulf %26, %28 : vector<2x256xf32>
    %30 = arith.addf %24, %29 : vector<2x256xf32>
    %c50_i32 = arith.constant 50 : i32
    %31 = tpu.dynamic_rotate %23 by %c50_i32 dim 1 : vector<2x256xf32>, i32 -> vector<2x256xf32>
    %c1 = arith.constant 1 : index
    %c0_19 = arith.constant 0 : index
    %c0_20 = arith.constant 0 : index
    %32 = vector.load %arg3[%c1, %c0_19, %c0_20] : memref<49x2x256xf32, #tpu.memory_space<vmem>>, vector<1x2x256xf32>
    %33 = vector.shape_cast %32 : vector<1x2x256xf32> to vector<2x256xf32>
    %34 = arith.mulf %31, %33 : vector<2x256xf32>
    %35 = arith.addf %25, %34 : vector<2x256xf32>
    %c49_i32 = arith.constant 49 : i32
    %36 = tpu.dynamic_rotate %23 by %c49_i32 dim 1 : vector<2x256xf32>, i32 -> vector<2x256xf32>
    %c2 = arith.constant 2 : index
    %c0_21 = arith.constant 0 : index
    %c0_22 = arith.constant 0 : index
    %37 = vector.load %arg3[%c2, %c0_21, %c0_22] : memref<49x2x256xf32, #tpu.memory_space<vmem>>, vector<1x2x256xf32>
    %38 = vector.shape_cast %37 : vector<1x2x256xf32> to vector<2x256xf32>
    %39 = arith.mulf %36, %38 : vector<2x256xf32>
    %40 = arith.addf %30, %39 : vector<2x256xf32>
    %c48_i32 = arith.constant 48 : i32
    %41 = tpu.dynamic_rotate %23 by %c48_i32 dim 1 : vector<2x256xf32>, i32 -> vector<2x256xf32>
    %c3 = arith.constant 3 : index
    %c0_23 = arith.constant 0 : index
    %c0_24 = arith.constant 0 : index
    %42 = vector.load %arg3[%c3, %c0_23, %c0_24] : memref<49x2x256xf32, #tpu.memory_space<vmem>>, vector<1x2x256xf32>
    %43 = vector.shape_cast %42 : vector<1x2x256xf32> to vector<2x256xf32>
    %44 = arith.mulf %41, %43 : vector<2x256xf32>
    %45 = arith.addf %35, %44 : vector<2x256xf32>
    %c47_i32 = arith.constant 47 : i32
    %46 = tpu.dynamic_rotate %23 by %c47_i32 dim 1 : vector<2x256xf32>, i32 -> vector<2x256xf32>
    %c4 = arith.constant 4 : index
    %c0_25 = arith.constant 0 : index
    %c0_26 = arith.constant 0 : index
    %47 = vector.load %arg3[%c4, %c0_25, %c0_26] : memref<49x2x256xf32, #tpu.memory_space<vmem>>, vector<1x2x256xf32>
    %48 = vector.shape_cast %47 : vector<1x2x256xf32> to vector<2x256xf32>
    %49 = arith.mulf %46, %48 : vector<2x256xf32>
    %50 = arith.addf %40, %49 : vector<2x256xf32>
    %c46_i32 = arith.constant 46 : i32
    %51 = tpu.dynamic_rotate %23 by %c46_i32 dim 1 : vector<2x256xf32>, i32 -> vector<2x256xf32>
    %c5 = arith.constant 5 : index
    %c0_27 = arith.constant 0 : index
    %c0_28 = arith.constant 0 : index
    %52 = vector.load %arg3[%c5, %c0_27, %c0_28] : memref<49x2x256xf32, #tpu.memory_space<vmem>>, vector<1x2x256xf32>
    %53 = vector.shape_cast %52 : vector<1x2x256xf32> to vector<2x256xf32>
    %54 = arith.mulf %51, %53 : vector<2x256xf32>
    %55 = arith.addf %45, %54 : vector<2x256xf32>
    %c45_i32 = arith.constant 45 : i32
    %56 = tpu.dynamic_rotate %23 by %c45_i32 dim 1 : vector<2x256xf32>, i32 -> vector<2x256xf32>
    %c6 = arith.constant 6 : index
    %c0_29 = arith.constant 0 : index
    %c0_30 = arith.constant 0 : index
    %57 = vector.load %arg3[%c6, %c0_29, %c0_30] : memref<49x2x256xf32, #tpu.memory_space<vmem>>, vector<1x2x256xf32>
    %58 = vector.shape_cast %57 : vector<1x2x256xf32> to vector<2x256xf32>
    %59 = arith.mulf %56, %58 : vector<2x256xf32>
    %60 = arith.addf %50, %59 : vector<2x256xf32>
    %c35_i32 = arith.constant 35 : i32
    %61 = tpu.dynamic_rotate %23 by %c35_i32 dim 1 : vector<2x256xf32>, i32 -> vector<2x256xf32>
    %c7 = arith.constant 7 : index
    %c0_31 = arith.constant 0 : index
    %c0_32 = arith.constant 0 : index
    %62 = vector.load %arg3[%c7, %c0_31, %c0_32] : memref<49x2x256xf32, #tpu.memory_space<vmem>>, vector<1x2x256xf32>
    %63 = vector.shape_cast %62 : vector<1x2x256xf32> to vector<2x256xf32>
    %64 = arith.mulf %61, %63 : vector<2x256xf32>
    %65 = arith.addf %55, %64 : vector<2x256xf32>
    %c34_i32 = arith.constant 34 : i32
    %66 = tpu.dynamic_rotate %23 by %c34_i32 dim 1 : vector<2x256xf32>, i32 -> vector<2x256xf32>
    %c8 = arith.constant 8 : index
    %c0_33 = arith.constant 0 : index
    %c0_34 = arith.constant 0 : index
    %67 = vector.load %arg3[%c8, %c0_33, %c0_34] : memref<49x2x256xf32, #tpu.memory_space<vmem>>, vector<1x2x256xf32>
    %68 = vector.shape_cast %67 : vector<1x2x256xf32> to vector<2x256xf32>
    %69 = arith.mulf %66, %68 : vector<2x256xf32>
    %70 = arith.addf %60, %69 : vector<2x256xf32>
    %c33_i32 = arith.constant 33 : i32
    %71 = tpu.dynamic_rotate %23 by %c33_i32 dim 1 : vector<2x256xf32>, i32 -> vector<2x256xf32>
    %c9 = arith.constant 9 : index
    %c0_35 = arith.constant 0 : index
    %c0_36 = arith.constant 0 : index
    %72 = vector.load %arg3[%c9, %c0_35, %c0_36] : memref<49x2x256xf32, #tpu.memory_space<vmem>>, vector<1x2x256xf32>
    %73 = vector.shape_cast %72 : vector<1x2x256xf32> to vector<2x256xf32>
    %74 = arith.mulf %71, %73 : vector<2x256xf32>
    %75 = arith.addf %65, %74 : vector<2x256xf32>
    %c32_i32 = arith.constant 32 : i32
    %76 = tpu.dynamic_rotate %23 by %c32_i32 dim 1 : vector<2x256xf32>, i32 -> vector<2x256xf32>
    %c10 = arith.constant 10 : index
    %c0_37 = arith.constant 0 : index
    %c0_38 = arith.constant 0 : index
    %77 = vector.load %arg3[%c10, %c0_37, %c0_38] : memref<49x2x256xf32, #tpu.memory_space<vmem>>, vector<1x2x256xf32>
    %78 = vector.shape_cast %77 : vector<1x2x256xf32> to vector<2x256xf32>
    %79 = arith.mulf %76, %78 : vector<2x256xf32>
    %80 = arith.addf %70, %79 : vector<2x256xf32>
    %c31_i32 = arith.constant 31 : i32
    %81 = tpu.dynamic_rotate %23 by %c31_i32 dim 1 : vector<2x256xf32>, i32 -> vector<2x256xf32>
    %c11 = arith.constant 11 : index
    %c0_39 = arith.constant 0 : index
    %c0_40 = arith.constant 0 : index
    %82 = vector.load %arg3[%c11, %c0_39, %c0_40] : memref<49x2x256xf32, #tpu.memory_space<vmem>>, vector<1x2x256xf32>
    %83 = vector.shape_cast %82 : vector<1x2x256xf32> to vector<2x256xf32>
    %84 = arith.mulf %81, %83 : vector<2x256xf32>
    %85 = arith.addf %75, %84 : vector<2x256xf32>
    %c30_i32 = arith.constant 30 : i32
    %86 = tpu.dynamic_rotate %23 by %c30_i32 dim 1 : vector<2x256xf32>, i32 -> vector<2x256xf32>
    %c12 = arith.constant 12 : index
    %c0_41 = arith.constant 0 : index
    %c0_42 = arith.constant 0 : index
    %87 = vector.load %arg3[%c12, %c0_41, %c0_42] : memref<49x2x256xf32, #tpu.memory_space<vmem>>, vector<1x2x256xf32>
    %88 = vector.shape_cast %87 : vector<1x2x256xf32> to vector<2x256xf32>
    %89 = arith.mulf %86, %88 : vector<2x256xf32>
    %90 = arith.addf %80, %89 : vector<2x256xf32>
    %c29_i32 = arith.constant 29 : i32
    %91 = tpu.dynamic_rotate %23 by %c29_i32 dim 1 : vector<2x256xf32>, i32 -> vector<2x256xf32>
    %c13 = arith.constant 13 : index
    %c0_43 = arith.constant 0 : index
    %c0_44 = arith.constant 0 : index
    %92 = vector.load %arg3[%c13, %c0_43, %c0_44] : memref<49x2x256xf32, #tpu.memory_space<vmem>>, vector<1x2x256xf32>
    %93 = vector.shape_cast %92 : vector<1x2x256xf32> to vector<2x256xf32>
    %94 = arith.mulf %91, %93 : vector<2x256xf32>
    %95 = arith.addf %85, %94 : vector<2x256xf32>
    %c19_i32 = arith.constant 19 : i32
    %96 = tpu.dynamic_rotate %23 by %c19_i32 dim 1 : vector<2x256xf32>, i32 -> vector<2x256xf32>
    %c14 = arith.constant 14 : index
    %c0_45 = arith.constant 0 : index
    %c0_46 = arith.constant 0 : index
    %97 = vector.load %arg3[%c14, %c0_45, %c0_46] : memref<49x2x256xf32, #tpu.memory_space<vmem>>, vector<1x2x256xf32>
    %98 = vector.shape_cast %97 : vector<1x2x256xf32> to vector<2x256xf32>
    %99 = arith.mulf %96, %98 : vector<2x256xf32>
    %100 = arith.addf %90, %99 : vector<2x256xf32>
    %c18_i32 = arith.constant 18 : i32
    %101 = tpu.dynamic_rotate %23 by %c18_i32 dim 1 : vector<2x256xf32>, i32 -> vector<2x256xf32>
    %c15 = arith.constant 15 : index
    %c0_47 = arith.constant 0 : index
    %c0_48 = arith.constant 0 : index
    %102 = vector.load %arg3[%c15, %c0_47, %c0_48] : memref<49x2x256xf32, #tpu.memory_space<vmem>>, vector<1x2x256xf32>
    %103 = vector.shape_cast %102 : vector<1x2x256xf32> to vector<2x256xf32>
    %104 = arith.mulf %101, %103 : vector<2x256xf32>
    %105 = arith.addf %95, %104 : vector<2x256xf32>
    %c17_i32 = arith.constant 17 : i32
    %106 = tpu.dynamic_rotate %23 by %c17_i32 dim 1 : vector<2x256xf32>, i32 -> vector<2x256xf32>
    %c16 = arith.constant 16 : index
    %c0_49 = arith.constant 0 : index
    %c0_50 = arith.constant 0 : index
    %107 = vector.load %arg3[%c16, %c0_49, %c0_50] : memref<49x2x256xf32, #tpu.memory_space<vmem>>, vector<1x2x256xf32>
    %108 = vector.shape_cast %107 : vector<1x2x256xf32> to vector<2x256xf32>
    %109 = arith.mulf %106, %108 : vector<2x256xf32>
    %110 = arith.addf %100, %109 : vector<2x256xf32>
    %c16_i32 = arith.constant 16 : i32
    %111 = tpu.dynamic_rotate %23 by %c16_i32 dim 1 : vector<2x256xf32>, i32 -> vector<2x256xf32>
    %c17 = arith.constant 17 : index
    %c0_51 = arith.constant 0 : index
    %c0_52 = arith.constant 0 : index
    %112 = vector.load %arg3[%c17, %c0_51, %c0_52] : memref<49x2x256xf32, #tpu.memory_space<vmem>>, vector<1x2x256xf32>
    %113 = vector.shape_cast %112 : vector<1x2x256xf32> to vector<2x256xf32>
    %114 = arith.mulf %111, %113 : vector<2x256xf32>
    %115 = arith.addf %105, %114 : vector<2x256xf32>
    %c15_i32 = arith.constant 15 : i32
    %116 = tpu.dynamic_rotate %23 by %c15_i32 dim 1 : vector<2x256xf32>, i32 -> vector<2x256xf32>
    %c18 = arith.constant 18 : index
    %c0_53 = arith.constant 0 : index
    %c0_54 = arith.constant 0 : index
    %117 = vector.load %arg3[%c18, %c0_53, %c0_54] : memref<49x2x256xf32, #tpu.memory_space<vmem>>, vector<1x2x256xf32>
    %118 = vector.shape_cast %117 : vector<1x2x256xf32> to vector<2x256xf32>
    %119 = arith.mulf %116, %118 : vector<2x256xf32>
    %120 = arith.addf %110, %119 : vector<2x256xf32>
    %c14_i32 = arith.constant 14 : i32
    %121 = tpu.dynamic_rotate %23 by %c14_i32 dim 1 : vector<2x256xf32>, i32 -> vector<2x256xf32>
    %c19 = arith.constant 19 : index
    %c0_55 = arith.constant 0 : index
    %c0_56 = arith.constant 0 : index
    %122 = vector.load %arg3[%c19, %c0_55, %c0_56] : memref<49x2x256xf32, #tpu.memory_space<vmem>>, vector<1x2x256xf32>
    %123 = vector.shape_cast %122 : vector<1x2x256xf32> to vector<2x256xf32>
    %124 = arith.mulf %121, %123 : vector<2x256xf32>
    %125 = arith.addf %115, %124 : vector<2x256xf32>
    %c13_i32 = arith.constant 13 : i32
    %126 = tpu.dynamic_rotate %23 by %c13_i32 dim 1 : vector<2x256xf32>, i32 -> vector<2x256xf32>
    %c20 = arith.constant 20 : index
    %c0_57 = arith.constant 0 : index
    %c0_58 = arith.constant 0 : index
    %127 = vector.load %arg3[%c20, %c0_57, %c0_58] : memref<49x2x256xf32, #tpu.memory_space<vmem>>, vector<1x2x256xf32>
    %128 = vector.shape_cast %127 : vector<1x2x256xf32> to vector<2x256xf32>
    %129 = arith.mulf %126, %128 : vector<2x256xf32>
    %130 = arith.addf %120, %129 : vector<2x256xf32>
    %c3_i32 = arith.constant 3 : i32
    %131 = tpu.dynamic_rotate %23 by %c3_i32 dim 1 : vector<2x256xf32>, i32 -> vector<2x256xf32>
    %c21 = arith.constant 21 : index
    %c0_59 = arith.constant 0 : index
    %c0_60 = arith.constant 0 : index
    %132 = vector.load %arg3[%c21, %c0_59, %c0_60] : memref<49x2x256xf32, #tpu.memory_space<vmem>>, vector<1x2x256xf32>
    %133 = vector.shape_cast %132 : vector<1x2x256xf32> to vector<2x256xf32>
    %134 = arith.mulf %131, %133 : vector<2x256xf32>
    %135 = arith.addf %125, %134 : vector<2x256xf32>
    %c2_i32 = arith.constant 2 : i32
    %136 = tpu.dynamic_rotate %23 by %c2_i32 dim 1 : vector<2x256xf32>, i32 -> vector<2x256xf32>
    %c22 = arith.constant 22 : index
    %c0_61 = arith.constant 0 : index
    %c0_62 = arith.constant 0 : index
    %137 = vector.load %arg3[%c22, %c0_61, %c0_62] : memref<49x2x256xf32, #tpu.memory_space<vmem>>, vector<1x2x256xf32>
    %138 = vector.shape_cast %137 : vector<1x2x256xf32> to vector<2x256xf32>
    %139 = arith.mulf %136, %138 : vector<2x256xf32>
    %140 = arith.addf %130, %139 : vector<2x256xf32>
    %c1_i32 = arith.constant 1 : i32
    %141 = tpu.dynamic_rotate %23 by %c1_i32 dim 1 : vector<2x256xf32>, i32 -> vector<2x256xf32>
    %c23 = arith.constant 23 : index
    %c0_63 = arith.constant 0 : index
    %c0_64 = arith.constant 0 : index
    %142 = vector.load %arg3[%c23, %c0_63, %c0_64] : memref<49x2x256xf32, #tpu.memory_space<vmem>>, vector<1x2x256xf32>
    %143 = vector.shape_cast %142 : vector<1x2x256xf32> to vector<2x256xf32>
    %144 = arith.mulf %141, %143 : vector<2x256xf32>
    %145 = arith.addf %135, %144 : vector<2x256xf32>
    %c24 = arith.constant 24 : index
    %c0_65 = arith.constant 0 : index
    %c0_66 = arith.constant 0 : index
    %146 = vector.load %arg3[%c24, %c0_65, %c0_66] : memref<49x2x256xf32, #tpu.memory_space<vmem>>, vector<1x2x256xf32>
    %147 = vector.shape_cast %146 : vector<1x2x256xf32> to vector<2x256xf32>
    %148 = arith.mulf %23, %147 : vector<2x256xf32>
    %149 = arith.addf %140, %148 : vector<2x256xf32>
    %c255_i32 = arith.constant 255 : i32
    %150 = tpu.dynamic_rotate %23 by %c255_i32 dim 1 : vector<2x256xf32>, i32 -> vector<2x256xf32>
    %c25 = arith.constant 25 : index
    %c0_67 = arith.constant 0 : index
    %c0_68 = arith.constant 0 : index
    %151 = vector.load %arg3[%c25, %c0_67, %c0_68] : memref<49x2x256xf32, #tpu.memory_space<vmem>>, vector<1x2x256xf32>
    %152 = vector.shape_cast %151 : vector<1x2x256xf32> to vector<2x256xf32>
    %153 = arith.mulf %150, %152 : vector<2x256xf32>
    %154 = arith.addf %145, %153 : vector<2x256xf32>
    %c254_i32 = arith.constant 254 : i32
    %155 = tpu.dynamic_rotate %23 by %c254_i32 dim 1 : vector<2x256xf32>, i32 -> vector<2x256xf32>
    %c26 = arith.constant 26 : index
    %c0_69 = arith.constant 0 : index
    %c0_70 = arith.constant 0 : index
    %156 = vector.load %arg3[%c26, %c0_69, %c0_70] : memref<49x2x256xf32, #tpu.memory_space<vmem>>, vector<1x2x256xf32>
    %157 = vector.shape_cast %156 : vector<1x2x256xf32> to vector<2x256xf32>
    %158 = arith.mulf %155, %157 : vector<2x256xf32>
    %159 = arith.addf %149, %158 : vector<2x256xf32>
    %c253_i32 = arith.constant 253 : i32
    %160 = tpu.dynamic_rotate %23 by %c253_i32 dim 1 : vector<2x256xf32>, i32 -> vector<2x256xf32>
    %c27 = arith.constant 27 : index
    %c0_71 = arith.constant 0 : index
    %c0_72 = arith.constant 0 : index
    %161 = vector.load %arg3[%c27, %c0_71, %c0_72] : memref<49x2x256xf32, #tpu.memory_space<vmem>>, vector<1x2x256xf32>
    %162 = vector.shape_cast %161 : vector<1x2x256xf32> to vector<2x256xf32>
    %163 = arith.mulf %160, %162 : vector<2x256xf32>
    %164 = arith.addf %154, %163 : vector<2x256xf32>
    %c243_i32 = arith.constant 243 : i32
    %165 = tpu.dynamic_rotate %23 by %c243_i32 dim 1 : vector<2x256xf32>, i32 -> vector<2x256xf32>
    %c28 = arith.constant 28 : index
    %c0_73 = arith.constant 0 : index
    %c0_74 = arith.constant 0 : index
    %166 = vector.load %arg3[%c28, %c0_73, %c0_74] : memref<49x2x256xf32, #tpu.memory_space<vmem>>, vector<1x2x256xf32>
    %167 = vector.shape_cast %166 : vector<1x2x256xf32> to vector<2x256xf32>
    %168 = arith.mulf %165, %167 : vector<2x256xf32>
    %169 = arith.addf %159, %168 : vector<2x256xf32>
    %c242_i32 = arith.constant 242 : i32
    %170 = tpu.dynamic_rotate %23 by %c242_i32 dim 1 : vector<2x256xf32>, i32 -> vector<2x256xf32>
    %c29 = arith.constant 29 : index
    %c0_75 = arith.constant 0 : index
    %c0_76 = arith.constant 0 : index
    %171 = vector.load %arg3[%c29, %c0_75, %c0_76] : memref<49x2x256xf32, #tpu.memory_space<vmem>>, vector<1x2x256xf32>
    %172 = vector.shape_cast %171 : vector<1x2x256xf32> to vector<2x256xf32>
    %173 = arith.mulf %170, %172 : vector<2x256xf32>
    %174 = arith.addf %164, %173 : vector<2x256xf32>
    %c241_i32 = arith.constant 241 : i32
    %175 = tpu.dynamic_rotate %23 by %c241_i32 dim 1 : vector<2x256xf32>, i32 -> vector<2x256xf32>
    %c30 = arith.constant 30 : index
    %c0_77 = arith.constant 0 : index
    %c0_78 = arith.constant 0 : index
    %176 = vector.load %arg3[%c30, %c0_77, %c0_78] : memref<49x2x256xf32, #tpu.memory_space<vmem>>, vector<1x2x256xf32>
    %177 = vector.shape_cast %176 : vector<1x2x256xf32> to vector<2x256xf32>
    %178 = arith.mulf %175, %177 : vector<2x256xf32>
    %179 = arith.addf %169, %178 : vector<2x256xf32>
    %c240_i32 = arith.constant 240 : i32
    %180 = tpu.dynamic_rotate %23 by %c240_i32 dim 1 : vector<2x256xf32>, i32 -> vector<2x256xf32>
    %c31 = arith.constant 31 : index
    %c0_79 = arith.constant 0 : index
    %c0_80 = arith.constant 0 : index
    %181 = vector.load %arg3[%c31, %c0_79, %c0_80] : memref<49x2x256xf32, #tpu.memory_space<vmem>>, vector<1x2x256xf32>
    %182 = vector.shape_cast %181 : vector<1x2x256xf32> to vector<2x256xf32>
    %183 = arith.mulf %180, %182 : vector<2x256xf32>
    %184 = arith.addf %174, %183 : vector<2x256xf32>
    %c239_i32 = arith.constant 239 : i32
    %185 = tpu.dynamic_rotate %23 by %c239_i32 dim 1 : vector<2x256xf32>, i32 -> vector<2x256xf32>
    %c32 = arith.constant 32 : index
    %c0_81 = arith.constant 0 : index
    %c0_82 = arith.constant 0 : index
    %186 = vector.load %arg3[%c32, %c0_81, %c0_82] : memref<49x2x256xf32, #tpu.memory_space<vmem>>, vector<1x2x256xf32>
    %187 = vector.shape_cast %186 : vector<1x2x256xf32> to vector<2x256xf32>
    %188 = arith.mulf %185, %187 : vector<2x256xf32>
    %189 = arith.addf %179, %188 : vector<2x256xf32>
    %c238_i32 = arith.constant 238 : i32
    %190 = tpu.dynamic_rotate %23 by %c238_i32 dim 1 : vector<2x256xf32>, i32 -> vector<2x256xf32>
    %c33 = arith.constant 33 : index
    %c0_83 = arith.constant 0 : index
    %c0_84 = arith.constant 0 : index
    %191 = vector.load %arg3[%c33, %c0_83, %c0_84] : memref<49x2x256xf32, #tpu.memory_space<vmem>>, vector<1x2x256xf32>
    %192 = vector.shape_cast %191 : vector<1x2x256xf32> to vector<2x256xf32>
    %193 = arith.mulf %190, %192 : vector<2x256xf32>
    %194 = arith.addf %184, %193 : vector<2x256xf32>
    %c237_i32 = arith.constant 237 : i32
    %195 = tpu.dynamic_rotate %23 by %c237_i32 dim 1 : vector<2x256xf32>, i32 -> vector<2x256xf32>
    %c34 = arith.constant 34 : index
    %c0_85 = arith.constant 0 : index
    %c0_86 = arith.constant 0 : index
    %196 = vector.load %arg3[%c34, %c0_85, %c0_86] : memref<49x2x256xf32, #tpu.memory_space<vmem>>, vector<1x2x256xf32>
    %197 = vector.shape_cast %196 : vector<1x2x256xf32> to vector<2x256xf32>
    %198 = arith.mulf %195, %197 : vector<2x256xf32>
    %199 = arith.addf %189, %198 : vector<2x256xf32>
    %c227_i32 = arith.constant 227 : i32
    %200 = tpu.dynamic_rotate %23 by %c227_i32 dim 1 : vector<2x256xf32>, i32 -> vector<2x256xf32>
    %c35 = arith.constant 35 : index
    %c0_87 = arith.constant 0 : index
    %c0_88 = arith.constant 0 : index
    %201 = vector.load %arg3[%c35, %c0_87, %c0_88] : memref<49x2x256xf32, #tpu.memory_space<vmem>>, vector<1x2x256xf32>
    %202 = vector.shape_cast %201 : vector<1x2x256xf32> to vector<2x256xf32>
    %203 = arith.mulf %200, %202 : vector<2x256xf32>
    %204 = arith.addf %194, %203 : vector<2x256xf32>
    %c226_i32 = arith.constant 226 : i32
    %205 = tpu.dynamic_rotate %23 by %c226_i32 dim 1 : vector<2x256xf32>, i32 -> vector<2x256xf32>
    %c36 = arith.constant 36 : index
    %c0_89 = arith.constant 0 : index
    %c0_90 = arith.constant 0 : index
    %206 = vector.load %arg3[%c36, %c0_89, %c0_90] : memref<49x2x256xf32, #tpu.memory_space<vmem>>, vector<1x2x256xf32>
    %207 = vector.shape_cast %206 : vector<1x2x256xf32> to vector<2x256xf32>
    %208 = arith.mulf %205, %207 : vector<2x256xf32>
    %209 = arith.addf %199, %208 : vector<2x256xf32>
    %c225_i32 = arith.constant 225 : i32
    %210 = tpu.dynamic_rotate %23 by %c225_i32 dim 1 : vector<2x256xf32>, i32 -> vector<2x256xf32>
    %c37 = arith.constant 37 : index
    %c0_91 = arith.constant 0 : index
    %c0_92 = arith.constant 0 : index
    %211 = vector.load %arg3[%c37, %c0_91, %c0_92] : memref<49x2x256xf32, #tpu.memory_space<vmem>>, vector<1x2x256xf32>
    %212 = vector.shape_cast %211 : vector<1x2x256xf32> to vector<2x256xf32>
    %213 = arith.mulf %210, %212 : vector<2x256xf32>
    %214 = arith.addf %204, %213 : vector<2x256xf32>
    %c224_i32 = arith.constant 224 : i32
    %215 = tpu.dynamic_rotate %23 by %c224_i32 dim 1 : vector<2x256xf32>, i32 -> vector<2x256xf32>
    %c38 = arith.constant 38 : index
    %c0_93 = arith.constant 0 : index
    %c0_94 = arith.constant 0 : index
    %216 = vector.load %arg3[%c38, %c0_93, %c0_94] : memref<49x2x256xf32, #tpu.memory_space<vmem>>, vector<1x2x256xf32>
    %217 = vector.shape_cast %216 : vector<1x2x256xf32> to vector<2x256xf32>
    %218 = arith.mulf %215, %217 : vector<2x256xf32>
    %219 = arith.addf %209, %218 : vector<2x256xf32>
    %c223_i32 = arith.constant 223 : i32
    %220 = tpu.dynamic_rotate %23 by %c223_i32 dim 1 : vector<2x256xf32>, i32 -> vector<2x256xf32>
    %c39 = arith.constant 39 : index
    %c0_95 = arith.constant 0 : index
    %c0_96 = arith.constant 0 : index
    %221 = vector.load %arg3[%c39, %c0_95, %c0_96] : memref<49x2x256xf32, #tpu.memory_space<vmem>>, vector<1x2x256xf32>
    %222 = vector.shape_cast %221 : vector<1x2x256xf32> to vector<2x256xf32>
    %223 = arith.mulf %220, %222 : vector<2x256xf32>
    %224 = arith.addf %214, %223 : vector<2x256xf32>
    %c222_i32 = arith.constant 222 : i32
    %225 = tpu.dynamic_rotate %23 by %c222_i32 dim 1 : vector<2x256xf32>, i32 -> vector<2x256xf32>
    %c40 = arith.constant 40 : index
    %c0_97 = arith.constant 0 : index
    %c0_98 = arith.constant 0 : index
    %226 = vector.load %arg3[%c40, %c0_97, %c0_98] : memref<49x2x256xf32, #tpu.memory_space<vmem>>, vector<1x2x256xf32>
    %227 = vector.shape_cast %226 : vector<1x2x256xf32> to vector<2x256xf32>
    %228 = arith.mulf %225, %227 : vector<2x256xf32>
    %229 = arith.addf %219, %228 : vector<2x256xf32>
    %c221_i32 = arith.constant 221 : i32
    %230 = tpu.dynamic_rotate %23 by %c221_i32 dim 1 : vector<2x256xf32>, i32 -> vector<2x256xf32>
    %c41 = arith.constant 41 : index
    %c0_99 = arith.constant 0 : index
    %c0_100 = arith.constant 0 : index
    %231 = vector.load %arg3[%c41, %c0_99, %c0_100] : memref<49x2x256xf32, #tpu.memory_space<vmem>>, vector<1x2x256xf32>
    %232 = vector.shape_cast %231 : vector<1x2x256xf32> to vector<2x256xf32>
    %233 = arith.mulf %230, %232 : vector<2x256xf32>
    %234 = arith.addf %224, %233 : vector<2x256xf32>
    %c211_i32 = arith.constant 211 : i32
    %235 = tpu.dynamic_rotate %23 by %c211_i32 dim 1 : vector<2x256xf32>, i32 -> vector<2x256xf32>
    %c42 = arith.constant 42 : index
    %c0_101 = arith.constant 0 : index
    %c0_102 = arith.constant 0 : index
    %236 = vector.load %arg3[%c42, %c0_101, %c0_102] : memref<49x2x256xf32, #tpu.memory_space<vmem>>, vector<1x2x256xf32>
    %237 = vector.shape_cast %236 : vector<1x2x256xf32> to vector<2x256xf32>
    %238 = arith.mulf %235, %237 : vector<2x256xf32>
    %239 = arith.addf %229, %238 : vector<2x256xf32>
    %c210_i32 = arith.constant 210 : i32
    %240 = tpu.dynamic_rotate %23 by %c210_i32 dim 1 : vector<2x256xf32>, i32 -> vector<2x256xf32>
    %c43 = arith.constant 43 : index
    %c0_103 = arith.constant 0 : index
    %c0_104 = arith.constant 0 : index
    %241 = vector.load %arg3[%c43, %c0_103, %c0_104] : memref<49x2x256xf32, #tpu.memory_space<vmem>>, vector<1x2x256xf32>
    %242 = vector.shape_cast %241 : vector<1x2x256xf32> to vector<2x256xf32>
    %243 = arith.mulf %240, %242 : vector<2x256xf32>
    %244 = arith.addf %234, %243 : vector<2x256xf32>
    %c209_i32 = arith.constant 209 : i32
    %245 = tpu.dynamic_rotate %23 by %c209_i32 dim 1 : vector<2x256xf32>, i32 -> vector<2x256xf32>
    %c44 = arith.constant 44 : index
    %c0_105 = arith.constant 0 : index
    %c0_106 = arith.constant 0 : index
    %246 = vector.load %arg3[%c44, %c0_105, %c0_106] : memref<49x2x256xf32, #tpu.memory_space<vmem>>, vector<1x2x256xf32>
    %247 = vector.shape_cast %246 : vector<1x2x256xf32> to vector<2x256xf32>
    %248 = arith.mulf %245, %247 : vector<2x256xf32>
    %249 = arith.addf %239, %248 : vector<2x256xf32>
    %c208_i32 = arith.constant 208 : i32
    %250 = tpu.dynamic_rotate %23 by %c208_i32 dim 1 : vector<2x256xf32>, i32 -> vector<2x256xf32>
    %c45 = arith.constant 45 : index
    %c0_107 = arith.constant 0 : index
    %c0_108 = arith.constant 0 : index
    %251 = vector.load %arg3[%c45, %c0_107, %c0_108] : memref<49x2x256xf32, #tpu.memory_space<vmem>>, vector<1x2x256xf32>
    %252 = vector.shape_cast %251 : vector<1x2x256xf32> to vector<2x256xf32>
    %253 = arith.mulf %250, %252 : vector<2x256xf32>
    %254 = arith.addf %244, %253 : vector<2x256xf32>
    %c207_i32 = arith.constant 207 : i32
    %255 = tpu.dynamic_rotate %23 by %c207_i32 dim 1 : vector<2x256xf32>, i32 -> vector<2x256xf32>
    %c46 = arith.constant 46 : index
    %c0_109 = arith.constant 0 : index
    %c0_110 = arith.constant 0 : index
    %256 = vector.load %arg3[%c46, %c0_109, %c0_110] : memref<49x2x256xf32, #tpu.memory_space<vmem>>, vector<1x2x256xf32>
    %257 = vector.shape_cast %256 : vector<1x2x256xf32> to vector<2x256xf32>
    %258 = arith.mulf %255, %257 : vector<2x256xf32>
    %259 = arith.addf %249, %258 : vector<2x256xf32>
    %c206_i32 = arith.constant 206 : i32
    %260 = tpu.dynamic_rotate %23 by %c206_i32 dim 1 : vector<2x256xf32>, i32 -> vector<2x256xf32>
    %c47 = arith.constant 47 : index
    %c0_111 = arith.constant 0 : index
    %c0_112 = arith.constant 0 : index
    %261 = vector.load %arg3[%c47, %c0_111, %c0_112] : memref<49x2x256xf32, #tpu.memory_space<vmem>>, vector<1x2x256xf32>
    %262 = vector.shape_cast %261 : vector<1x2x256xf32> to vector<2x256xf32>
    %263 = arith.mulf %260, %262 : vector<2x256xf32>
    %264 = arith.addf %254, %263 : vector<2x256xf32>
    %c205_i32 = arith.constant 205 : i32
    %265 = tpu.dynamic_rotate %23 by %c205_i32 dim 1 : vector<2x256xf32>, i32 -> vector<2x256xf32>
    %c48 = arith.constant 48 : index
    %c0_113 = arith.constant 0 : index
    %c0_114 = arith.constant 0 : index
    %266 = vector.load %arg3[%c48, %c0_113, %c0_114] : memref<49x2x256xf32, #tpu.memory_space<vmem>>, vector<1x2x256xf32>
    %267 = vector.shape_cast %266 : vector<1x2x256xf32> to vector<2x256xf32>
    %268 = arith.mulf %265, %267 : vector<2x256xf32>
    %269 = arith.addf %259, %268 : vector<2x256xf32>
    %270 = arith.addf %269, %264 : vector<2x256xf32>
    %cst_115 = arith.constant dense<0.000000e+00> : vector<256xf32>
    %271 = vector.multi_reduction <add>, %270, %cst_115 [0] : vector<2x256xf32> to vector<256xf32>
    %272 = vector.shape_cast %271 : vector<256xf32> to vector<1x256xf32>
    %273 = vector.broadcast %1 : f32 to vector<1x256xf32>
    %274 = arith.addf %272, %273 : vector<1x256xf32>
    %275 = arith.negf %274 : vector<1x256xf32>
    %276 = math.exp %275 : vector<1x256xf32>
    %cst_116 = arith.constant 1.000000e+00 : f32
    %277 = vector.broadcast %cst_116 : f32 to vector<1x256xf32>
    %278 = arith.addf %277, %276 : vector<1x256xf32>
    %279 = arith.divf %277, %278 : vector<1x256xf32>
    %c0_117 = arith.constant 0 : index
    %c0_118 = arith.constant 0 : index
    %c0_119 = arith.constant 0 : index
    %280 = vector.load %arg5[%c0_117, %c0_118, %c0_119] : memref<2x32x256xf32, #tpu.memory_space<vmem>>, vector<1x32x256xf32>
    %281 = vector.shape_cast %280 : vector<1x32x256xf32> to vector<32x256xf32>
    %282 = vector.broadcast %279 : vector<1x256xf32> to vector<32x256xf32>
    %283 = arith.mulf %281, %282 : vector<32x256xf32>
    %c0_120 = arith.constant 0 : index
    %c0_121 = arith.constant 0 : index
    %c0_122 = arith.constant 0 : index
    %284 = vector.load %arg5[%c0_120, %c0_121, %c0_122] : memref<2x32x256xf32, #tpu.memory_space<vmem>>, vector<1x32x256xf32>
    %285 = vector.shape_cast %284 : vector<1x32x256xf32> to vector<32x256xf32>
    %286 = vector.shape_cast %283 : vector<32x256xf32> to vector<1x32x256xf32>
    tpu.vector_store %arg5[%c0_120, %c0_121, %c0_122], %286 {strides = array<i32>} : memref<2x32x256xf32, #tpu.memory_space<vmem>>, vector<1x32x256xf32>,
    %c1_123 = arith.constant 1 : index
    %c0_124 = arith.constant 0 : index
    %c0_125 = arith.constant 0 : index
    %287 = vector.load %arg1[%c1_123, %c0_124, %c0_125] : memref<2x32x256xf32, #tpu.memory_space<vmem>>, vector<1x32x256xf32>
    %288 = vector.shape_cast %287 : vector<1x32x256xf32> to vector<32x256xf32>
    %cst_126 = arith.constant dense<0.000000e+00> : vector<32xf32>
    %289 = vector.multi_reduction <add>, %288, %cst_126 [1] : vector<32x256xf32> to vector<32xf32>
    %290 = vector.shape_cast %289 : vector<32xf32> to vector<32x1xf32>
    %cst_127 = arith.constant 3.906250e-03 : f32
    %291 = vector.broadcast %cst_127 : f32 to vector<32x1xf32>
    %292 = arith.mulf %290, %291 : vector<32x1xf32>
    %cst_128 = arith.constant dense<0.000000e+00> : vector<32x1xf32>
    %293 = tpu.matmul %0, %292, %cst_128 {dimension_numbers = #tpu.dot_dimension_numbers<[1], [0], [0], [1], [0, 0, 1, 1], [], []>} : vector<32x32xf32>, vector<32x1xf32>, vector<32x1xf32> -> vector<32x1xf32>
    %294 = arith.negf %293 : vector<32x1xf32>
    %295 = math.exp %294 : vector<32x1xf32>
    %cst_129 = arith.constant 1.000000e+00 : f32
    %296 = vector.broadcast %cst_129 : f32 to vector<32x1xf32>
    %297 = arith.addf %296, %295 : vector<32x1xf32>
    %298 = arith.divf %296, %297 : vector<32x1xf32>
    %299 = vector.broadcast %298 : vector<32x1xf32> to vector<32x256xf32>
    %300 = arith.mulf %288, %299 : vector<32x256xf32>
    %c1_130 = arith.constant 1 : index
    %c0_131 = arith.constant 0 : index
    %c0_132 = arith.constant 0 : index
    %301 = vector.load %arg5[%c1_130, %c0_131, %c0_132] : memref<2x32x256xf32, #tpu.memory_space<vmem>>, vector<1x32x256xf32>
    %302 = vector.shape_cast %301 : vector<1x32x256xf32> to vector<32x256xf32>
    %303 = vector.shape_cast %300 : vector<32x256xf32> to vector<1x32x256xf32>
    tpu.vector_store %arg5[%c1_130, %c0_131, %c0_132], %303 {strides = array<i32>} : memref<2x32x256xf32, #tpu.memory_space<vmem>>, vector<1x32x256xf32>,
    %cst_133 = arith.constant dense<0.000000e+00> : vector<1x256xf32>
    %304 = tpu.matmul %2, %300, %cst_133 {dimension_numbers = #tpu.dot_dimension_numbers<[1], [0], [0], [1], [0, 0, 1, 1], [], []>} : vector<1x32xf32>, vector<32x256xf32>, vector<1x256xf32> -> vector<1x256xf32>
    %cst_134 = arith.constant dense<0xFF800000> : vector<256xf32>
    %305 = vector.multi_reduction <maximumf>, %300, %cst_134 [0] : vector<32x256xf32> to vector<256xf32>
    %306 = vector.shape_cast %305 : vector<256xf32> to vector<1x256xf32>
    %307 = tpu.concatenate %304, %306 in 0 : vector<1x256xf32>, vector<1x256xf32> -> vector<2x256xf32>
    %cst_135 = arith.constant 0.000000e+00 : f32
    %308 = vector.broadcast %cst_135 : f32 to vector<2x256xf32>
    %cst_136 = arith.constant 0.000000e+00 : f32
    %309 = vector.broadcast %cst_136 : f32 to vector<2x256xf32>
    %c51_i32_137 = arith.constant 51 : i32
    %310 = tpu.dynamic_rotate %307 by %c51_i32_137 dim 1 : vector<2x256xf32>, i32 -> vector<2x256xf32>
    %c0_138 = arith.constant 0 : index
    %c0_139 = arith.constant 0 : index
    %c0_140 = arith.constant 0 : index
    %311 = vector.load %arg3[%c0_138, %c0_139, %c0_140] : memref<49x2x256xf32, #tpu.memory_space<vmem>>, vector<1x2x256xf32>
    %312 = vector.shape_cast %311 : vector<1x2x256xf32> to vector<2x256xf32>
    %313 = arith.mulf %310, %312 : vector<2x256xf32>
    %314 = arith.addf %308, %313 : vector<2x256xf32>
    %c50_i32_141 = arith.constant 50 : i32
    %315 = tpu.dynamic_rotate %307 by %c50_i32_141 dim 1 : vector<2x256xf32>, i32 -> vector<2x256xf32>
    %c1_142 = arith.constant 1 : index
    %c0_143 = arith.constant 0 : index
    %c0_144 = arith.constant 0 : index
    %316 = vector.load %arg3[%c1_142, %c0_143, %c0_144] : memref<49x2x256xf32, #tpu.memory_space<vmem>>, vector<1x2x256xf32>
    %317 = vector.shape_cast %316 : vector<1x2x256xf32> to vector<2x256xf32>
    %318 = arith.mulf %315, %317 : vector<2x256xf32>
    %319 = arith.addf %309, %318 : vector<2x256xf32>
    %c49_i32_145 = arith.constant 49 : i32
    %320 = tpu.dynamic_rotate %307 by %c49_i32_145 dim 1 : vector<2x256xf32>, i32 -> vector<2x256xf32>
    %c2_146 = arith.constant 2 : index
    %c0_147 = arith.constant 0 : index
    %c0_148 = arith.constant 0 : index
    %321 = vector.load %arg3[%c2_146, %c0_147, %c0_148] : memref<49x2x256xf32, #tpu.memory_space<vmem>>, vector<1x2x256xf32>
    %322 = vector.shape_cast %321 : vector<1x2x256xf32> to vector<2x256xf32>
    %323 = arith.mulf %320, %322 : vector<2x256xf32>
    %324 = arith.addf %314, %323 : vector<2x256xf32>
    %c48_i32_149 = arith.constant 48 : i32
    %325 = tpu.dynamic_rotate %307 by %c48_i32_149 dim 1 : vector<2x256xf32>, i32 -> vector<2x256xf32>
    %c3_150 = arith.constant 3 : index
    %c0_151 = arith.constant 0 : index
    %c0_152 = arith.constant 0 : index
    %326 = vector.load %arg3[%c3_150, %c0_151, %c0_152] : memref<49x2x256xf32, #tpu.memory_space<vmem>>, vector<1x2x256xf32>
    %327 = vector.shape_cast %326 : vector<1x2x256xf32> to vector<2x256xf32>
    %328 = arith.mulf %325, %327 : vector<2x256xf32>
    %329 = arith.addf %319, %328 : vector<2x256xf32>
    %c47_i32_153 = arith.constant 47 : i32
    %330 = tpu.dynamic_rotate %307 by %c47_i32_153 dim 1 : vector<2x256xf32>, i32 -> vector<2x256xf32>
    %c4_154 = arith.constant 4 : index
    %c0_155 = arith.constant 0 : index
    %c0_156 = arith.constant 0 : index
    %331 = vector.load %arg3[%c4_154, %c0_155, %c0_156] : memref<49x2x256xf32, #tpu.memory_space<vmem>>, vector<1x2x256xf32>
    %332 = vector.shape_cast %331 : vector<1x2x256xf32> to vector<2x256xf32>
    %333 = arith.mulf %330, %332 : vector<2x256xf32>
    %334 = arith.addf %324, %333 : vector<2x256xf32>
    %c46_i32_157 = arith.constant 46 : i32
    %335 = tpu.dynamic_rotate %307 by %c46_i32_157 dim 1 : vector<2x256xf32>, i32 -> vector<2x256xf32>
    %c5_158 = arith.constant 5 : index
    %c0_159 = arith.constant 0 : index
    %c0_160 = arith.constant 0 : index
    %336 = vector.load %arg3[%c5_158, %c0_159, %c0_160] : memref<49x2x256xf32, #tpu.memory_space<vmem>>, vector<1x2x256xf32>
    %337 = vector.shape_cast %336 : vector<1x2x256xf32> to vector<2x256xf32>
    %338 = arith.mulf %335, %337 : vector<2x256xf32>
    %339 = arith.addf %329, %338 : vector<2x256xf32>
    %c45_i32_161 = arith.constant 45 : i32
    %340 = tpu.dynamic_rotate %307 by %c45_i32_161 dim 1 : vector<2x256xf32>, i32 -> vector<2x256xf32>
    %c6_162 = arith.constant 6 : index
    %c0_163 = arith.constant 0 : index
    %c0_164 = arith.constant 0 : index
    %341 = vector.load %arg3[%c6_162, %c0_163, %c0_164] : memref<49x2x256xf32, #tpu.memory_space<vmem>>, vector<1x2x256xf32>
    %342 = vector.shape_cast %341 : vector<1x2x256xf32> to vector<2x256xf32>
    %343 = arith.mulf %340, %342 : vector<2x256xf32>
    %344 = arith.addf %334, %343 : vector<2x256xf32>
    %c35_i32_165 = arith.constant 35 : i32
    %345 = tpu.dynamic_rotate %307 by %c35_i32_165 dim 1 : vector<2x256xf32>, i32 -> vector<2x256xf32>
    %c7_166 = arith.constant 7 : index
    %c0_167 = arith.constant 0 : index
    %c0_168 = arith.constant 0 : index
    %346 = vector.load %arg3[%c7_166, %c0_167, %c0_168] : memref<49x2x256xf32, #tpu.memory_space<vmem>>, vector<1x2x256xf32>
    %347 = vector.shape_cast %346 : vector<1x2x256xf32> to vector<2x256xf32>
    %348 = arith.mulf %345, %347 : vector<2x256xf32>
    %349 = arith.addf %339, %348 : vector<2x256xf32>
    %c34_i32_169 = arith.constant 34 : i32
    %350 = tpu.dynamic_rotate %307 by %c34_i32_169 dim 1 : vector<2x256xf32>, i32 -> vector<2x256xf32>
    %c8_170 = arith.constant 8 : index
    %c0_171 = arith.constant 0 : index
    %c0_172 = arith.constant 0 : index
    %351 = vector.load %arg3[%c8_170, %c0_171, %c0_172] : memref<49x2x256xf32, #tpu.memory_space<vmem>>, vector<1x2x256xf32>
    %352 = vector.shape_cast %351 : vector<1x2x256xf32> to vector<2x256xf32>
    %353 = arith.mulf %350, %352 : vector<2x256xf32>
    %354 = arith.addf %344, %353 : vector<2x256xf32>
    %c33_i32_173 = arith.constant 33 : i32
    %355 = tpu.dynamic_rotate %307 by %c33_i32_173 dim 1 : vector<2x256xf32>, i32 -> vector<2x256xf32>
    %c9_174 = arith.constant 9 : index
    %c0_175 = arith.constant 0 : index
    %c0_176 = arith.constant 0 : index
    %356 = vector.load %arg3[%c9_174, %c0_175, %c0_176] : memref<49x2x256xf32, #tpu.memory_space<vmem>>, vector<1x2x256xf32>
    %357 = vector.shape_cast %356 : vector<1x2x256xf32> to vector<2x256xf32>
    %358 = arith.mulf %355, %357 : vector<2x256xf32>
    %359 = arith.addf %349, %358 : vector<2x256xf32>
    %c32_i32_177 = arith.constant 32 : i32
    %360 = tpu.dynamic_rotate %307 by %c32_i32_177 dim 1 : vector<2x256xf32>, i32 -> vector<2x256xf32>
    %c10_178 = arith.constant 10 : index
    %c0_179 = arith.constant 0 : index
    %c0_180 = arith.constant 0 : index
    %361 = vector.load %arg3[%c10_178, %c0_179, %c0_180] : memref<49x2x256xf32, #tpu.memory_space<vmem>>, vector<1x2x256xf32>
    %362 = vector.shape_cast %361 : vector<1x2x256xf32> to vector<2x256xf32>
    %363 = arith.mulf %360, %362 : vector<2x256xf32>
    %364 = arith.addf %354, %363 : vector<2x256xf32>
    %c31_i32_181 = arith.constant 31 : i32
    %365 = tpu.dynamic_rotate %307 by %c31_i32_181 dim 1 : vector<2x256xf32>, i32 -> vector<2x256xf32>
    %c11_182 = arith.constant 11 : index
    %c0_183 = arith.constant 0 : index
    %c0_184 = arith.constant 0 : index
    %366 = vector.load %arg3[%c11_182, %c0_183, %c0_184] : memref<49x2x256xf32, #tpu.memory_space<vmem>>, vector<1x2x256xf32>
    %367 = vector.shape_cast %366 : vector<1x2x256xf32> to vector<2x256xf32>
    %368 = arith.mulf %365, %367 : vector<2x256xf32>
    %369 = arith.addf %359, %368 : vector<2x256xf32>
    %c30_i32_185 = arith.constant 30 : i32
    %370 = tpu.dynamic_rotate %307 by %c30_i32_185 dim 1 : vector<2x256xf32>, i32 -> vector<2x256xf32>
    %c12_186 = arith.constant 12 : index
    %c0_187 = arith.constant 0 : index
    %c0_188 = arith.constant 0 : index
    %371 = vector.load %arg3[%c12_186, %c0_187, %c0_188] : memref<49x2x256xf32, #tpu.memory_space<vmem>>, vector<1x2x256xf32>
    %372 = vector.shape_cast %371 : vector<1x2x256xf32> to vector<2x256xf32>
    %373 = arith.mulf %370, %372 : vector<2x256xf32>
    %374 = arith.addf %364, %373 : vector<2x256xf32>
    %c29_i32_189 = arith.constant 29 : i32
    %375 = tpu.dynamic_rotate %307 by %c29_i32_189 dim 1 : vector<2x256xf32>, i32 -> vector<2x256xf32>
    %c13_190 = arith.constant 13 : index
    %c0_191 = arith.constant 0 : index
    %c0_192 = arith.constant 0 : index
    %376 = vector.load %arg3[%c13_190, %c0_191, %c0_192] : memref<49x2x256xf32, #tpu.memory_space<vmem>>, vector<1x2x256xf32>
    %377 = vector.shape_cast %376 : vector<1x2x256xf32> to vector<2x256xf32>
    %378 = arith.mulf %375, %377 : vector<2x256xf32>
    %379 = arith.addf %369, %378 : vector<2x256xf32>
    %c19_i32_193 = arith.constant 19 : i32
    %380 = tpu.dynamic_rotate %307 by %c19_i32_193 dim 1 : vector<2x256xf32>, i32 -> vector<2x256xf32>
    %c14_194 = arith.constant 14 : index
    %c0_195 = arith.constant 0 : index
    %c0_196 = arith.constant 0 : index
    %381 = vector.load %arg3[%c14_194, %c0_195, %c0_196] : memref<49x2x256xf32, #tpu.memory_space<vmem>>, vector<1x2x256xf32>
    %382 = vector.shape_cast %381 : vector<1x2x256xf32> to vector<2x256xf32>
    %383 = arith.mulf %380, %382 : vector<2x256xf32>
    %384 = arith.addf %374, %383 : vector<2x256xf32>
    %c18_i32_197 = arith.constant 18 : i32
    %385 = tpu.dynamic_rotate %307 by %c18_i32_197 dim 1 : vector<2x256xf32>, i32 -> vector<2x256xf32>
    %c15_198 = arith.constant 15 : index
    %c0_199 = arith.constant 0 : index
    %c0_200 = arith.constant 0 : index
    %386 = vector.load %arg3[%c15_198, %c0_199, %c0_200] : memref<49x2x256xf32, #tpu.memory_space<vmem>>, vector<1x2x256xf32>
    %387 = vector.shape_cast %386 : vector<1x2x256xf32> to vector<2x256xf32>
    %388 = arith.mulf %385, %387 : vector<2x256xf32>
    %389 = arith.addf %379, %388 : vector<2x256xf32>
    %c17_i32_201 = arith.constant 17 : i32
    %390 = tpu.dynamic_rotate %307 by %c17_i32_201 dim 1 : vector<2x256xf32>, i32 -> vector<2x256xf32>
    %c16_202 = arith.constant 16 : index
    %c0_203 = arith.constant 0 : index
    %c0_204 = arith.constant 0 : index
    %391 = vector.load %arg3[%c16_202, %c0_203, %c0_204] : memref<49x2x256xf32, #tpu.memory_space<vmem>>, vector<1x2x256xf32>
    %392 = vector.shape_cast %391 : vector<1x2x256xf32> to vector<2x256xf32>
    %393 = arith.mulf %390, %392 : vector<2x256xf32>
    %394 = arith.addf %384, %393 : vector<2x256xf32>
    %c16_i32_205 = arith.constant 16 : i32
    %395 = tpu.dynamic_rotate %307 by %c16_i32_205 dim 1 : vector<2x256xf32>, i32 -> vector<2x256xf32>
    %c17_206 = arith.constant 17 : index
    %c0_207 = arith.constant 0 : index
    %c0_208 = arith.constant 0 : index
    %396 = vector.load %arg3[%c17_206, %c0_207, %c0_208] : memref<49x2x256xf32, #tpu.memory_space<vmem>>, vector<1x2x256xf32>
    %397 = vector.shape_cast %396 : vector<1x2x256xf32> to vector<2x256xf32>
    %398 = arith.mulf %395, %397 : vector<2x256xf32>
    %399 = arith.addf %389, %398 : vector<2x256xf32>
    %c15_i32_209 = arith.constant 15 : i32
    %400 = tpu.dynamic_rotate %307 by %c15_i32_209 dim 1 : vector<2x256xf32>, i32 -> vector<2x256xf32>
    %c18_210 = arith.constant 18 : index
    %c0_211 = arith.constant 0 : index
    %c0_212 = arith.constant 0 : index
    %401 = vector.load %arg3[%c18_210, %c0_211, %c0_212] : memref<49x2x256xf32, #tpu.memory_space<vmem>>, vector<1x2x256xf32>
    %402 = vector.shape_cast %401 : vector<1x2x256xf32> to vector<2x256xf32>
    %403 = arith.mulf %400, %402 : vector<2x256xf32>
    %404 = arith.addf %394, %403 : vector<2x256xf32>
    %c14_i32_213 = arith.constant 14 : i32
    %405 = tpu.dynamic_rotate %307 by %c14_i32_213 dim 1 : vector<2x256xf32>, i32 -> vector<2x256xf32>
    %c19_214 = arith.constant 19 : index
    %c0_215 = arith.constant 0 : index
    %c0_216 = arith.constant 0 : index
    %406 = vector.load %arg3[%c19_214, %c0_215, %c0_216] : memref<49x2x256xf32, #tpu.memory_space<vmem>>, vector<1x2x256xf32>
    %407 = vector.shape_cast %406 : vector<1x2x256xf32> to vector<2x256xf32>
    %408 = arith.mulf %405, %407 : vector<2x256xf32>
    %409 = arith.addf %399, %408 : vector<2x256xf32>
    %c13_i32_217 = arith.constant 13 : i32
    %410 = tpu.dynamic_rotate %307 by %c13_i32_217 dim 1 : vector<2x256xf32>, i32 -> vector<2x256xf32>
    %c20_218 = arith.constant 20 : index
    %c0_219 = arith.constant 0 : index
    %c0_220 = arith.constant 0 : index
    %411 = vector.load %arg3[%c20_218, %c0_219, %c0_220] : memref<49x2x256xf32, #tpu.memory_space<vmem>>, vector<1x2x256xf32>
    %412 = vector.shape_cast %411 : vector<1x2x256xf32> to vector<2x256xf32>
    %413 = arith.mulf %410, %412 : vector<2x256xf32>
    %414 = arith.addf %404, %413 : vector<2x256xf32>
    %c3_i32_221 = arith.constant 3 : i32
    %415 = tpu.dynamic_rotate %307 by %c3_i32_221 dim 1 : vector<2x256xf32>, i32 -> vector<2x256xf32>
    %c21_222 = arith.constant 21 : index
    %c0_223 = arith.constant 0 : index
    %c0_224 = arith.constant 0 : index
    %416 = vector.load %arg3[%c21_222, %c0_223, %c0_224] : memref<49x2x256xf32, #tpu.memory_space<vmem>>, vector<1x2x256xf32>
    %417 = vector.shape_cast %416 : vector<1x2x256xf32> to vector<2x256xf32>
    %418 = arith.mulf %415, %417 : vector<2x256xf32>
    %419 = arith.addf %409, %418 : vector<2x256xf32>
    %c2_i32_225 = arith.constant 2 : i32
    %420 = tpu.dynamic_rotate %307 by %c2_i32_225 dim 1 : vector<2x256xf32>, i32 -> vector<2x256xf32>
    %c22_226 = arith.constant 22 : index
    %c0_227 = arith.constant 0 : index
    %c0_228 = arith.constant 0 : index
    %421 = vector.load %arg3[%c22_226, %c0_227, %c0_228] : memref<49x2x256xf32, #tpu.memory_space<vmem>>, vector<1x2x256xf32>
    %422 = vector.shape_cast %421 : vector<1x2x256xf32> to vector<2x256xf32>
    %423 = arith.mulf %420, %422 : vector<2x256xf32>
    %424 = arith.addf %414, %423 : vector<2x256xf32>
    %c1_i32_229 = arith.constant 1 : i32
    %425 = tpu.dynamic_rotate %307 by %c1_i32_229 dim 1 : vector<2x256xf32>, i32 -> vector<2x256xf32>
    %c23_230 = arith.constant 23 : index
    %c0_231 = arith.constant 0 : index
    %c0_232 = arith.constant 0 : index
    %426 = vector.load %arg3[%c23_230, %c0_231, %c0_232] : memref<49x2x256xf32, #tpu.memory_space<vmem>>, vector<1x2x256xf32>
    %427 = vector.shape_cast %426 : vector<1x2x256xf32> to vector<2x256xf32>
    %428 = arith.mulf %425, %427 : vector<2x256xf32>
    %429 = arith.addf %419, %428 : vector<2x256xf32>
    %c24_233 = arith.constant 24 : index
    %c0_234 = arith.constant 0 : index
    %c0_235 = arith.constant 0 : index
    %430 = vector.load %arg3[%c24_233, %c0_234, %c0_235] : memref<49x2x256xf32, #tpu.memory_space<vmem>>, vector<1x2x256xf32>
    %431 = vector.shape_cast %430 : vector<1x2x256xf32> to vector<2x256xf32>
    %432 = arith.mulf %307, %431 : vector<2x256xf32>
    %433 = arith.addf %424, %432 : vector<2x256xf32>
    %c255_i32_236 = arith.constant 255 : i32
    %434 = tpu.dynamic_rotate %307 by %c255_i32_236 dim 1 : vector<2x256xf32>, i32 -> vector<2x256xf32>
    %c25_237 = arith.constant 25 : index
    %c0_238 = arith.constant 0 : index
    %c0_239 = arith.constant 0 : index
    %435 = vector.load %arg3[%c25_237, %c0_238, %c0_239] : memref<49x2x256xf32, #tpu.memory_space<vmem>>, vector<1x2x256xf32>
    %436 = vector.shape_cast %435 : vector<1x2x256xf32> to vector<2x256xf32>
    %437 = arith.mulf %434, %436 : vector<2x256xf32>
    %438 = arith.addf %429, %437 : vector<2x256xf32>
    %c254_i32_240 = arith.constant 254 : i32
    %439 = tpu.dynamic_rotate %307 by %c254_i32_240 dim 1 : vector<2x256xf32>, i32 -> vector<2x256xf32>
    %c26_241 = arith.constant 26 : index
    %c0_242 = arith.constant 0 : index
    %c0_243 = arith.constant 0 : index
    %440 = vector.load %arg3[%c26_241, %c0_242, %c0_243] : memref<49x2x256xf32, #tpu.memory_space<vmem>>, vector<1x2x256xf32>
    %441 = vector.shape_cast %440 : vector<1x2x256xf32> to vector<2x256xf32>
    %442 = arith.mulf %439, %441 : vector<2x256xf32>
    %443 = arith.addf %433, %442 : vector<2x256xf32>
    %c253_i32_244 = arith.constant 253 : i32
    %444 = tpu.dynamic_rotate %307 by %c253_i32_244 dim 1 : vector<2x256xf32>, i32 -> vector<2x256xf32>
    %c27_245 = arith.constant 27 : index
    %c0_246 = arith.constant 0 : index
    %c0_247 = arith.constant 0 : index
    %445 = vector.load %arg3[%c27_245, %c0_246, %c0_247] : memref<49x2x256xf32, #tpu.memory_space<vmem>>, vector<1x2x256xf32>
    %446 = vector.shape_cast %445 : vector<1x2x256xf32> to vector<2x256xf32>
    %447 = arith.mulf %444, %446 : vector<2x256xf32>
    %448 = arith.addf %438, %447 : vector<2x256xf32>
    %c243_i32_248 = arith.constant 243 : i32
    %449 = tpu.dynamic_rotate %307 by %c243_i32_248 dim 1 : vector<2x256xf32>, i32 -> vector<2x256xf32>
    %c28_249 = arith.constant 28 : index
    %c0_250 = arith.constant 0 : index
    %c0_251 = arith.constant 0 : index
    %450 = vector.load %arg3[%c28_249, %c0_250, %c0_251] : memref<49x2x256xf32, #tpu.memory_space<vmem>>, vector<1x2x256xf32>
    %451 = vector.shape_cast %450 : vector<1x2x256xf32> to vector<2x256xf32>
    %452 = arith.mulf %449, %451 : vector<2x256xf32>
    %453 = arith.addf %443, %452 : vector<2x256xf32>
    %c242_i32_252 = arith.constant 242 : i32
    %454 = tpu.dynamic_rotate %307 by %c242_i32_252 dim 1 : vector<2x256xf32>, i32 -> vector<2x256xf32>
    %c29_253 = arith.constant 29 : index
    %c0_254 = arith.constant 0 : index
    %c0_255 = arith.constant 0 : index
    %455 = vector.load %arg3[%c29_253, %c0_254, %c0_255] : memref<49x2x256xf32, #tpu.memory_space<vmem>>, vector<1x2x256xf32>
    %456 = vector.shape_cast %455 : vector<1x2x256xf32> to vector<2x256xf32>
    %457 = arith.mulf %454, %456 : vector<2x256xf32>
    %458 = arith.addf %448, %457 : vector<2x256xf32>
    %c241_i32_256 = arith.constant 241 : i32
    %459 = tpu.dynamic_rotate %307 by %c241_i32_256 dim 1 : vector<2x256xf32>, i32 -> vector<2x256xf32>
    %c30_257 = arith.constant 30 : index
    %c0_258 = arith.constant 0 : index
    %c0_259 = arith.constant 0 : index
    %460 = vector.load %arg3[%c30_257, %c0_258, %c0_259] : memref<49x2x256xf32, #tpu.memory_space<vmem>>, vector<1x2x256xf32>
    %461 = vector.shape_cast %460 : vector<1x2x256xf32> to vector<2x256xf32>
    %462 = arith.mulf %459, %461 : vector<2x256xf32>
    %463 = arith.addf %453, %462 : vector<2x256xf32>
    %c240_i32_260 = arith.constant 240 : i32
    %464 = tpu.dynamic_rotate %307 by %c240_i32_260 dim 1 : vector<2x256xf32>, i32 -> vector<2x256xf32>
    %c31_261 = arith.constant 31 : index
    %c0_262 = arith.constant 0 : index
    %c0_263 = arith.constant 0 : index
    %465 = vector.load %arg3[%c31_261, %c0_262, %c0_263] : memref<49x2x256xf32, #tpu.memory_space<vmem>>, vector<1x2x256xf32>
    %466 = vector.shape_cast %465 : vector<1x2x256xf32> to vector<2x256xf32>
    %467 = arith.mulf %464, %466 : vector<2x256xf32>
    %468 = arith.addf %458, %467 : vector<2x256xf32>
    %c239_i32_264 = arith.constant 239 : i32
    %469 = tpu.dynamic_rotate %307 by %c239_i32_264 dim 1 : vector<2x256xf32>, i32 -> vector<2x256xf32>
    %c32_265 = arith.constant 32 : index
    %c0_266 = arith.constant 0 : index
    %c0_267 = arith.constant 0 : index
    %470 = vector.load %arg3[%c32_265, %c0_266, %c0_267] : memref<49x2x256xf32, #tpu.memory_space<vmem>>, vector<1x2x256xf32>
    %471 = vector.shape_cast %470 : vector<1x2x256xf32> to vector<2x256xf32>
    %472 = arith.mulf %469, %471 : vector<2x256xf32>
    %473 = arith.addf %463, %472 : vector<2x256xf32>
    %c238_i32_268 = arith.constant 238 : i32
    %474 = tpu.dynamic_rotate %307 by %c238_i32_268 dim 1 : vector<2x256xf32>, i32 -> vector<2x256xf32>
    %c33_269 = arith.constant 33 : index
    %c0_270 = arith.constant 0 : index
    %c0_271 = arith.constant 0 : index
    %475 = vector.load %arg3[%c33_269, %c0_270, %c0_271] : memref<49x2x256xf32, #tpu.memory_space<vmem>>, vector<1x2x256xf32>
    %476 = vector.shape_cast %475 : vector<1x2x256xf32> to vector<2x256xf32>
    %477 = arith.mulf %474, %476 : vector<2x256xf32>
    %478 = arith.addf %468, %477 : vector<2x256xf32>
    %c237_i32_272 = arith.constant 237 : i32
    %479 = tpu.dynamic_rotate %307 by %c237_i32_272 dim 1 : vector<2x256xf32>, i32 -> vector<2x256xf32>
    %c34_273 = arith.constant 34 : index
    %c0_274 = arith.constant 0 : index
    %c0_275 = arith.constant 0 : index
    %480 = vector.load %arg3[%c34_273, %c0_274, %c0_275] : memref<49x2x256xf32, #tpu.memory_space<vmem>>, vector<1x2x256xf32>
    %481 = vector.shape_cast %480 : vector<1x2x256xf32> to vector<2x256xf32>
    %482 = arith.mulf %479, %481 : vector<2x256xf32>
    %483 = arith.addf %473, %482 : vector<2x256xf32>
    %c227_i32_276 = arith.constant 227 : i32
    %484 = tpu.dynamic_rotate %307 by %c227_i32_276 dim 1 : vector<2x256xf32>, i32 -> vector<2x256xf32>
    %c35_277 = arith.constant 35 : index
    %c0_278 = arith.constant 0 : index
    %c0_279 = arith.constant 0 : index
    %485 = vector.load %arg3[%c35_277, %c0_278, %c0_279] : memref<49x2x256xf32, #tpu.memory_space<vmem>>, vector<1x2x256xf32>
    %486 = vector.shape_cast %485 : vector<1x2x256xf32> to vector<2x256xf32>
    %487 = arith.mulf %484, %486 : vector<2x256xf32>
    %488 = arith.addf %478, %487 : vector<2x256xf32>
    %c226_i32_280 = arith.constant 226 : i32
    %489 = tpu.dynamic_rotate %307 by %c226_i32_280 dim 1 : vector<2x256xf32>, i32 -> vector<2x256xf32>
    %c36_281 = arith.constant 36 : index
    %c0_282 = arith.constant 0 : index
    %c0_283 = arith.constant 0 : index
    %490 = vector.load %arg3[%c36_281, %c0_282, %c0_283] : memref<49x2x256xf32, #tpu.memory_space<vmem>>, vector<1x2x256xf32>
    %491 = vector.shape_cast %490 : vector<1x2x256xf32> to vector<2x256xf32>
    %492 = arith.mulf %489, %491 : vector<2x256xf32>
    %493 = arith.addf %483, %492 : vector<2x256xf32>
    %c225_i32_284 = arith.constant 225 : i32
    %494 = tpu.dynamic_rotate %307 by %c225_i32_284 dim 1 : vector<2x256xf32>, i32 -> vector<2x256xf32>
    %c37_285 = arith.constant 37 : index
    %c0_286 = arith.constant 0 : index
    %c0_287 = arith.constant 0 : index
    %495 = vector.load %arg3[%c37_285, %c0_286, %c0_287] : memref<49x2x256xf32, #tpu.memory_space<vmem>>, vector<1x2x256xf32>
    %496 = vector.shape_cast %495 : vector<1x2x256xf32> to vector<2x256xf32>
    %497 = arith.mulf %494, %496 : vector<2x256xf32>
    %498 = arith.addf %488, %497 : vector<2x256xf32>
    %c224_i32_288 = arith.constant 224 : i32
    %499 = tpu.dynamic_rotate %307 by %c224_i32_288 dim 1 : vector<2x256xf32>, i32 -> vector<2x256xf32>
    %c38_289 = arith.constant 38 : index
    %c0_290 = arith.constant 0 : index
    %c0_291 = arith.constant 0 : index
    %500 = vector.load %arg3[%c38_289, %c0_290, %c0_291] : memref<49x2x256xf32, #tpu.memory_space<vmem>>, vector<1x2x256xf32>
    %501 = vector.shape_cast %500 : vector<1x2x256xf32> to vector<2x256xf32>
    %502 = arith.mulf %499, %501 : vector<2x256xf32>
    %503 = arith.addf %493, %502 : vector<2x256xf32>
    %c223_i32_292 = arith.constant 223 : i32
    %504 = tpu.dynamic_rotate %307 by %c223_i32_292 dim 1 : vector<2x256xf32>, i32 -> vector<2x256xf32>
    %c39_293 = arith.constant 39 : index
    %c0_294 = arith.constant 0 : index
    %c0_295 = arith.constant 0 : index
    %505 = vector.load %arg3[%c39_293, %c0_294, %c0_295] : memref<49x2x256xf32, #tpu.memory_space<vmem>>, vector<1x2x256xf32>
    %506 = vector.shape_cast %505 : vector<1x2x256xf32> to vector<2x256xf32>
    %507 = arith.mulf %504, %506 : vector<2x256xf32>
    %508 = arith.addf %498, %507 : vector<2x256xf32>
    %c222_i32_296 = arith.constant 222 : i32
    %509 = tpu.dynamic_rotate %307 by %c222_i32_296 dim 1 : vector<2x256xf32>, i32 -> vector<2x256xf32>
    %c40_297 = arith.constant 40 : index
    %c0_298 = arith.constant 0 : index
    %c0_299 = arith.constant 0 : index
    %510 = vector.load %arg3[%c40_297, %c0_298, %c0_299] : memref<49x2x256xf32, #tpu.memory_space<vmem>>, vector<1x2x256xf32>
    %511 = vector.shape_cast %510 : vector<1x2x256xf32> to vector<2x256xf32>
    %512 = arith.mulf %509, %511 : vector<2x256xf32>
    %513 = arith.addf %503, %512 : vector<2x256xf32>
    %c221_i32_300 = arith.constant 221 : i32
    %514 = tpu.dynamic_rotate %307 by %c221_i32_300 dim 1 : vector<2x256xf32>, i32 -> vector<2x256xf32>
    %c41_301 = arith.constant 41 : index
    %c0_302 = arith.constant 0 : index
    %c0_303 = arith.constant 0 : index
    %515 = vector.load %arg3[%c41_301, %c0_302, %c0_303] : memref<49x2x256xf32, #tpu.memory_space<vmem>>, vector<1x2x256xf32>
    %516 = vector.shape_cast %515 : vector<1x2x256xf32> to vector<2x256xf32>
    %517 = arith.mulf %514, %516 : vector<2x256xf32>
    %518 = arith.addf %508, %517 : vector<2x256xf32>
    %c211_i32_304 = arith.constant 211 : i32
    %519 = tpu.dynamic_rotate %307 by %c211_i32_304 dim 1 : vector<2x256xf32>, i32 -> vector<2x256xf32>
    %c42_305 = arith.constant 42 : index
    %c0_306 = arith.constant 0 : index
    %c0_307 = arith.constant 0 : index
    %520 = vector.load %arg3[%c42_305, %c0_306, %c0_307] : memref<49x2x256xf32, #tpu.memory_space<vmem>>, vector<1x2x256xf32>
    %521 = vector.shape_cast %520 : vector<1x2x256xf32> to vector<2x256xf32>
    %522 = arith.mulf %519, %521 : vector<2x256xf32>
    %523 = arith.addf %513, %522 : vector<2x256xf32>
    %c210_i32_308 = arith.constant 210 : i32
    %524 = tpu.dynamic_rotate %307 by %c210_i32_308 dim 1 : vector<2x256xf32>, i32 -> vector<2x256xf32>
    %c43_309 = arith.constant 43 : index
    %c0_310 = arith.constant 0 : index
    %c0_311 = arith.constant 0 : index
    %525 = vector.load %arg3[%c43_309, %c0_310, %c0_311] : memref<49x2x256xf32, #tpu.memory_space<vmem>>, vector<1x2x256xf32>
    %526 = vector.shape_cast %525 : vector<1x2x256xf32> to vector<2x256xf32>
    %527 = arith.mulf %524, %526 : vector<2x256xf32>
    %528 = arith.addf %518, %527 : vector<2x256xf32>
    %c209_i32_312 = arith.constant 209 : i32
    %529 = tpu.dynamic_rotate %307 by %c209_i32_312 dim 1 : vector<2x256xf32>, i32 -> vector<2x256xf32>
    %c44_313 = arith.constant 44 : index
    %c0_314 = arith.constant 0 : index
    %c0_315 = arith.constant 0 : index
    %530 = vector.load %arg3[%c44_313, %c0_314, %c0_315] : memref<49x2x256xf32, #tpu.memory_space<vmem>>, vector<1x2x256xf32>
    %531 = vector.shape_cast %530 : vector<1x2x256xf32> to vector<2x256xf32>
    %532 = arith.mulf %529, %531 : vector<2x256xf32>
    %533 = arith.addf %523, %532 : vector<2x256xf32>
    %c208_i32_316 = arith.constant 208 : i32
    %534 = tpu.dynamic_rotate %307 by %c208_i32_316 dim 1 : vector<2x256xf32>, i32 -> vector<2x256xf32>
    %c45_317 = arith.constant 45 : index
    %c0_318 = arith.constant 0 : index
    %c0_319 = arith.constant 0 : index
    %535 = vector.load %arg3[%c45_317, %c0_318, %c0_319] : memref<49x2x256xf32, #tpu.memory_space<vmem>>, vector<1x2x256xf32>
    %536 = vector.shape_cast %535 : vector<1x2x256xf32> to vector<2x256xf32>
    %537 = arith.mulf %534, %536 : vector<2x256xf32>
    %538 = arith.addf %528, %537 : vector<2x256xf32>
    %c207_i32_320 = arith.constant 207 : i32
    %539 = tpu.dynamic_rotate %307 by %c207_i32_320 dim 1 : vector<2x256xf32>, i32 -> vector<2x256xf32>
    %c46_321 = arith.constant 46 : index
    %c0_322 = arith.constant 0 : index
    %c0_323 = arith.constant 0 : index
    %540 = vector.load %arg3[%c46_321, %c0_322, %c0_323] : memref<49x2x256xf32, #tpu.memory_space<vmem>>, vector<1x2x256xf32>
    %541 = vector.shape_cast %540 : vector<1x2x256xf32> to vector<2x256xf32>
    %542 = arith.mulf %539, %541 : vector<2x256xf32>
    %543 = arith.addf %533, %542 : vector<2x256xf32>
    %c206_i32_324 = arith.constant 206 : i32
    %544 = tpu.dynamic_rotate %307 by %c206_i32_324 dim 1 : vector<2x256xf32>, i32 -> vector<2x256xf32>
    %c47_325 = arith.constant 47 : index
    %c0_326 = arith.constant 0 : index
    %c0_327 = arith.constant 0 : index
    %545 = vector.load %arg3[%c47_325, %c0_326, %c0_327] : memref<49x2x256xf32, #tpu.memory_space<vmem>>, vector<1x2x256xf32>
    %546 = vector.shape_cast %545 : vector<1x2x256xf32> to vector<2x256xf32>
    %547 = arith.mulf %544, %546 : vector<2x256xf32>
    %548 = arith.addf %538, %547 : vector<2x256xf32>
    %c205_i32_328 = arith.constant 205 : i32
    %549 = tpu.dynamic_rotate %307 by %c205_i32_328 dim 1 : vector<2x256xf32>, i32 -> vector<2x256xf32>
    %c48_329 = arith.constant 48 : index
    %c0_330 = arith.constant 0 : index
    %c0_331 = arith.constant 0 : index
    %550 = vector.load %arg3[%c48_329, %c0_330, %c0_331] : memref<49x2x256xf32, #tpu.memory_space<vmem>>, vector<1x2x256xf32>
    %551 = vector.shape_cast %550 : vector<1x2x256xf32> to vector<2x256xf32>
    %552 = arith.mulf %549, %551 : vector<2x256xf32>
    %553 = arith.addf %543, %552 : vector<2x256xf32>
    %554 = arith.addf %553, %548 : vector<2x256xf32>
    %cst_332 = arith.constant dense<0.000000e+00> : vector<256xf32>
    %555 = vector.multi_reduction <add>, %554, %cst_332 [0] : vector<2x256xf32> to vector<256xf32>
    %556 = vector.shape_cast %555 : vector<256xf32> to vector<1x256xf32>
    %557 = vector.broadcast %1 : f32 to vector<1x256xf32>
    %558 = arith.addf %556, %557 : vector<1x256xf32>
    %559 = arith.negf %558 : vector<1x256xf32>
    %560 = math.exp %559 : vector<1x256xf32>
    %cst_333 = arith.constant 1.000000e+00 : f32
    %561 = vector.broadcast %cst_333 : f32 to vector<1x256xf32>
    %562 = arith.addf %561, %560 : vector<1x256xf32>
    %563 = arith.divf %561, %562 : vector<1x256xf32>
    %c1_334 = arith.constant 1 : index
    %c0_335 = arith.constant 0 : index
    %c0_336 = arith.constant 0 : index
    %564 = vector.load %arg5[%c1_334, %c0_335, %c0_336] : memref<2x32x256xf32, #tpu.memory_space<vmem>>, vector<1x32x256xf32>
    %565 = vector.shape_cast %564 : vector<1x32x256xf32> to vector<32x256xf32>
    %566 = vector.broadcast %563 : vector<1x256xf32> to vector<32x256xf32>
    %567 = arith.mulf %565, %566 : vector<32x256xf32>
    %c1_337 = arith.constant 1 : index
    %c0_338 = arith.constant 0 : index
    %c0_339 = arith.constant 0 : index
    %568 = vector.load %arg5[%c1_337, %c0_338, %c0_339] : memref<2x32x256xf32, #tpu.memory_space<vmem>>, vector<1x32x256xf32>
    %569 = vector.shape_cast %568 : vector<1x32x256xf32> to vector<32x256xf32>
    %570 = vector.shape_cast %567 : vector<32x256xf32> to vector<1x32x256xf32>
    tpu.vector_store %arg5[%c1_337, %c0_338, %c0_339], %570 {strides = array<i32>} : memref<2x32x256xf32, #tpu.memory_space<vmem>>, vector<1x32x256xf32>,
    return
  }
  func.func @transform_0(%arg0: i32) -> (i32, i32, i32) {
    %c0_i32 = arith.constant 0 : i32
    %c0_i32_0 = arith.constant 0 : i32
    %c0_i32_1 = arith.constant 0 : i32
    return %arg0, %c0_i32, %c0_i32_0 : i32, i32, i32
  }
  func.func @transform_1(%arg0: i32) -> (i32, i32) {
    %c0_i32 = arith.constant 0 : i32
    %c0_i32_0 = arith.constant 0 : i32
    %c0_i32_1 = arith.constant 0 : i32
    return %c0_i32, %c0_i32_0 : i32, i32
  }
  func.func @transform_2(%arg0: i32) -> (i32, i32, i32) {
    %c0_i32 = arith.constant 0 : i32
    %c0_i32_0 = arith.constant 0 : i32
    %c0_i32_1 = arith.constant 0 : i32
    %c0_i32_2 = arith.constant 0 : i32
    return %c0_i32, %c0_i32_0, %c0_i32_1 : i32, i32, i32
  }
  func.func @transform_3(%arg0: i32) -> i32 {
    %c0_i32 = arith.constant 0 : i32
    %c0_i32_0 = arith.constant 0 : i32
    return %c0_i32 : i32
  }
  func.func @transform_4(%arg0: i32) -> (i32, i32, i32) {
    %c0_i32 = arith.constant 0 : i32
    %c0_i32_0 = arith.constant 0 : i32
    %c0_i32_1 = arith.constant 0 : i32
    return %arg0, %c0_i32, %c0_i32_0 : i32, i32, i32
  }
}

</mosaic_0001>

<bundles_post_ra>
// kernel: _lambda_.1
= control target key start
LH: loop header
LB: loop body
LE: loop exit
PB: predicated region body
PF: predicated region fallthrough
CT: control target
= control target key end

     0   :  { %vm47_vm0 = vcmask 261120   ;;  %v3312_v44 = vmov 0   ;;  %vm297_vm1 = vcmask 1040384   ;;  %s3316_s28 = smov 50   ;;  %s3317_s29 = smov 49   ;;  %s6003_s0 = inlined_call_operand.vmem [shape: f32[2,32,256], index: 0, kind: input, shape index: {}]   ;;  %s6004_s1 = inlined_call_operand.vmem [shape: f32[32,32], index: 1, kind: input, shape index: {}]   ;;  %s6005_s2 = inlined_call_operand.vmem [shape: f32[49,2,256], index: 2, kind: input, shape index: {}]   ;;  %s6006_s3 = inlined_call_operand.<no memory space> [shape: f32[1], index: 3, kind: input, shape index: {}]   ;;  %s6007_s4 = inlined_call_operand.vmem [shape: f32[2,32,256], index: 4, kind: output, shape index: {}]  }
   0x1   :  { %v3391_v0 = vld [vmem:[%s6003_s0 + $0x30] sm:$0xff]  ;;  %v3396_v1 = vld [vmem:[%s6003_s0 + $0x38] sm:$0xff]  ;;  %v3401_v2 = vld [vmem:[%s6003_s0 + $0x20] sm:$0xff]  ;;  %3261 = vset.pattern.permute.xlu1 %v3312_v44  ;;  %3262 = vset.pattern.permute.xlu0 %v3312_v44  ;;  %s3318_s30 = smov 48   ;;  %s3319_s5 = smov 47  }
   0x2   :  { %v40_v3 = vadd.f32 %v3396_v1, %v3391_v0  ;;  %v3408_v4 = vld [vmem:[%s6003_s0 + $0x28] sm:$0xff]  ;;  %v3413_v5 = vld [vmem:[%s6003_s0 + $0x10] sm:$0xff]  ;;  %v3418_v6 = vld [vmem:[%s6003_s0 + $0x18] sm:$0xff]  ;;  %s3320_s6 = smov 46   ;;  %s3321_s7 = smov 45  }
   0x3   :  { %v34_v7 = vadd.f32 %v3418_v6, %v3413_v5  ;;  %v3425_v8 = vld [vmem:[%s6003_s0] sm:$0xff]  ;;  %v3430_v9 = vld [vmem:[%s6003_s0 + $0x8] sm:$0xff]  ;;  %v37_v10 = vadd.f32 %v3408_v4, %v3401_v2  ;;  %v3439_v12 = vld [vmem:[%s6003_s0 + $0x70] sm:$0xff]  ;;  %s3322_s8 = smov 35   ;;  %s3323_s9 = smov 34  }
   0x4   :  { %41 = vadd.xlane.f32.xlu0 %v40_v3  ;;  %v31_v11 = vadd.f32 %v3430_v9, %v3425_v8  ;;  %v3444_v13 = vld [vmem:[%s6003_s0 + $0x78] sm:$0xff]  ;;  %v3449_v14 = vld [vmem:[%s6003_s0 + $0x60] sm:$0xff]  ;;  %v3454_v15 = vld [vmem:[%s6003_s0 + $0x68] sm:$0xff]  ;;  %s3324_s10 = smov 33   ;;  %s3325_s11 = smov 32  }
   0x5   :  { %35 = vadd.xlane.f32.xlu1 %v34_v7  ;;  %v1544_v16 = vadd.f32 %v3444_v13, %v3439_v12  ;;  %v1541_v17 = vadd.f32 %v3454_v15, %v3449_v14  ;;  %v3463_v18 = vld [vmem:[%s6003_s0 + $0x50] sm:$0xff]  ;;  %v3468_v19 = vld [vmem:[%s6003_s0 + $0x58] sm:$0xff]  ;;  %v3473_v20 = vld [vmem:[%s6003_s0 + $0x40] sm:$0xff]  ;;  %s3326_s12 = smov 31   ;;  %s3327_s13 = smov 30  }
   0x6   :  { %v3478_v21 = vld [vmem:[%s6003_s0 + $0x48] sm:$0xff]  ;;  %v1538_v22 = vadd.f32 %v3468_v19, %v3463_v18  ;;  %v18_v24 = vld [vmem:[%s6004_s1] sm:$0xff]  ;;  %v20_v38 = vld [vmem:[%s6004_s1 + $0x10] sm:$0xff]  ;;  %s3328_s14 = smov 29   ;;  %s3329_s15 = smov 19  }
   0x7   :  { %v1535_v23 = vadd.f32 %v3478_v21, %v3473_v20  ;;  %3190 = vmatprep.mubr.msk.f32.mxu0 %vm47_vm0, %v18_v24  ;;  %v19_v36 = vld [vmem:[%s6004_s1 + $0x8] sm:$0xff]  ;;  %v21_v42 = vld [vmem:[%s6004_s1 + $0x18] sm:$0xff]  ;;  %s3315_s1 = smov 51   ;;  %s3330_s16 = smov 18  }
   0x8   :  { %38 = vadd.xlane.f32.xlu0 %v37_v10  ;;  %s3331_s17 = smov 17   ;;  %s3332_s18 = smov 16  }
   0x9   :  { %32 = vadd.xlane.f32.xlu1 %v31_v11  ;;  %s3333_s19 = smov 15   ;;  %s3334_s20 = smov 14  }
   0xa   :  { %s3335_s21 = smov 13   ;;  %s3336_s22 = smov 3  }
   0xb   :  { %s3337_s0 = smov 2   ;;  %s3338_s23 = smov 1  }
   0xc   :  { %1545 = vadd.xlane.f32.xlu0 %v1544_v16  ;;  %s6008_s24 = smov 127   ;;  %s6010_s25 = smov 126  }
   0xd   :  { %1542 = vadd.xlane.f32.xlu1 %v1541_v17  ;;  %s6012_s26 = smov 125   ;;  %s3342_s27 = smov 115  }
  0x10   :  { %1539 = vadd.xlane.f32.xlu0 %v1538_v22 }
  0x11   :  { %1536 = vadd.xlane.f32.xlu1 %v1535_v23 }
  0x8d   :  { %v42_v25 = vpop.xlane.xlu0 %41 }
  0x8e   :  { %v46_v26 = vmul.f32 0.00390625, %v42_v25  ;;  %v36_v27 = vpop.xlane.xlu1 %35 }
  0x8f   :  { %v44_v31 = vmul.f32 0.00390625, %v36_v27 }
  0x90   :  { %3182 = vmatprep.subr.mxu0 %v46_v26 }
  0x91   :  { %3183 = vmatpush3.msra.mxu0 %v46_v26  ;;  %v39_v28 = vpop.xlane.xlu0 %38 }
  0x92   :  { %v45_v29 = vmul.f32 0.00390625, %v39_v28  ;;  %v33_v30 = vpop.xlane.xlu1 %32 }
  0x93   :  { %v43_v32 = vmul.f32 0.00390625, %v33_v30 }
  0x94   :  { %3184 = vmatprep.subr.mxu0 %v45_v29 }
  0x95   :  { %3185 = vmatpush3.msra.mxu0 %v45_v29  ;;  %v1546_v33 = vpop.xlane.xlu0 %1545 }
  0x96   :  { %3186 = vmatprep.subr.mxu0 %v44_v31  ;;  %v1550_v34 = vmul.f32 0.00390625, %v1546_v33  ;;  %v1543_v35 = vpop.xlane.xlu1 %1542 }
  0x97   :  { %3187 = vmatpush3.msra.mxu0 %v44_v31  ;;  %v1549_v37 = vmul.f32 0.00390625, %v1543_v35  ;;  %v3313_v35 = vmov 0.0  }
  0x98   :  { %3188 = vmatprep.subr.mxu0 %v43_v32  ;;  %272 = vmatprep.mubr.f32.mxu1 %v3313_v35 }
  0x99   :  { %3189 = vmatpush3.msra.mxu0 %v43_v32  ;;  %v1540_v39 = vpop.xlane.xlu0 %1539 }
  0x9a   :  { %3191 = vmatmul.mubr.msk.f32.vlgmr.msra.gmra.mxu0 %vm47_vm0, %v19_v36  ;;  %3196 = vmatprep.subr.mxu0 %v1550_v34  ;;  %v1548_v40 = vmul.f32 0.00390625, %v1540_v39  ;;  %v1537_v41 = vpop.xlane.xlu1 %1536 }
  0x9b   :  { %3193 = vmatprep.mubr.msk.f32.mxu0 %vm47_vm0, %v20_v38  ;;  %3197 = vmatpush3.msra.mxu0 %v1550_v34  ;;  %v1547_v43 = vmul.f32 0.00390625, %v1537_v41 }
  0x9c   :  { %3198 = vmatprep.subr.mxu0 %v1549_v37 }
  0x9d   :  { %3199 = vmatpush3.msra.mxu0 %v1549_v37 }
  0x9e   :  { %3194 = vmatmul.mubr.msk.f32.gmra.mxu0 %vm47_vm0, %v21_v42  ;;  %3200 = vmatprep.subr.mxu0 %v1548_v40 }
  0x9f   :  { %3201 = vmatpush3.msra.mxu0 %v1548_v40  ;;  %3204 = vmatprep.mubr.msk.f32.mxu0 %vm47_vm0, %v18_v24 }
  0xa0   :  { %3202 = vmatprep.subr.mxu0 %v1547_v43 }
  0xa1   :  { %3203 = vmatpush3.msra.mxu0 %v1547_v43 }
  0xa2   :  { %3205 = vmatmul.mubr.msk.f32.vlgmr.msra.gmra.mxu0 %vm47_vm0, %v19_v36 }
  0xa3   :  { %3207 = vmatprep.mubr.msk.f32.mxu0 %vm47_vm0, %v20_v38 }
  0xa6   :  { %3208 = vmatmul.mubr.msk.f32.gmra.mxu0 %vm47_vm0, %v21_v42 }
 0x15a   :  { %v3192_v45 = vpop.f32.mrf.mxu0 }
 0x15b   :  { %v2923_v46 = vmul.f32 -1.442695, %v3192_v45 }
 0x15c   :  { %v126_v47 = vpop.f32.mrf.mxu0 }
 0x15d   :  { %3263 = vpow2.f32 %v2923_v46  ;;  %v2922_v48 = vmul.f32 -1.442695, %v126_v47 }
 0x15e   :  { %v3195_v49 = vpop.f32.mrf.mxu0 }
 0x15f   :  { %3265 = vpow2.f32 %v2922_v48  ;;  %v2925_v50 = vmul.f32 -1.442695, %v3195_v49 }
 0x160   :  { %v136_v51 = vpop.f32.mrf.mxu0 }
 0x161   :  { %3267 = vpow2.f32 %v2925_v50  ;;  %v2924_v52 = vmul.f32 -1.442695, %v136_v51 }
 0x162   :  { %v3206_v53 = vpop.f32.mrf.mxu0 }
 0x163   :  { %3269 = vpow2.f32 %v2924_v52  ;;  %v3039_v54 = vmul.f32 -1.442695, %v3206_v53 }
 0x164   :  { %v1617_v55 = vpop.f32.mrf.mxu0 }
 0x165   :  { %3271 = vpow2.f32 %v3039_v54  ;;  %v3038_v56 = vmul.f32 -1.442695, %v1617_v55 }
 0x166   :  { %v3209_v57 = vpop.f32.mrf.mxu0 }
 0x167   :  { %3273 = vpow2.f32 %v3038_v56  ;;  %v3041_v58 = vmul.f32 -1.442695, %v3209_v57 }
 0x168   :  { %v1627_v59 = vpop.f32.mrf.mxu0 }
 0x169   :  { %3275 = vpow2.f32 %v3041_v58  ;;  %v3040_v60 = vmul.f32 -1.442695, %v1627_v59 }
 0x16a   :  { %v3264_v61 = vpop.eup %3263 }
 0x16b   :  { %v158_v62 = vadd.f32 1.0, %v3264_v61  ;;  %3277 = vpow2.f32 %v3040_v60 }
 0x16c   :  { %v3266_v63 = vpop.eup %3265 }
 0x16d   :  { %3279 = vrcp.f32 %v158_v62  ;;  %v157_v3 = vadd.f32 1.0, %v3266_v63 }
 0x16e   :  { %v3268_v7 = vpop.eup %3267 }
 0x16f   :  { %3281 = vrcp.f32 %v157_v3  ;;  %v160_v10 = vadd.f32 1.0, %v3268_v7 }
 0x170   :  { %v3270_v11 = vpop.eup %3269 }
 0x171   :  { %3283 = vrcp.f32 %v160_v10  ;;  %v159_v16 = vadd.f32 1.0, %v3270_v11 }
 0x172   :  { %v3272_v17 = vpop.eup %3271 }
 0x173   :  { %v1649_v22 = vadd.f32 1.0, %v3272_v17  ;;  %3285 = vrcp.f32 %v159_v16 }
 0x174   :  { %v3274_v23 = vpop.eup %3273 }
 0x175   :  { %v1648_v24 = vadd.f32 1.0, %v3274_v23  ;;  %3287 = vrcp.f32 %v1649_v22 }
 0x176   :  { %v3276_v25 = vpop.eup %3275 }
 0x177   :  { %3289 = vrcp.f32 %v1648_v24  ;;  %v1651_v26 = vadd.f32 1.0, %v3276_v25 }
 0x178   :  { %v3278_v27 = vpop.eup %3277 }
 0x179   :  { %3291 = vrcp.f32 %v1651_v26  ;;  %v1650_v29 = vadd.f32 1.0, %v3278_v27 }
 0x17a   :  { %v3280_v28 = vpop.eup %3279 }
 0x17b   :  { %176 = vperm.xlu1 %3261, %v3280_v28   ;;  %3293 = vrcp.f32 %v1650_v29 }
 0x17c   :  { %v3282_v30 = vpop.eup %3281 }
 0x17d   :  { %171 = vperm.xlu0 %3262, %v3282_v30  }
 0x17e   :  { %v3284_v31 = vpop.eup %3283 }
 0x17f   :  { %186 = vperm.xlu1 %3261, %v3284_v31  }
 0x180   :  { %v3286_v32 = vpop.eup %3285 }
 0x182   :  { %v3288_v33 = vpop.eup %3287 }
 0x183   :  { %181 = vperm.xlu1 %3261, %v3286_v32  }
 0x184   :  { %v3290_v34 = vpop.eup %3289 }
 0x185   :  { %1662 = vperm.xlu0 %3262, %v3290_v34  }
 0x186   :  { %v3292_v36 = vpop.eup %3291 }
 0x187   :  { %1667 = vperm.xlu1 %3261, %v3288_v33  }
 0x188   :  { %v3294_v37 = vpop.eup %3293 }
 0x18b   :  { %1677 = vperm.xlu1 %3261, %v3292_v36  }
 0x18f   :  { %1672 = vperm.xlu1 %3261, %v3294_v37  }
 0x1f6   :  { %v177_v38 = vpop.permute.xlu1 %176 }
 0x1f7   :  { %v3519_v46 = vmul.f32 %v177_v38, %v3418_v6 }
 0x1f8   :  { %v172_v45 = vpop.permute.xlu0 %171 }
 0x1f9   :  { %6216 = vst [vmem:[#allocation7_spill] sm:$0xff] %v3519_v46  ;;  %v3527_v47 = vmul.f32 %v172_v45, %v3430_v9  ;;  %v3314_v9 = vmov 0.03125  }
 0x1fa   :  { %v187_v39 = vpop.permute.xlu1 %186 }
 0x1fb   :  { %v3505_v40 = vmul.f32 %v187_v39, %v3391_v0  ;;  %v3508_v41 = vmul.f32 %v187_v39, %v3396_v1  ;;  %v3523_v0 = vmul.f32 %v177_v38, %v3413_v5  ;;  %6218 = vst [vmem:[#allocation9_spill] sm:$0xff] %v3527_v47 }
 0x1fd   :  { %6212 = vst [vmem:[#allocation3_spill] sm:$0xff] %v3505_v40  ;;  %6213 = vst [vmem:[#allocation4_spill] sm:$0xff] %v3508_v41  ;;  %232 = vmatprep.subr.mxu1 %v3508_v41 }
 0x1fe   :  { %233 = vmatpush1.msra.mxu1 %v3505_v40  ;;  %v182_v42 = vpop.permute.xlu1 %181  ;;  %6217 = vst [vmem:[#allocation8_spill] sm:$0xff] %v3523_v0 }
 0x1ff   :  { %v3513_v43 = vmul.f32 %v182_v42, %v3401_v2  ;;  %v3516_v44 = vmul.f32 %v182_v42, %v3408_v4  ;;  %v3531_v2 = vmul.f32 %v172_v45, %v3425_v8 }
 0x201   :  { %6214 = vst [vmem:[#allocation5_spill] sm:$0xff] %v3513_v43  ;;  %6215 = vst [vmem:[#allocation6_spill] sm:$0xff] %v3516_v44  ;;  %234 = vmatprep.subr.mxu1 %v3516_v44 }
 0x202   :  { %235 = vmatpush1.msra.mxu1 %v3513_v43  ;;  %v1668_v1 = vpop.permute.xlu1 %1667  ;;  %6219 = vst [vmem:[#allocation10_spill] sm:$0xff] %v3531_v2 }
 0x203   :  { %236 = vmatprep.subr.mxu1 %v3519_v46  ;;  %v3552_v50 = vmul.f32 %v3468_v19, %v1668_v1  ;;  %v288_v19 = vmax.f32 %v3527_v47, %v3516_v44 }
 0x204   :  { %237 = vmatpush1.msra.mxu1 %v3523_v0 }
 0x205   :  { %238 = vmatprep.subr.mxu1 %v3527_v47  ;;  %6224 = vst [vmem:[#allocation15_spill] sm:$0xff] %v3552_v50 }
 0x206   :  { %239 = vmatpush1.msra.mxu1 %v3531_v2  ;;  %v1678_v4 = vpop.permute.xlu1 %1677 }
 0x207   :  { %v3537_v5 = vmul.f32 %v3439_v12, %v1678_v4  ;;  %v3540_v6 = vmul.f32 %v3444_v13, %v1678_v4  ;;  %2926 = vmatmul.mubr.msk.f32.vlgmr.msra.gmra.mxu1 %vm47_vm0, %v3314_v9  ;;  %v1663_v12 = vpop.permute.xlu0 %1662  ;;  %v3556_v13 = vmul.f32 %v3463_v18, %v1668_v1  ;;  %v280_v18 = vmax.f32 %v3523_v0, %v3505_v40 }
 0x208   :  { %1761 = vmatprep.mubr.f32.mxu1 %v3313_v35  ;;  %v3560_v51 = vmul.f32 %v3478_v21, %v1663_v12 }
 0x209   :  { %6220 = vst [vmem:[#allocation11_spill] sm:$0xff] %v3537_v5  ;;  %6221 = vst [vmem:[#allocation12_spill] sm:$0xff] %v3540_v6  ;;  %1721 = vmatprep.subr.mxu1 %v3540_v6 }
 0x20a   :  { %1722 = vmatpush1.msra.mxu1 %v3537_v5  ;;  %v1673_v8 = vpop.permute.xlu1 %1672  ;;  %6225 = vst [vmem:[#allocation16_spill] sm:$0xff] %v3556_v13  ;;  %6226 = vst [vmem:[#allocation17_spill] sm:$0xff] %v3560_v51 }
 0x20b   :  { %v3546_v48 = vmul.f32 %v3449_v14, %v1673_v8  ;;  %v3549_v49 = vmul.f32 %v3454_v15, %v1673_v8  ;;  %v3564_v14 = vmul.f32 %v3473_v20, %v1663_v12  ;;  %v279_v15 = vmax.f32 %v3531_v2, %v3513_v43 }
 0x20c   :  { %v289_v20 = vmax.f32 %v3519_v46, %v3508_v41  ;;  %v1778_v12 = vmax.f32 %v3552_v50, %v3540_v6 }
 0x20d   :  { %6222 = vst [vmem:[#allocation13_spill] sm:$0xff] %v3546_v48  ;;  %6223 = vst [vmem:[#allocation14_spill] sm:$0xff] %v3549_v49  ;;  %1723 = vmatprep.subr.mxu1 %v3549_v49  ;;  %v281_v21 = vmax.f32 %v279_v15, %v280_v18 }
 0x20e   :  { %1724 = vmatpush1.msra.mxu1 %v3546_v48  ;;  %6227 = vst [vmem:[#allocation18_spill] sm:$0xff] %v3564_v14  ;;  %v290_v52 = vmax.f32 %v288_v19, %v289_v20  ;;  %v1768_v20 = vmax.f32 %v3564_v14, %v3546_v48 }
 0x20f   :  { %1725 = vmatprep.subr.mxu1 %v3552_v50  ;;  %v282_v53 = vrot.slane %v281_v21, 4 }
 0x210   :  { %1726 = vmatpush1.msra.mxu1 %v3556_v13  ;;  %v291_v54 = vrot.slane %v290_v52, 4 }
 0x211   :  { %1727 = vmatprep.subr.mxu1 %v3560_v51  ;;  %v283_v55 = vmax.f32 %v281_v21, %v282_v53 }
 0x212   :  { %1728 = vmatpush1.msra.mxu1 %v3564_v14  ;;  %v292_v56 = vmax.f32 %v290_v52, %v291_v54  ;;  %v1769_v52 = vmax.f32 %v3556_v13, %v3537_v5 }
 0x213   :  { %3050 = vmatmul.mubr.msk.f32.vlgmr.msra.gmra.mxu1 %vm47_vm0, %v3314_v9  ;;  %v284_v57 = vrot.slane %v283_v55, 2  ;;  %v1777_v9 = vmax.f32 %v3560_v51, %v3549_v49 }
 0x214   :  { %v293_v58 = vrot.slane %v292_v56, 2 }
 0x215   :  { %v285_v59 = vmax.f32 %v283_v55, %v284_v57  ;;  %v1779_v18 = vmax.f32 %v1777_v9, %v1778_v12  ;;  %v1770_v55 = vmax.f32 %v1768_v20, %v1769_v52 }
 0x216   :  { %v294_v60 = vmax.f32 %v292_v56, %v293_v58 }
 0x217   :  { %v286_v61 = vrot.slane %v285_v59, 1  ;;  %v1780_v53 = vrot.slane %v1779_v18, 4 }
 0x218   :  { %v295_v62 = vrot.slane %v294_v60, 1 }
 0x219   :  { %v287_v63 = vmax.f32 %v285_v59, %v286_v61  ;;  %v1781_v57 = vmax.f32 %v1779_v18, %v1780_v53  ;;  %v1771_v59 = vrot.slane %v1770_v55, 4 }
 0x21a   :  { %v296_v7 = vmax.f32 %v294_v60, %v295_v62 }
 0x21b   :  { %v1782_v61 = vrot.slane %v1781_v57, 2 }
 0x2c7   :  { %v274_v3 = vpop.f32.mrf.mxu1 }
 0x2c8   :  { %v3579_v10 = vsel %vm297_vm1, %v274_v3, %v287_v63  ;;  %v1772_v63 = vmax.f32 %v1770_v55, %v1771_v59 }
 0x2c9   :  { %300 = vrot.lane.b32.xlu1 %v3579_v10, %s3315_s1  ;;  %v276_v11 = vpop.f32.mrf.mxu1 }
 0x2ca   :  { %v3584_v16 = vsel %vm297_vm1, %v276_v11, %v296_v7  ;;  %v1783_v7 = vmax.f32 %v1781_v57, %v1782_v61  ;;  %v1773_v9 = vrot.slane %v1772_v63, 2 }
 0x2cb   :  { %327 = vrot.lane.b32.xlu0 %v3584_v16, %s3316_s28 }
 0x2cc   :  { %v1784_v20 = vrot.slane %v1783_v7, 1  ;;  %v1774_v53 = vmax.f32 %v1772_v63, %v1773_v9 }
 0x2cd   :  { %325 = vrot.lane.b32.xlu1 %v3579_v10, %s3316_s28 }
 0x2ce   :  { %v1785_v59 = vmax.f32 %v1783_v7, %v1784_v20  ;;  %v1775_v6 = vrot.slane %v1774_v53, 1 }
 0x2cf   :  { %351 = vrot.lane.b32.xlu0 %v3584_v16, %s3317_s29 }
 0x2d0   :  { %v1776_v7 = vmax.f32 %v1774_v53, %v1775_v6 }
 0x2d1   :  { %349 = vrot.lane.b32.xlu1 %v3579_v10, %s3317_s29 }
 0x2d3   :  { %375 = vrot.lane.b32.xlu0 %v3584_v16, %s3318_s30  ;;  %v1763_v12 = vpop.f32.mrf.mxu1 }
 0x2d4   :  { %v3874_v50 = vsel %vm297_vm1, %v1763_v12, %v1776_v7 }
 0x2d5   :  { %373 = vrot.lane.b32.xlu1 %v3579_v10, %s3318_s30  ;;  %v1765_v55 = vpop.f32.mrf.mxu1 }
 0x2d6   :  { %v3859_v49 = vsel %vm297_vm1, %v1765_v55, %v1785_v59 }
 0x2d7   :  { %399 = vrot.lane.b32.xlu0 %v3584_v16, %s3319_s5 }
 0x2d9   :  { %397 = vrot.lane.b32.xlu1 %v3579_v10, %s3319_s5 }
 0x2db   :  { %423 = vrot.lane.b32.xlu0 %v3584_v16, %s3320_s6 }
 0x2dd   :  { %421 = vrot.lane.b32.xlu1 %v3579_v10, %s3320_s6 }
 0x2df   :  { %447 = vrot.lane.b32.xlu0 %v3584_v16, %s3321_s7 }
 0x2e1   :  { %445 = vrot.lane.b32.xlu1 %v3579_v10, %s3321_s7 }
 0x2e3   :  { %471 = vrot.lane.b32.xlu0 %v3584_v16, %s3322_s8 }
 0x2e5   :  { %469 = vrot.lane.b32.xlu1 %v3579_v10, %s3322_s8 }
 0x2e7   :  { %495 = vrot.lane.b32.xlu0 %v3584_v16, %s3323_s9 }
 0x2e9   :  { %493 = vrot.lane.b32.xlu1 %v3579_v10, %s3323_s9 }
 0x2eb   :  { %519 = vrot.lane.b32.xlu0 %v3584_v16, %s3324_s10 }
 0x2ed   :  { %517 = vrot.lane.b32.xlu1 %v3579_v10, %s3324_s10 }
 0x2ef   :  { %543 = vrot.lane.b32.xlu0 %v3584_v16, %s3325_s11 }
 0x2f1   :  { %541 = vrot.lane.b32.xlu1 %v3579_v10, %s3325_s11 }
 0x2f3   :  { %567 = vrot.lane.b32.xlu0 %v3584_v16, %s3326_s12 }
 0x2f5   :  { %565 = vrot.lane.b32.xlu1 %v3579_v10, %s3326_s12 }
 0x2f7   :  { %591 = vrot.lane.b32.xlu0 %v3584_v16, %s3327_s13 }
 0x2f9   :  { %589 = vrot.lane.b32.xlu1 %v3579_v10, %s3327_s13 }
 0x2fb   :  { %615 = vrot.lane.b32.xlu0 %v3584_v16, %s3328_s14 }
 0x2fd   :  { %613 = vrot.lane.b32.xlu1 %v3579_v10, %s3328_s14 }
 0x2ff   :  { %639 = vrot.lane.b32.xlu0 %v3584_v16, %s3329_s15 }
 0x301   :  { %637 = vrot.lane.b32.xlu1 %v3579_v10, %s3329_s15 }
 0x303   :  { %663 = vrot.lane.b32.xlu0 %v3584_v16, %s3330_s16 }
 0x305   :  { %661 = vrot.lane.b32.xlu1 %v3579_v10, %s3330_s16 }
 0x307   :  { %687 = vrot.lane.b32.xlu0 %v3584_v16, %s3331_s17 }
 0x309   :  { %685 = vrot.lane.b32.xlu1 %v3579_v10, %s3331_s17 }
 0x30b   :  { %711 = vrot.lane.b32.xlu0 %v3584_v16, %s3332_s18 }
 0x30d   :  { %709 = vrot.lane.b32.xlu1 %v3579_v10, %s3332_s18 }
 0x30f   :  { %735 = vrot.lane.b32.xlu0 %v3584_v16, %s3333_s19 }
 0x311   :  { %733 = vrot.lane.b32.xlu1 %v3579_v10, %s3333_s19 }
 0x313   :  { %759 = vrot.lane.b32.xlu0 %v3584_v16, %s3334_s20 }
 0x315   :  { %757 = vrot.lane.b32.xlu1 %v3579_v10, %s3334_s20 }
 0x317   :  { %783 = vrot.lane.b32.xlu0 %v3584_v16, %s3335_s21 }
 0x319   :  { %781 = vrot.lane.b32.xlu1 %v3579_v10, %s3335_s21 }
 0x31b   :  { %807 = vrot.lane.b32.xlu0 %v3584_v16, %s3336_s22 }
 0x31d   :  { %805 = vrot.lane.b32.xlu1 %v3579_v10, %s3336_s22 }
 0x31f   :  { %831 = vrot.lane.b32.xlu0 %v3584_v16, %s3337_s0 }
 0x321   :  { %829 = vrot.lane.b32.xlu1 %v3579_v10, %s3337_s0 }
 0x323   :  { %855 = vrot.lane.b32.xlu0 %v3584_v16, %s3338_s23 }
 0x325   :  { %853 = vrot.lane.b32.xlu1 %v3579_v10, %s3338_s23 }
 0x327   :  { %896 = vrot.lane.b32.xlu0 %v3584_v16, %s6008_s24 }
 0x329   :  { %894 = vrot.lane.b32.xlu1 %v3579_v10, %s6008_s24  ;;  %s6014_s24 = smov 114  }
 0x32b   :  { %920 = vrot.lane.b32.xlu0 %v3584_v16, %s6010_s25 }
 0x32d   :  { %918 = vrot.lane.b32.xlu1 %v3579_v10, %s6010_s25  ;;  %s6016_s25 = smov 113  }
 0x32f   :  { %944 = vrot.lane.b32.xlu0 %v3584_v16, %s6012_s26 }
 0x331   :  { %942 = vrot.lane.b32.xlu1 %v3579_v10, %s6012_s26  ;;  %s6018_s26 = smov 112  }
 0x333   :  { %968 = vrot.lane.b32.xlu0 %v3584_v16, %s3342_s27 }
 0x335   :  { %966 = vrot.lane.b32.xlu1 %v3579_v10, %s3342_s27 }
 0x337   :  { %992 = vrot.lane.b32.xlu0 %v3584_v16, %s6014_s24 }
 0x339   :  { %990 = vrot.lane.b32.xlu1 %v3579_v10, %s6014_s24  ;;  %s6020_s24 = smov 111  }
 0x33b   :  { %1016 = vrot.lane.b32.xlu0 %v3584_v16, %s6016_s25  ;;  %v3700_v17 = vpop.permute.xlu1 %300 }
 0x33c   :  { %6228 = vst [vmem:[#allocation19_spill] sm:$0xff] %v3700_v17 }
 0x33d   :  { %1014 = vrot.lane.b32.xlu1 %v3579_v10, %s6016_s25  ;;  %v3704_v22 = vpop.permute.xlu0 %327  ;;  %s6022_s25 = smov 110  }
 0x33f   :  { %1040 = vrot.lane.b32.xlu0 %v3584_v16, %s6018_s26  ;;  %v3708_v23 = vpop.permute.xlu1 %325 }
 0x341   :  { %1038 = vrot.lane.b32.xlu1 %v3579_v10, %s6018_s26  ;;  %v3712_v24 = vpop.permute.xlu0 %351  ;;  %s6024_s26 = smov 109  }
 0x343   :  { %1064 = vrot.lane.b32.xlu0 %v3584_v16, %s6020_s24  ;;  %v3716_v25 = vpop.permute.xlu1 %349 }
 0x345   :  { %1062 = vrot.lane.b32.xlu1 %v3579_v10, %s6020_s24  ;;  %v3720_v26 = vpop.permute.xlu0 %375  ;;  %s6026_s24 = smov 99  }
 0x347   :  { %1088 = vrot.lane.b32.xlu0 %v3584_v16, %s6022_s25  ;;  %v3724_v27 = vpop.permute.xlu1 %373 }
 0x349   :  { %1086 = vrot.lane.b32.xlu1 %v3579_v10, %s6022_s25  ;;  %v3728_v28 = vpop.permute.xlu0 %399  ;;  %s6028_s25 = smov 98  }
 0x34b   :  { %1112 = vrot.lane.b32.xlu0 %v3584_v16, %s6024_s26  ;;  %v3732_v29 = vpop.permute.xlu1 %397 }
 0x34d   :  { %1110 = vrot.lane.b32.xlu1 %v3579_v10, %s6024_s26  ;;  %v3736_v30 = vpop.permute.xlu0 %423  ;;  %s6030_s26 = smov 97  }
 0x34f   :  { %1136 = vrot.lane.b32.xlu0 %v3584_v16, %s6026_s24  ;;  %v3740_v31 = vpop.permute.xlu1 %421 }
 0x351   :  { %1134 = vrot.lane.b32.xlu1 %v3579_v10, %s6026_s24  ;;  %v3744_v32 = vpop.permute.xlu0 %447  ;;  %s6032_s24 = smov 96  }
 0x353   :  { %1160 = vrot.lane.b32.xlu0 %v3584_v16, %s6028_s25  ;;  %v3748_v33 = vpop.permute.xlu1 %445 }
 0x355   :  { %1158 = vrot.lane.b32.xlu1 %v3579_v10, %s6028_s25  ;;  %v3752_v34 = vpop.permute.xlu0 %471  ;;  %s6040_s25 = smov 95  }
 0x357   :  { %1184 = vrot.lane.b32.xlu0 %v3584_v16, %s6030_s26  ;;  %v3756_v35 = vpop.permute.xlu1 %469 }
 0x359   :  { %1182 = vrot.lane.b32.xlu1 %v3579_v10, %s6030_s26  ;;  %v3760_v36 = vpop.permute.xlu0 %495  ;;  %s6034_s26 = smov 94  }
 0x35b   :  { %1208 = vrot.lane.b32.xlu0 %v3584_v16, %s6032_s24  ;;  %v3764_v37 = vpop.permute.xlu1 %493 }
 0x35d   :  { %1206 = vrot.lane.b32.xlu1 %v3579_v10, %s6032_s24  ;;  %v3768_v38 = vpop.permute.xlu0 %519  ;;  %s6036_s24 = smov 93  }
 0x35f   :  { %1232 = vrot.lane.b32.xlu0 %v3584_v16, %s6040_s25  ;;  %v3772_v39 = vpop.permute.xlu1 %517 }
 0x361   :  { %1230 = vrot.lane.b32.xlu1 %v3579_v10, %s6040_s25  ;;  %v3776_v42 = vpop.permute.xlu0 %543  ;;  %s6046_s25 = smov 80  }
 0x363   :  { %1256 = vrot.lane.b32.xlu0 %v3584_v16, %s6034_s26  ;;  %v3780_v45 = vpop.permute.xlu1 %541 }
 0x365   :  { %1254 = vrot.lane.b32.xlu1 %v3579_v10, %s6034_s26  ;;  %v3784_v1 = vpop.permute.xlu0 %567  ;;  %s6038_s26 = smov 83  }
 0x367   :  { %1280 = vrot.lane.b32.xlu0 %v3584_v16, %s6036_s24  ;;  %v3788_v4 = vpop.permute.xlu1 %565 }
 0x369   :  { %1278 = vrot.lane.b32.xlu1 %v3579_v10, %s6036_s24  ;;  %v3794_v8 = vpop.permute.xlu0 %591  ;;  %s6042_s24 = smov 82  }
 0x36b   :  { %1304 = vrot.lane.b32.xlu0 %v3584_v16, %s6038_s26  ;;  %v3800_v15 = vpop.permute.xlu1 %589 }
 0x36d   :  { %1302 = vrot.lane.b32.xlu1 %v3579_v10, %s6038_s26  ;;  %v3804_v19 = vpop.permute.xlu0 %615  ;;  %s6044_s26 = smov 81  }
 0x36f   :  { %1328 = vrot.lane.b32.xlu0 %v3584_v16, %s6042_s24  ;;  %v3810_v21 = vpop.permute.xlu1 %613 }
 0x371   :  { %1326 = vrot.lane.b32.xlu1 %v3579_v10, %s6042_s24  ;;  %v3816_v54 = vpop.permute.xlu0 %639  ;;  %s3360_s24 = smov 79  }
 0x372   :  { %6229 = vst [vmem:[#allocation20_spill] sm:$0xff] %v3816_v54 }
 0x373   :  { %1352 = vrot.lane.b32.xlu0 %v3584_v16, %s6044_s26  ;;  %v3820_v56 = vpop.permute.xlu1 %637 }
 0x374   :  { %6230 = vst [vmem:[#allocation21_spill] sm:$0xff] %v3820_v56 }
 0x375   :  { %1350 = vrot.lane.b32.xlu1 %v3579_v10, %s6044_s26  ;;  %v3824_v58 = vpop.permute.xlu0 %663  ;;  %s3361_s26 = smov 78  }
 0x377   :  { %1376 = vrot.lane.b32.xlu0 %v3584_v16, %s6046_s25  ;;  %v3828_v60 = vpop.permute.xlu1 %661 }
 0x378   :  { %6231 = vst [vmem:[#allocation22_spill] sm:$0xff] %v3828_v60  ;;  %v4169_v60 = vld.sshfl [vmem:[%s6005_s2 + $0x70] sm:$0x33 pattern:$0x76325410] }
 0x379   :  { %1374 = vrot.lane.b32.xlu1 %v3579_v10, %s6046_s25  ;;  %v3832_v62 = vpop.permute.xlu0 %687  ;;  %s3362_s25 = smov 77   ;;  %6279 = vst [vmem:[#allocation70_spill] sm:$0xff] %v4169_v60 }
 0x37a   :  { %6232 = vst [vmem:[#allocation23_spill] sm:$0xff] %v3832_v62  ;;  %v4151_v62 = vld.sshfl [vmem:[%s6005_s2 + $0x6c] sm:$0x33 pattern:$0x76325410] }
 0x37b   :  { %1400 = vrot.lane.b32.xlu0 %v3584_v16, %s3360_s24  ;;  %v3836_v3 = vpop.permute.xlu1 %685 }
 0x37c   :  { %6233 = vst [vmem:[#allocation24_spill] sm:$0xff] %v3836_v3 }
 0x37d   :  { %1398 = vrot.lane.b32.xlu1 %v3579_v10, %s3360_s24  ;;  %v3840_v11 = vpop.permute.xlu0 %711 }
 0x37e   :  { %6234 = vst [vmem:[#allocation25_spill] sm:$0xff] %v3840_v11  ;;  %v4136_v11 = vld.sshfl [vmem:[%s6005_s2 + $0x5c] sm:$0x33 pattern:$0x76325410] }
 0x37f   :  { %1424 = vrot.lane.b32.xlu0 %v3584_v16, %s3361_s26  ;;  %v3844_v18 = vpop.permute.xlu1 %709 }
 0x380   :  { %6235 = vst [vmem:[#allocation26_spill] sm:$0xff] %v3844_v18 }
 0x381   :  { %v3846_v52 = vpop.permute.xlu0 %735  ;;  %1422 = vrot.lane.b32.xlu1 %v3579_v10, %s3361_s26 }
 0x382   :  { %6236 = vst [vmem:[#allocation27_spill] sm:$0xff] %v3846_v52 }
 0x383   :  { %1448 = vrot.lane.b32.xlu0 %v3584_v16, %s3362_s25  ;;  %v3852_v57 = vpop.permute.xlu1 %733 }
 0x384   :  { %6237 = vst [vmem:[#allocation28_spill] sm:$0xff] %v3852_v57  ;;  %v4103_v57 = vld.sshfl [vmem:[%s6005_s2 + $0x4c] sm:$0x33 pattern:$0x76325410] }
 0x385   :  { %v3854_v61 = vpop.permute.xlu0 %759  ;;  %1446 = vrot.lane.b32.xlu1 %v3579_v10, %s3362_s25 }
 0x386   :  { %6238 = vst [vmem:[#allocation29_spill] sm:$0xff] %v3854_v61  ;;  %v4113_v61 = vld.sshfl [vmem:[%s6005_s2 + $0x54] sm:$0x33 pattern:$0x76325410] }
 0x387   :  { %1790 = vrot.lane.b32.xlu0 %v3859_v49, %s3315_s1  ;;  %v3863_v63 = vpop.permute.xlu1 %757 }
 0x388   :  { %6239 = vst [vmem:[#allocation30_spill] sm:$0xff] %v3863_v63  ;;  %v4108_v63 = vld.sshfl [vmem:[%s6005_s2 + $0x50] sm:$0x33 pattern:$0x76325410] }
 0x389   :  { %v3865_v9 = vpop.permute.xlu0 %783  ;;  %302 = vrot.lane.b32.xlu1 %v3584_v16, %s3315_s1 }
 0x38a   :  { %6240 = vst [vmem:[#allocation31_spill] sm:$0xff] %v3865_v9  ;;  %v4093_v9 = vld.sshfl [vmem:[%s6005_s2 + $0x48] sm:$0x33 pattern:$0x76325410] }
 0x38b   :  { %1812 = vrot.lane.b32.xlu0 %v3859_v49, %s3316_s28  ;;  %v3871_v20 = vpop.permute.xlu1 %781  ;;  %6273 = vst [vmem:[#allocation64_spill] sm:$0xff] %v4093_v9  ;;  %v4223_v9 = vld.sshfl [vmem:[%s6005_s2 + $0x80] sm:$0x33 pattern:$0x76325410] }
 0x38c   :  { %6241 = vst [vmem:[#allocation32_spill] sm:$0xff] %v3871_v20  ;;  %v4118_v20 = vld.sshfl [vmem:[%s6005_s2 + $0x58] sm:$0x33 pattern:$0x76325410] }
 0x38d   :  { %v3876_v55 = vpop.permute.xlu0 %807  ;;  %1788 = vrot.lane.b32.xlu1 %v3874_v50, %s3315_s1  ;;  %6274 = vst [vmem:[#allocation65_spill] sm:$0xff] %v4118_v20  ;;  %s6389_s1 = smov 114  }
 0x38e   :  { %6242 = vst [vmem:[#allocation33_spill] sm:$0xff] %v3876_v55  ;;  %v4088_v55 = vld.sshfl [vmem:[%s6005_s2 + $0x44] sm:$0x33 pattern:$0x76325410] }
 0x38f   :  { %1834 = vrot.lane.b32.xlu0 %v3859_v49, %s3317_s29  ;;  %v3882_v59 = vpop.permute.xlu1 %805 }
 0x390   :  { %6243 = vst [vmem:[#allocation34_spill] sm:$0xff] %v3882_v59  ;;  %v4078_v59 = vld.sshfl [vmem:[%s6005_s2 + $0x3c] sm:$0x33 pattern:$0x76325410] }
 0x391   :  { %v3884_v51 = vpop.permute.xlu0 %831  ;;  %1810 = vrot.lane.b32.xlu1 %v3874_v50, %s3316_s28 }
 0x392   :  { %6244 = vst [vmem:[#allocation35_spill] sm:$0xff] %v3884_v51  ;;  %v4041_v51 = vld.sshfl [vmem:[%s6005_s2 + $0x28] sm:$0x33 pattern:$0x76325410] }
 0x393   :  { %1856 = vrot.lane.b32.xlu0 %v3859_v49, %s3318_s30  ;;  %v3890_v6 = vpop.permute.xlu1 %829 }
 0x394   :  { %6245 = vst [vmem:[#allocation36_spill] sm:$0xff] %v3890_v6  ;;  %v4048_v6 = vld.sshfl [vmem:[%s6005_s2 + $0x2c] sm:$0x33 pattern:$0x76325410] }
 0x395   :  { %v3892_v12 = vpop.permute.xlu0 %855  ;;  %1832 = vrot.lane.b32.xlu1 %v3874_v50, %s3317_s29  ;;  %s6419_s29 = smov 111  }
 0x396   :  { %6246 = vst [vmem:[#allocation37_spill] sm:$0xff] %v3892_v12  ;;  %v4063_v12 = vld.sshfl [vmem:[%s6005_s2 + $0x38] sm:$0x33 pattern:$0x76325410] }
 0x397   :  { %1878 = vrot.lane.b32.xlu0 %v3859_v49, %s3319_s5  ;;  %v3898_v53 = vpop.permute.xlu1 %853  ;;  %6271 = vst [vmem:[#allocation62_spill] sm:$0xff] %v4063_v12 }
 0x398   :  { %6247 = vst [vmem:[#allocation38_spill] sm:$0xff] %v3898_v53 }
 0x399   :  { %v3900_v7 = vpop.permute.xlu0 %896  ;;  %1854 = vrot.lane.b32.xlu1 %v3874_v50, %s3318_s30  ;;  %s6424_s30 = smov 110  }
 0x39a   :  { %6248 = vst [vmem:[#allocation39_spill] sm:$0xff] %v3900_v7  ;;  %v4058_v7 = vld.sshfl [vmem:[%s6005_s2 + $0x34] sm:$0x33 pattern:$0x76325410] }
 0x39b   :  { %1900 = vrot.lane.b32.xlu0 %v3859_v49, %s3320_s6  ;;  %v3906_v5 = vpop.permute.xlu1 %894 }
 0x39c   :  { %6249 = vst [vmem:[#allocation40_spill] sm:$0xff] %v3906_v5  ;;  %v4053_v5 = vld.sshfl [vmem:[%s6005_s2 + $0x30] sm:$0x33 pattern:$0x76325410] }
 0x39d   :  { %v3908_v48 = vpop.permute.xlu0 %920  ;;  %1876 = vrot.lane.b32.xlu1 %v3874_v50, %s3319_s5  ;;  %s6433_s5 = smov 99  }
 0x39e   :  { %6250 = vst [vmem:[#allocation41_spill] sm:$0xff] %v3908_v48  ;;  %v4026_v48 = vld.sshfl [vmem:[%s6005_s2 + $0x1c] sm:$0x33 pattern:$0x76325410] }
 0x39f   :  { %1922 = vrot.lane.b32.xlu0 %v3859_v49, %s3321_s7  ;;  %v3914_v13 = vpop.permute.xlu1 %918 }
 0x3a0   :  { %6251 = vst [vmem:[#allocation42_spill] sm:$0xff] %v3914_v13  ;;  %v4012_v13 = vld.sshfl [vmem:[%s6005_s2 + $0x14] sm:$0x33 pattern:$0x76325410] }
 0x3a1   :  { %v3916_v14 = vpop.permute.xlu0 %944  ;;  %1898 = vrot.lane.b32.xlu1 %v3874_v50, %s3320_s6  ;;  %s6456_s6 = smov 97  }
 0x3a2   :  { %6252 = vst [vmem:[#allocation43_spill] sm:$0xff] %v3916_v14  ;;  %v4036_v14 = vld.sshfl [vmem:[%s6005_s2 + $0x24] sm:$0x33 pattern:$0x76325410] }
 0x3a3   :  { %1944 = vrot.lane.b32.xlu0 %v3859_v49, %s3322_s8  ;;  %v3922_v41 = vpop.permute.xlu1 %942 }
 0x3a4   :  { %6253 = vst [vmem:[#allocation44_spill] sm:$0xff] %v3922_v41  ;;  %v4031_v41 = vld.sshfl [vmem:[%s6005_s2 + $0x20] sm:$0x33 pattern:$0x76325410] }
 0x3a5   :  { %v3924_v40 = vpop.permute.xlu0 %968  ;;  %1920 = vrot.lane.b32.xlu1 %v3874_v50, %s3321_s7  ;;  %s6357_s7 = smov 125  }
 0x3a6   :  { %6254 = vst [vmem:[#allocation45_spill] sm:$0xff] %v3924_v40  ;;  %v3986_v40 = vld.sshfl [vmem:[%s6005_s2 + $0x4] sm:$0x33 pattern:$0x76325410] }
 0x3a7   :  { %1966 = vrot.lane.b32.xlu0 %v3859_v49, %s3323_s9  ;;  %v3930_v44 = vpop.permute.xlu1 %966 }
 0x3a8   :  { %6255 = vst [vmem:[#allocation46_spill] sm:$0xff] %v3930_v44 }
 0x3a9   :  { %v3932_v43 = vpop.permute.xlu0 %992  ;;  %1942 = vrot.lane.b32.xlu1 %v3874_v50, %s3322_s8  ;;  %s6492_s8 = smov 93  }
 0x3aa   :  { %6256 = vst [vmem:[#allocation47_spill] sm:$0xff] %v3932_v43  ;;  %v4007_v43 = vld.sshfl [vmem:[%s6005_s2 + $0x10] sm:$0x33 pattern:$0x76325410] }
 0x3ab   :  { %1988 = vrot.lane.b32.xlu0 %v3859_v49, %s3324_s10  ;;  %v3938_v46 = vpop.permute.xlu1 %990 }
 0x3ac   :  { %6257 = vst [vmem:[#allocation48_spill] sm:$0xff] %v3938_v46  ;;  %v4002_v46 = vld.sshfl [vmem:[%s6005_s2 + $0xc] sm:$0x33 pattern:$0x76325410] }
 0x3ad   :  { %v3940_v47 = vpop.permute.xlu0 %1016  ;;  %1964 = vrot.lane.b32.xlu1 %v3874_v50, %s3323_s9  ;;  %s6502_s9 = smov 83  }
 0x3ae   :  { %6258 = vst [vmem:[#allocation49_spill] sm:$0xff] %v3940_v47 }
 0x3af   :  { %2010 = vrot.lane.b32.xlu0 %v3859_v49, %s3325_s11  ;;  %v3946_v0 = vpop.permute.xlu1 %1014 }
 0x3b0   :  { %6259 = vst [vmem:[#allocation50_spill] sm:$0xff] %v3946_v0 }
 0x3b1   :  { %v3948_v2 = vpop.permute.xlu0 %1040  ;;  %1986 = vrot.lane.b32.xlu1 %v3874_v50, %s3324_s10 }
 0x3b2   :  { %6260 = vst [vmem:[#allocation51_spill] sm:$0xff] %v3948_v2 }
 0x3b3   :  { %2032 = vrot.lane.b32.xlu0 %v3859_v49, %s3326_s12  ;;  %v3954_v17 = vpop.permute.xlu1 %1038 }
 0x3b4   :  { %6261 = vst [vmem:[#allocation52_spill] sm:$0xff] %v3954_v17 }
 0x3b5   :  { %v3956_v44 = vpop.permute.xlu0 %1064  ;;  %2008 = vrot.lane.b32.xlu1 %v3874_v50, %s3325_s11  ;;  %s6508_s11 = smov 82  }
 0x3b6   :  { %6262 = vst [vmem:[#allocation53_spill] sm:$0xff] %v3956_v44  ;;  %v304_v44 = vlaneseq }
 0x3b7   :  { %2054 = vrot.lane.b32.xlu0 %v3859_v49, %s3327_s13  ;;  %v3962_v47 = vpop.permute.xlu1 %1062 }
 0x3b8   :  { %6263 = vst [vmem:[#allocation54_spill] sm:$0xff] %v3962_v47 }
 0x3b9   :  { %v3964_v0 = vpop.permute.xlu0 %1088  ;;  %2030 = vrot.lane.b32.xlu1 %v3874_v50, %s3326_s12 }
 0x3ba   :  { %6264 = vst [vmem:[#allocation55_spill] sm:$0xff] %v3964_v0  ;;  %v2975_v0 = vld.sshfl [vmem:[%s6005_s2 + $0x60] sm:$0x33 pattern:$0x76325410] }
 0x3bb   :  { %2076 = vrot.lane.b32.xlu0 %v3859_v49, %s3328_s14  ;;  %v3970_v2 = vpop.permute.xlu1 %1086  ;;  %v4125_v3 = vmul.f32 %v2975_v0, %v3579_v10  ;;  %v4146_v10 = vld.sshfl [vmem:[%s6005_s2 + $0x68] sm:$0x33 pattern:$0x76325410] }
 0x3bc   :  { %6265 = vst [vmem:[#allocation56_spill] sm:$0xff] %v3970_v2  ;;  %6277 = vst [vmem:[#allocation68_spill] sm:$0xff] %v4146_v10 }
 0x3bd   :  { %v3972_v17 = vpop.permute.xlu0 %1112  ;;  %2052 = vrot.lane.b32.xlu1 %v3874_v50, %s3327_s13  ;;  %6276 = vst [vmem:[#allocation67_spill] sm:$0xff] %v4125_v3  ;;  %s6512_s13 = smov 81  }
 0x3be   :  { %6266 = vst [vmem:[#allocation57_spill] sm:$0xff] %v3972_v17  ;;  %v3991_v17 = vld.sshfl [vmem:[%s6005_s2 + $0x8] sm:$0x33 pattern:$0x76325410] }
 0x3bf   :  { %2098 = vrot.lane.b32.xlu0 %v3859_v49, %s3329_s15  ;;  %v3978_v47 = vpop.permute.xlu1 %1110 }
 0x3c0   :  { %6267 = vst [vmem:[#allocation58_spill] sm:$0xff] %v3978_v47  ;;  %v3997_v47 = vand.u32 127, %v304_v44  ;;  %v4017_v44 = vld.sshfl [vmem:[%s6005_s2 + $0x18] sm:$0x33 pattern:$0x76325410] }
 0x3c1   :  { %v3993_v2 = vpop.permute.xlu0 %1136  ;;  %2074 = vrot.lane.b32.xlu1 %v3874_v50, %s3328_s14 }
 0x3c2   :  { %6268 = vst [vmem:[#allocation59_spill] sm:$0xff] %v3993_v2  ;;  %vm329_vm2 = vcmp.lt.s32.totalorder %v3997_v47, 50  ;;  %vm353_vm3 = vcmp.lt.s32.totalorder %v3997_v47, 49  ;;  %vm377_vm4 = vcmp.lt.s32.totalorder %v3997_v47, 48  ;;  %vm401_vm5 = vcmp.lt.s32.totalorder %v3997_v47, 47 }
 0x3c3   :  { %2120 = vrot.lane.b32.xlu0 %v3859_v49, %s3330_s16  ;;  %v4021_v2 = vpop.permute.xlu1 %1134  ;;  %vm425_vm6 = vcmp.lt.s32.totalorder %v3997_v47, 46  ;;  %vm473_vm7 = vcmp.lt.s32.totalorder %v3997_v47, 35  ;;  %vm449_vm8 = vcmp.lt.s32.totalorder %v3997_v47, 45  ;;  %vm6129_vm9 = vcmp.lt.s32.totalorder %v3997_v47, 33 }
 0x3c4   :  { %6269 = vst [vmem:[#allocation60_spill] sm:$0xff] %v4021_v2  ;;  %v4043_v2 = vcombine.high %v2975_v0, %v2975_v0  ;;  %v4141_v0 = vld.sshfl [vmem:[%s6005_s2 + $0x64] sm:$0x33 pattern:$0x76325410]  ;;  %v379_v54 = vsel %vm377_vm4, %v3720_v26, %v3724_v27  ;;  %vm6130_vm10 = vcmp.lt.s32.totalorder %v3997_v47, 34  ;;  %v330_v10 = vsel %vm329_vm2, %v3708_v23, %v3704_v22 }
 0x3c5   :  { %v4065_v53 = vpop.permute.xlu0 %1160  ;;  %2096 = vrot.lane.b32.xlu1 %v3874_v50, %s3329_s15  ;;  %vm6131_vm11 = vcmp.lt.s32.totalorder %v3997_v47, 31  ;;  %vm6132_vm12 = vcmp.lt.s32.totalorder %v3997_v47, 32  ;;  %vm6133_vm13 = vcmp.lt.s32.totalorder %v3997_v47, 29  ;;  %vm6134_vm14 = vcmp.lt.s32.totalorder %v3997_v47, 30  ;;  %s6463_s15 = smov 96  }
 0x3c6   :  { %6270 = vst [vmem:[#allocation61_spill] sm:$0xff] %v4043_v2  ;;  %6272 = vst [vmem:[#allocation63_spill] sm:$0xff] %v4065_v53  ;;  %v4083_v53 = vld.sshfl [vmem:[%s6005_s2 + $0x40] sm:$0x33 pattern:$0x76325410]  ;;  %v4155_v18 = vmul.f32 %v4043_v2, %v3584_v16 }
 0x3c7   :  { %2142 = vrot.lane.b32.xlu0 %v3859_v49, %s3331_s17  ;;  %v4122_v52 = vpop.permute.xlu1 %1158  ;;  %v4174_v16 = vld.sshfl [vmem:[%s6005_s2 + $0x74] sm:$0x33 pattern:$0x76325410]  ;;  %vm6135_vm15 = vcmp.lt.s32.totalorder %v3997_v47, 18  ;;  %vm6140_vm0 = vcmp.lt.s32.totalorder %v3997_v47, 19 }
 0x3c8   :  { %6275 = vst [vmem:[#allocation66_spill] sm:$0xff] %v4122_v52  ;;  %6278 = vst [vmem:[#allocation69_spill] sm:$0xff] %v4155_v18  ;;  %v4191_v18 = vld.sshfl [vmem:[%s6005_s2 + $0x78] sm:$0x33 pattern:$0x76325410]  ;;  %v378_v52 = vsel %vm377_vm4, %v3724_v27, %v3720_v26  ;;  %v331_v26 = vsel %vm329_vm2, %v3704_v22, %v3708_v23  ;;  %v354_v22 = vsel %vm353_vm3, %v3716_v25, %v3712_v24 }
 0x3c9   :  { %6280 = vst [vmem:[#allocation71_spill] sm:$0xff] %v4174_v16  ;;  %v4176_v3 = vpop.permute.xlu0 %1184  ;;  %2118 = vrot.lane.b32.xlu1 %v3874_v50, %s3330_s16  ;;  %6282 = vst [vmem:[#allocation73_spill] sm:$0xff] %v4191_v18  ;;  %v4205_v2 = vld.sshfl [vmem:[%s6005_s2 + $0x7c] sm:$0x33 pattern:$0x76325410]  ;;  %v355_v23 = vsel %vm353_vm3, %v3712_v24, %v3716_v25  ;;  %v393_v18 = vmul.f32 %v4002_v46, %v379_v54  ;;  %v426_v16 = vsel %vm425_vm6, %v3740_v31, %v3736_v30 }
 0x3ca   :  { %6281 = vst [vmem:[#allocation72_spill] sm:$0xff] %v4176_v3  ;;  %6283 = vst [vmem:[#allocation74_spill] sm:$0xff] %v4205_v2  ;;  %v4236_v3 = vld.sshfl [vmem:[%s6005_s2 + $0x84] sm:$0x33 pattern:$0x76325410]  ;;  %v427_v24 = vsel %vm425_vm6, %v3736_v30, %v3740_v31  ;;  %v4331_v56 = vmul.f32 %v3991_v17, %v355_v23 }
 0x3cb   :  { %2164 = vrot.lane.b32.xlu0 %v3859_v49, %s3332_s18  ;;  %v4209_v12 = vpop.permute.xlu1 %1182  ;;  %v4310_v25 = vld.sshfl [vmem:[%s6005_s2 + $0x90] sm:$0x33 pattern:$0x76325410]  ;;  %v441_v30 = vmul.f32 %v4012_v13, %v427_v24  ;;  %vm6145_vm1 = vcmp.lt.s32.totalorder %v3997_v47, 16  ;;  %s6411_s16 = smov 112  }
 0x3cc   :  { %6284 = vst [vmem:[#allocation75_spill] sm:$0xff] %v4209_v12  ;;  %v4276_v12 = vld.sshfl [vmem:[%s6005_s2 + $0x8c] sm:$0x33 pattern:$0x76325410] }
 0x3cd   :  { %v4238_v20 = vpop.permute.xlu0 %1208  ;;  %2140 = vrot.lane.b32.xlu1 %v3874_v50, %s3331_s17  ;;  %v4328_v27 = vld.sshfl [vmem:[%s6005_s2 + $0x94] sm:$0x33 pattern:$0x76325410]  ;;  %s6483_s17 = smov 94  }
 0x3ce   :  { %6285 = vst [vmem:[#allocation76_spill] sm:$0xff] %v4238_v20  ;;  %v4258_v20 = vld.sshfl [vmem:[%s6005_s2 + $0x88] sm:$0x33 pattern:$0x76325410] }
 0x3cf   :  { %2186 = vrot.lane.b32.xlu0 %v3859_v49, %s3333_s19  ;;  %v4280_v60 = vpop.permute.xlu1 %1206 }
 0x3d0   :  { %6286 = vst [vmem:[#allocation77_spill] sm:$0xff] %v4280_v60  ;;  %v6287_v60 = vcombine.high %v4002_v46, %v4002_v46  ;;  %v345_v46 = vmul.f32 %v3986_v40, %v331_v26  ;;  %v402_v26 = vsel %vm401_vm5, %v3732_v29, %v3728_v28 }
 0x3d1   :  { %v4312_v54 = vpop.permute.xlu0 %1232  ;;  %2162 = vrot.lane.b32.xlu1 %v3874_v50, %s3332_s18 }
 0x3d2   :  { %v394_v2 = vmul.f32 %v6287_v60, %v378_v52  ;;  %v6288_v60 = vcombine.high %v3986_v40, %v3986_v40  ;;  %v6289_v40 = vcombine.high %v3991_v17, %v3991_v17  ;;  %v6290_v17 = vcombine.high %v4012_v13, %v4012_v13 }
 0x3d3   :  { %2208 = vrot.lane.b32.xlu0 %v3859_v49, %s3334_s20  ;;  %v4348_v23 = vpop.permute.xlu1 %1230  ;;  %v395_v24 = vadd.f32 %v393_v18, %v345_v46  ;;  %v6291_v18 = vcombine.high %v4007_v43, %v4007_v43 }
 0x3d4   :  { %v346_v52 = vmul.f32 %v6288_v60, %v330_v10  ;;  %v4336_v10 = vmul.f32 %v6289_v40, %v354_v22  ;;  %v403_v60 = vsel %vm401_vm5, %v3728_v28, %v3732_v29  ;;  %v442_v22 = vmul.f32 %v6290_v17, %v426_v16  ;;  %v4366_v29 = vld.sshfl [vmem:[%s6005_s2 + $0x98] sm:$0x33 pattern:$0x76325410] }
 0x3d5   :  { %v474_v40 = vsel %vm473_vm7, %v3756_v35, %v3752_v34  ;;  %v475_v28 = vsel %vm473_vm7, %v3752_v34, %v3756_v35  ;;  %v4376_v34 = vld.sshfl [vmem:[%s6005_s2 + $0x9c] sm:$0x33 pattern:$0x76325410]  ;;  %v4378_v35 = vpop.permute.xlu0 %1256  ;;  %2184 = vrot.lane.b32.xlu1 %v3874_v50, %s3333_s19  ;;  %v4388_v46 = vmul.f32 %v6291_v18, %v402_v26  ;;  %v451_v16 = vsel %vm449_vm8, %v3744_v32, %v3748_v33 }
 0x3d6   :  { %v396_v13 = vadd.f32 %v394_v2, %v346_v52  ;;  %v4383_v2 = vmul.f32 %v4007_v43, %v403_v60  ;;  %v450_v52 = vsel %vm449_vm8, %v3748_v33, %v3744_v32  ;;  %v489_v17 = vmul.f32 %v4026_v48, %v475_v28 }
 0x3d7   :  { %v6292_v60 = vcombine.high %v4026_v48, %v4026_v48  ;;  %v522_v43 = vsel %vm6129_vm9, %v3772_v39, %v3768_v38  ;;  %v523_v26 = vsel %vm6129_vm9, %v3768_v38, %v3772_v39  ;;  %2230 = vrot.lane.b32.xlu0 %v3859_v49, %s3335_s21  ;;  %v4416_v48 = vld.sshfl [vmem:[%s6005_s2 + $0xa0] sm:$0x33 pattern:$0x76325410]  ;;  %v4418_v32 = vpop.permute.xlu1 %1254  ;;  %v443_v33 = vadd.f32 %v441_v30, %v395_v24 }
 0x3d8   :  { %6293 = vst [vmem:[#allocation78_spill] sm:$0xff] %v4416_v48  ;;  %v4428_v39 = vld.sshfl [vmem:[%s6005_s2 + $0xa4] sm:$0x33 pattern:$0x76325410]  ;;  %v4431_v18 = vmul.f32 %v4017_v44, %v451_v16  ;;  %v6295_v30 = vcombine.high %v4017_v44, %v4017_v44  ;;  %v498_v24 = vsel %vm6130_vm10, %v3764_v37, %v3760_v36  ;;  %v537_v16 = vmul.f32 %v4036_v14, %v523_v26 }
 0x3d9   :  { %v490_v31 = vmul.f32 %v6292_v60, %v474_v40  ;;  %v444_v40 = vadd.f32 %v442_v22, %v396_v13  ;;  %6294 = vst [vmem:[#allocation79_spill] sm:$0xff] %v4428_v39  ;;  %v499_v13 = vsel %vm6130_vm10, %v3760_v36, %v3764_v37  ;;  %v4446_v60 = vpop.permute.xlu0 %1280  ;;  %2206 = vrot.lane.b32.xlu1 %v3874_v50, %s3334_s20  ;;  %vm6153_vm9 = vcmp.lt.s32.totalorder %v3997_v47, 17  ;;  %v4466_v37 = vld.sshfl [vmem:[%s6005_s2 + $0xa8] sm:$0x33 pattern:$0x76325410] }
 0x3da   :  { %v4436_v22 = vmul.f32 %v6295_v30, %v450_v52  ;;  %6296 = vst [vmem:[#allocation80_spill] sm:$0xff] %v4446_v60  ;;  %v6297_v44 = vcombine.high %v4036_v14, %v4036_v14  ;;  %v570_v30 = vsel %vm6131_vm11, %v3788_v4, %v3784_v1  ;;  %v571_v36 = vsel %vm6131_vm11, %v3784_v1, %v3788_v4  ;;  %v6348_v60 = vld [vmem:[#allocation39_spill] sm:$0xff]  ;;  %s6441_s20 = smov 98  }
 0x3db   :  { %6298 = vst [vmem:[#allocation81_spill] sm:$0xff] %v4466_v37  ;;  %v491_v26 = vadd.f32 %v489_v17, %v443_v33  ;;  %v492_v14 = vadd.f32 %v490_v31, %v444_v40  ;;  %vm6154_vm10 = vcmp.lt.s32.totalorder %v3997_v47, 14  ;;  %2252 = vrot.lane.b32.xlu0 %v3859_v49, %s3336_s22  ;;  %v4475_v4 = vpop.permute.xlu1 %1278  ;;  %v4483_v31 = vmul.f32 %v4031_v41, %v499_v13 }
 0x3dc   :  { %v538_v52 = vmul.f32 %v6297_v44, %v522_v43  ;;  %6299 = vst [vmem:[#allocation82_spill] sm:$0xff] %v4475_v4  ;;  %v4480_v44 = vld.sshfl [vmem:[%s6005_s2 + $0xac] sm:$0x33 pattern:$0x76325410]  ;;  %v6301_v17 = vcombine.high %v4031_v41, %v4031_v41  ;;  %v546_v40 = vsel %vm6132_vm12, %v3780_v45, %v3776_v42  ;;  %v547_v1 = vsel %vm6132_vm12, %v3776_v42, %v3780_v45 }
 0x3dd   :  { %6300 = vst [vmem:[#allocation83_spill] sm:$0xff] %v4480_v44  ;;  %vm6159_vm11 = vcmp.lt.s32.totalorder %v3997_v47, 15  ;;  %v585_v13 = vmul.f32 %v4048_v6, %v571_v36  ;;  %v6302_v43 = vcombine.high %v4048_v6, %v4048_v6  ;;  %v4511_v38 = vpop.permute.xlu0 %1304  ;;  %2228 = vrot.lane.b32.xlu1 %v3874_v50, %s3335_s21  ;;  %v4518_v42 = vld.sshfl [vmem:[%s6005_s2 + $0xb0] sm:$0x33 pattern:$0x76325410]  ;;  %v539_v45 = vadd.f32 %v537_v16, %v491_v26 }
 0x3de   :  { %v4488_v33 = vmul.f32 %v6301_v17, %v498_v24  ;;  %v618_v24 = vsel %vm6133_vm13, %v3810_v21, %v3804_v19  ;;  %v619_v17 = vsel %vm6133_vm13, %v3804_v19, %v3810_v21  ;;  %6303 = vst [vmem:[#allocation84_spill] sm:$0xff] %v4511_v38  ;;  %6304 = vst [vmem:[#allocation85_spill] sm:$0xff] %v4518_v42  ;;  %vm6160_vm12 = vcmp.lt.s32.totalorder %v3997_v47, 3 }
 0x3df   :  { %v586_v41 = vmul.f32 %v6302_v43, %v570_v30  ;;  %v540_v6 = vadd.f32 %v538_v52, %v492_v14  ;;  %v4528_v21 = vld.sshfl [vmem:[%s6005_s2 + $0xb4] sm:$0x33 pattern:$0x76325410]  ;;  %v4531_v36 = vmul.f32 %v4041_v51, %v547_v1  ;;  %v6306_v16 = vcombine.high %v4041_v51, %v4041_v51  ;;  %2274 = vrot.lane.b32.xlu0 %v3859_v49, %s3337_s0  ;;  %v4548_v43 = vpop.permute.xlu1 %1302 }
 0x3e0   :  { %6305 = vst [vmem:[#allocation86_spill] sm:$0xff] %v4528_v21  ;;  %v594_v26 = vsel %vm6134_vm14, %v3800_v15, %v3794_v8  ;;  %v595_v14 = vsel %vm6134_vm14, %v3794_v8, %v3800_v15  ;;  %6307 = vst [vmem:[#allocation87_spill] sm:$0xff] %v4548_v43  ;;  %v633_v1 = vmul.f32 %v4058_v7, %v619_v17  ;;  %vm6170_vm13 = vcmp.lt.s32.totalorder %v3997_v47, 13  ;;  %v6338_v43 = vld [vmem:[#allocation64_spill] sm:$0xff] }
 0x3e1   :  { %v4536_v52 = vmul.f32 %v6306_v16, %v546_v40  ;;  %v6308_v51 = vcombine.high %v4058_v7, %v4058_v7  ;;  %v6309_v16 = vld [vmem:[#allocation22_spill] sm:$0xff]  ;;  %vm6171_vm14 = vcmp.lt.s32.totalorder %v3997_v47, 1  ;;  %v587_v7 = vadd.f32 %v585_v13, %v539_v45  ;;  %v4569_v17 = vpop.permute.xlu0 %1328  ;;  %2250 = vrot.lane.b32.xlu1 %v3874_v50, %s3336_s22  ;;  %v6314_v45 = vld [vmem:[#allocation20_spill] sm:$0xff] }
 0x3e2   :  { %v666_v19 = vsel %vm6135_vm15, %v6309_v16, %v3824_v58  ;;  %v667_v8 = vsel %vm6135_vm15, %v3824_v58, %v6309_v16  ;;  %v4567_v15 = vld.sshfl [vmem:[%s6005_s2 + $0xb8] sm:$0x33 pattern:$0x76325410]  ;;  %6311 = vst [vmem:[#allocation88_spill] sm:$0xff] %v4569_v17  ;;  %v4583_v30 = vmul.f32 %v4053_v5, %v595_v14  ;;  %v6313_v13 = vcombine.high %v4053_v5, %v4053_v5  ;;  %v6330_v17 = vld [vmem:[#allocation27_spill] sm:$0xff] }
 0x3e3   :  { %v634_v40 = vmul.f32 %v6308_v51, %v618_v24  ;;  %6310 = vst [vmem:[#allocation22_spill] sm:$0xff] %v4567_v15  ;;  %v588_v24 = vadd.f32 %v586_v41, %v540_v6  ;;  %v4580_v16 = vld.sshfl [vmem:[%s6005_s2 + $0xbc] sm:$0x33 pattern:$0x76325410]  ;;  %v6315_v6 = vld [vmem:[#allocation21_spill] sm:$0xff]  ;;  %v681_v14 = vmul.f32 %v4078_v59, %v667_v8  ;;  %v6316_v28 = vcombine.high %v4078_v59, %v4078_v59  ;;  %v4614_v8 = vpop.permute.xlu1 %1326 }
 0x3e4   :  { %6312 = vst [vmem:[#allocation89_spill] sm:$0xff] %v4580_v16  ;;  %v4588_v41 = vmul.f32 %v6313_v13, %v594_v26  ;;  %v642_v51 = vsel %vm6140_vm0, %v6315_v6, %v6314_v45  ;;  %v643_v58 = vsel %vm6140_vm0, %v6314_v45, %v6315_v6  ;;  %vm6173_vm15 = vcmp.lt.s32.totalorder %v3997_v47, 127  ;;  %v6317_v26 = vld [vmem:[#allocation25_spill] sm:$0xff]  ;;  %v6318_v13 = vld [vmem:[#allocation26_spill] sm:$0xff]  ;;  %2296 = vrot.lane.b32.xlu0 %v3859_v49, %s3338_s23 }
 0x3e5   :  { %v682_v5 = vmul.f32 %v6316_v28, %v666_v19  ;;  %v714_v42 = vsel %vm6145_vm1, %v6318_v13, %v6317_v26  ;;  %v715_v21 = vsel %vm6145_vm1, %v6317_v26, %v6318_v13  ;;  %vm6177_vm0 = vcmp.lt.s32.totalorder %v3997_v47, 2  ;;  %6319 = vst [vmem:[#allocation20_spill] sm:$0xff] %v4614_v8  ;;  %v4623_v6 = vld.sshfl [vmem:[%s6005_s2 + $0xc0] sm:$0x33 pattern:$0x76325410]  ;;  %v4642_v19 = vpop.permute.xlu0 %1352  ;;  %2272 = vrot.lane.b32.xlu1 %v3874_v50, %s3337_s0 }
 0x3e6   :  { %v635_v45 = vadd.f32 %v633_v1, %v587_v7  ;;  %v636_v59 = vadd.f32 %v634_v40, %v588_v24  ;;  %6320 = vst [vmem:[#allocation21_spill] sm:$0xff] %v4623_v6  ;;  %v6321_v26 = vld [vmem:[#allocation62_spill] sm:$0xff]  ;;  %v6323_v1 = vld [vmem:[#allocation23_spill] sm:$0xff]  ;;  %v6324_v40 = vld [vmem:[#allocation24_spill] sm:$0xff]  ;;  %vm6178_vm1 = vcmp.lt.s32.totalorder %v3997_v47, 125  ;;  %s6331_s0 = smov 127   ;;  %v6346_v38 = vcombine.high %v4113_v61, %v4113_v61 }
 0x3e7   :  { %v4626_v13 = vmul.f32 %v6321_v26, %v643_v58  ;;  %v6322_v44 = vcombine.high %v6321_v26, %v6321_v26  ;;  %v690_v7 = vsel %vm6153_vm9, %v6324_v40, %v6323_v1  ;;  %v691_v24 = vsel %vm6153_vm9, %v6323_v1, %v6324_v40  ;;  %6325 = vst [vmem:[#allocation25_spill] sm:$0xff] %v4642_v19  ;;  %v6327_v28 = vld [vmem:[#allocation29_spill] sm:$0xff]  ;;  %v6328_v1 = vld [vmem:[#allocation30_spill] sm:$0xff]  ;;  %v6329_v8 = vld [vmem:[#allocation28_spill] sm:$0xff] }
 0x3e8   :  { %v6326_v58 = vcombine.high %v4088_v55, %v4088_v55  ;;  %v762_v40 = vsel %vm6154_vm10, %v6328_v1, %v6327_v28  ;;  %v763_v16 = vsel %vm6154_vm10, %v6327_v28, %v6328_v1  ;;  %v683_v15 = vadd.f32 %v681_v14, %v635_v45  ;;  %2334 = vrot.lane.b32.xlu0 %v3859_v49, %s6331_s0  ;;  %v4677_v14 = vld.sshfl [vmem:[%s6005_s2 + $0x4] sm:$0x33 pattern:$0x76325410] }
 0x3e9   :  { %v4631_v37 = vmul.f32 %v6322_v44, %v642_v51  ;;  %v4649_v44 = vld.sshfl [vmem:[%s6005_s2] sm:$0x33 pattern:$0x76325410]  ;;  %v729_v51 = vmul.f32 %v4088_v55, %v715_v21  ;;  %v684_v19 = vadd.f32 %v682_v5, %v636_v59  ;;  %v739_v21 = vsel %vm6159_vm11, %v6330_v17, %v6329_v8  ;;  %v4670_v55 = vpop.permute.xlu1 %1350  ;;  %v4713_v6 = vpop.permute.xlu0 %1376  ;;  %2294 = vrot.lane.b32.xlu1 %v3874_v50, %s3338_s23  ;;  %s6344_s23 = smov 126  }
 0x3ea   :  { %v730_v26 = vmul.f32 %v6326_v58, %v714_v42  ;;  %vm922_vm9 = vcmp.lt.s32.totalorder %v3997_v47, 126  ;;  %6332 = vst [vmem:[#allocation26_spill] sm:$0xff] %v4670_v55  ;;  %v4680_v5 = vmul.f32 %v4083_v53, %v691_v24  ;;  %v6333_v45 = vcombine.high %v4083_v53, %v4083_v53  ;;  %v4699_v24 = vld.sshfl [vmem:[%s6005_s2 + $0x8] sm:$0x33 pattern:$0x76325410] }
 0x3eb   :  { %v738_v28 = vsel %vm6159_vm11, %v6329_v8, %v6330_v17  ;;  %vm6185_vm10 = vcmp.lt.s32.totalorder %v3997_v47, 114  ;;  %v4694_v58 = vcombine.high %v4649_v44, %v4649_v44  ;;  %v777_v53 = vmul.f32 %v4103_v57, %v763_v16  ;;  %v6336_v42 = vld [vmem:[#allocation34_spill] sm:$0xff]  ;;  %6337 = vst [vmem:[#allocation62_spill] sm:$0xff] %v4713_v6 }
 0x3ec   :  { %v4685_v59 = vmul.f32 %v6333_v45, %v690_v7  ;;  %v6334_v7 = vcombine.high %v4103_v57, %v4103_v57  ;;  %v6335_v45 = vld [vmem:[#allocation33_spill] sm:$0xff]  ;;  %v731_v16 = vadd.f32 %v729_v51, %v683_v15  ;;  %v732_v55 = vadd.f32 %v730_v26, %v684_v19  ;;  %v6340_v15 = vld [vmem:[#allocation32_spill] sm:$0xff]  ;;  %v6341_v19 = vld [vmem:[#allocation31_spill] sm:$0xff]  ;;  %2356 = vrot.lane.b32.xlu0 %v3859_v49, %s6344_s23 }
 0x3ed   :  { %v810_v17 = vsel %vm6160_vm12, %v6336_v42, %v6335_v45  ;;  %v811_v8 = vsel %vm6160_vm12, %v6335_v45, %v6336_v42  ;;  %v4718_v57 = vmul.f32 %v6338_v43, %v739_v21  ;;  %vm6191_vm11 = vcmp.lt.s32.totalorder %v3997_v47, 115  ;;  %v6342_v26 = vld [vmem:[#allocation38_spill] sm:$0xff]  ;;  %v6343_v21 = vld [vmem:[#allocation37_spill] sm:$0xff]  ;;  %v4744_v6 = vpop.permute.xlu1 %1374  ;;  %2332 = vrot.lane.b32.xlu1 %v3874_v50, %s6331_s0  ;;  %s6515_s0 = smov 80  }
 0x3ee   :  { %v778_v1 = vmul.f32 %v6334_v7, %v762_v40  ;;  %v4726_v7 = vld.sshfl [vmem:[%s6005_s2 + $0xc] sm:$0x33 pattern:$0x76325410]  ;;  %v6339_v42 = vcombine.high %v6338_v43, %v6338_v43  ;;  %v787_v51 = vsel %vm6170_vm13, %v6341_v19, %v6340_v15  ;;  %v859_v40 = vsel %vm6171_vm14, %v6343_v21, %v6342_v26  ;;  %6345 = vst [vmem:[#allocation23_spill] sm:$0xff] %v4744_v6 }
 0x3ef   :  { %vm6192_vm12 = vcmp.lt.s32.totalorder %v3997_v47, 112  ;;  %v826_v39 = vmul.f32 %v6346_v38, %v810_v17  ;;  %v858_v48 = vsel %vm6171_vm14, %v6342_v26, %v6343_v21  ;;  %v4763_v43 = vld.sshfl [vmem:[%s6005_s2 + $0x10] sm:$0x33 pattern:$0x76325410]  ;;  %v779_v6 = vadd.f32 %v777_v53, %v731_v16  ;;  %v6351_v53 = vld [vmem:[#allocation36_spill] sm:$0xff] }
 0x3f0   :  { %v4731_v45 = vmul.f32 %v6339_v42, %v738_v28  ;;  %v786_v28 = vsel %vm6170_vm13, %v6340_v15, %v6341_v19  ;;  %v825_v42 = vmul.f32 %v4113_v61, %v811_v8  ;;  %6347 = vst [vmem:[#allocation24_spill] sm:$0xff] %v4763_v43  ;;  %v780_v4 = vadd.f32 %v778_v1, %v732_v55  ;;  %v6349_v15 = vld [vmem:[#allocation40_spill] sm:$0xff]  ;;  %v4770_v61 = vpop.permute.xlu0 %1400  ;;  %v6352_v55 = vld [vmem:[#allocation35_spill] sm:$0xff] }
 0x3f1   :  { %v899_v8 = vsel %vm6173_vm15, %v6349_v15, %v6348_v60  ;;  %vm6200_vm13 = vcmp.lt.s32.totalorder %v3997_v47, 110  ;;  %6350 = vst [vmem:[#allocation29_spill] sm:$0xff] %v4770_v61  ;;  %v4777_v17 = vmul.f32 %v4108_v63, %v787_v51  ;;  %v835_v1 = vsel %vm6177_vm0, %v6352_v55, %v6351_v53  ;;  %v4792_v26 = vld.sshfl [vmem:[%s6005_s2 + $0x14] sm:$0x33 pattern:$0x76325410]  ;;  %2378 = vrot.lane.b32.xlu0 %v3859_v49, %s6357_s7  ;;  %v4808_v38 = vpop.permute.xlu1 %1398 }
 0x3f2   :  { %v873_v16 = vmul.f32 %v4136_v11, %v859_v40  ;;  %v900_v19 = vsel %vm6173_vm15, %v6348_v60, %v6349_v15  ;;  %vm6201_vm14 = vcmp.lt.s32.totalorder %v3997_v47, 113  ;;  %6353 = vst [vmem:[#allocation30_spill] sm:$0xff] %v4792_v26  ;;  %v6354_v51 = vcombine.high %v4108_v63, %v4108_v63  ;;  %6358 = vst [vmem:[#allocation27_spill] sm:$0xff] %v4808_v38 }
 0x3f3   :  { %v834_v40 = vsel %vm6177_vm0, %v6351_v53, %v6352_v55  ;;  %v6356_v60 = vcombine.high %v4136_v11, %v4136_v11  ;;  %v4815_v63 = vld.sshfl [vmem:[%s6005_s2 + $0x18] sm:$0x33 pattern:$0x76325410]  ;;  %v914_v53 = vmul.f32 %v4141_v0, %v899_v8  ;;  %v6360_v55 = vld [vmem:[#allocation43_spill] sm:$0xff]  ;;  %v6361_v11 = vld [vmem:[#allocation44_spill] sm:$0xff]  ;;  %v6364_v61 = vcombine.high %v4141_v0, %v4141_v0  ;;  %2354 = vrot.lane.b32.xlu1 %v3874_v50, %s6344_s23 }
 0x3f4   :  { %v4797_v21 = vmul.f32 %v6354_v51, %v786_v28  ;;  %6359 = vst [vmem:[#allocation33_spill] sm:$0xff] %v4815_v63  ;;  %v827_v28 = vadd.f32 %v825_v42, %v779_v6  ;;  %v828_v51 = vadd.f32 %v826_v39, %v780_v4  ;;  %vm1066_vm15 = vcmp.lt.s32.totalorder %v3997_v47, 111  ;;  %v4833_v4 = vpop.permute.xlu0 %1424  ;;  %v4843_v0 = vld.sshfl [vmem:[%s6005_s2 + $0x1c] sm:$0x33 pattern:$0x76325410] }
 0x3f5   :  { %v874_v15 = vmul.f32 %v6356_v60, %v858_v48  ;;  %v947_v48 = vsel %vm6178_vm1, %v6361_v11, %v6360_v55  ;;  %v6362_v60 = vld [vmem:[#allocation65_spill] sm:$0xff]  ;;  %v915_v43 = vmul.f32 %v6364_v61, %v900_v19  ;;  %v948_v39 = vsel %vm6178_vm1, %v6360_v55, %v6361_v11  ;;  %6365 = vst [vmem:[#allocation64_spill] sm:$0xff] %v4833_v4  ;;  %v6370_v19 = vld [vmem:[#allocation42_spill] sm:$0xff]  ;;  %v4873_v11 = vpop.permute.xlu1 %1422  ;;  %s6428_s23 = smov 109  }
 0x3f6   :  { %6355 = vst [vmem:[#allocation28_spill] sm:$0xff] %v4797_v21  ;;  %v4824_v38 = vmul.f32 %v6362_v60, %v835_v1  ;;  %vm306_vm0 = vcmp.lt.s32.totalorder %v3997_v47, 51  ;;  %6366 = vst [vmem:[#allocation32_spill] sm:$0xff] %v4843_v0  ;;  %v6367_v42 = vcombine.high %v6362_v60, %v6362_v60  ;;  %v875_v61 = vadd.f32 %v873_v16, %v827_v28  ;;  %v6369_v1 = vld [vmem:[#allocation41_spill] sm:$0xff]  ;;  %v6372_v60 = vld [vmem:[#allocation47_spill] sm:$0xff] }
 0x3f7   :  { %v923_v55 = vsel %vm922_vm9, %v6370_v19, %v6369_v1  ;;  %vm1138_vm1 = vcmp.lt.s32.totalorder %v3997_v47, 99  ;;  %v4860_v6 = vld.sshfl [vmem:[%s6005_s2 + $0x20] sm:$0x33 pattern:$0x76325410]  ;;  %v876_v4 = vadd.f32 %v874_v15, %v828_v51  ;;  %v6373_v16 = vld [vmem:[#allocation48_spill] sm:$0xff]  ;;  %2400 = vrot.lane.b32.xlu0 %v3859_v49, %s3342_s27  ;;  %v924_v15 = vsel %vm922_vm9, %v6369_v1, %v6370_v19  ;;  %2376 = vrot.lane.b32.xlu1 %v3874_v50, %s6357_s7 }
 0x3f8   :  { %6363 = vst [vmem:[#allocation34_spill] sm:$0xff] %v4824_v38  ;;  %v4848_v8 = vmul.f32 %v6367_v42, %v834_v40  ;;  %6371 = vst [vmem:[#allocation38_spill] sm:$0xff] %v4860_v6  ;;  %v962_v40 = vmul.f32 %v4151_v62, %v947_v48  ;;  %v995_v28 = vsel %vm6185_vm10, %v6373_v16, %v6372_v60  ;;  %v6383_v19 = vld [vmem:[#allocation71_spill] sm:$0xff]  ;;  %v6386_v0 = vld [vmem:[#allocation52_spill] sm:$0xff]  ;;  %s6472_s7 = smov 95  }
 0x3f9   :  { %v996_v42 = vsel %vm6185_vm10, %v6372_v60, %v6373_v16  ;;  %6374 = vst [vmem:[#allocation37_spill] sm:$0xff] %v4873_v11  ;;  %v916_v63 = vadd.f32 %v914_v53, %v875_v61  ;;  %v6375_v51 = vcombine.high %v4151_v62, %v4151_v62  ;;  %v4887_v60 = vld.sshfl [vmem:[%s6005_s2 + $0x24] sm:$0x33 pattern:$0x76325410]  ;;  %v917_v16 = vadd.f32 %v915_v43, %v876_v4  ;;  %v6377_v11 = vld [vmem:[#allocation68_spill] sm:$0xff]  ;;  %v4897_v62 = vpop.permute.xlu0 %1448 }
 0x3fa   :  { %6368 = vst [vmem:[#allocation31_spill] sm:$0xff] %v4848_v8  ;;  %6376 = vst [vmem:[#allocation39_spill] sm:$0xff] %v4887_v60  ;;  %v4890_v53 = vmul.f32 %v6377_v11, %v923_v55  ;;  %v6379_v61 = vld [vmem:[#allocation45_spill] sm:$0xff]  ;;  %v6380_v8 = vld [vmem:[#allocation46_spill] sm:$0xff]  ;;  %vm6202_vm10 = vcmp.lt.s32.totalorder %v3997_v47, 97  ;;  %v1010_v55 = vmul.f32 %v6383_v19, %v995_v28  ;;  %v6387_v6 = vcombine.high %v6377_v11, %v6377_v11  ;;  %v4932_v28 = vpop.permute.xlu1 %1446 }
 0x3fb   :  { %v963_v48 = vmul.f32 %v6375_v51, %v948_v39  ;;  %v971_v1 = vsel %vm6191_vm11, %v6380_v8, %v6379_v61  ;;  %6381 = vst [vmem:[#allocation36_spill] sm:$0xff] %v4897_v62  ;;  %v4906_v43 = vld.sshfl [vmem:[%s6005_s2 + $0x28] sm:$0x33 pattern:$0x76325410]  ;;  %v972_v4 = vsel %vm6191_vm11, %v6379_v61, %v6380_v8  ;;  %v6384_v51 = vcombine.high %v6383_v19, %v6383_v19  ;;  %v6385_v62 = vld [vmem:[#allocation51_spill] sm:$0xff] }
 0x3fc   :  { %6378 = vst [vmem:[#allocation40_spill] sm:$0xff] %v4890_v53  ;;  %6382 = vst [vmem:[#allocation35_spill] sm:$0xff] %v4906_v43  ;;  %v1043_v39 = vsel %vm6192_vm12, %v6386_v0, %v6385_v62  ;;  %v4923_v53 = vmul.f32 %v6387_v6, %v924_v15  ;;  %v964_v38 = vadd.f32 %v962_v40, %v916_v63  ;;  %vm1114_vm11 = vcmp.lt.s32.totalorder %v3997_v47, 109  ;;  %v6392_v11 = vld [vmem:[#allocation70_spill] sm:$0xff]  ;;  %v6395_v15 = vld [vmem:[#allocation56_spill] sm:$0xff] }
 0x3fd   :  { %v1011_v26 = vmul.f32 %v6384_v51, %v996_v42  ;;  %v1044_v8 = vsel %vm6192_vm12, %v6385_v62, %v6386_v0  ;;  %2422 = vrot.lane.b32.xlu0 %v3859_v49, %s6389_s1  ;;  %6390 = vst [vmem:[#allocation44_spill] sm:$0xff] %v4932_v28  ;;  %v4939_v6 = vld.sshfl [vmem:[%s6005_s2 + $0x2c] sm:$0x33 pattern:$0x76325410]  ;;  %v965_v63 = vadd.f32 %v963_v48, %v917_v16  ;;  %v6394_v0 = vld [vmem:[#allocation55_spill] sm:$0xff]  ;;  %v1791_v60 = vpop.permute.xlu0 %1790 }
 0x3fe   :  { %6388 = vst [vmem:[#allocation43_spill] sm:$0xff] %v4923_v53  ;;  %6391 = vst [vmem:[#allocation65_spill] sm:$0xff] %v4939_v6  ;;  %v4942_v40 = vmul.f32 %v6392_v11, %v971_v1  ;;  %v1091_v61 = vsel %vm6200_vm13, %v6395_v15, %v6394_v0  ;;  %vm1162_vm12 = vcmp.lt.s32.totalorder %v3997_v47, 98  ;;  %v6396_v48 = vcombine.high %v6392_v11, %v6392_v11  ;;  %v6398_v1 = vld [vmem:[#allocation49_spill] sm:$0xff]  ;;  %v6399_v51 = vld [vmem:[#allocation50_spill] sm:$0xff] }
 0x3ff   :  { %v4954_v19 = vld.sshfl [vmem:[%s6005_s2 + $0x30] sm:$0x33 pattern:$0x76325410]  ;;  %v1019_v42 = vsel %vm6201_vm14, %v6399_v51, %v6398_v1  ;;  %v1020_v62 = vsel %vm6201_vm14, %v6398_v1, %v6399_v51  ;;  %v6400_v43 = vld [vmem:[#allocation74_spill] sm:$0xff]  ;;  %2398 = vrot.lane.b32.xlu1 %v3874_v50, %s3342_s27  ;;  %v1013_v11 = vadd.f32 %v1011_v26, %v965_v63  ;;  %s6404_s27 = smov 113   ;;  %v303_v26 = vpop.permute.xlu1 %302 }
 0x400   :  { %6393 = vst [vmem:[#allocation41_spill] sm:$0xff] %v4942_v40  ;;  %v4959_v16 = vmul.f32 %v6396_v48, %v972_v4  ;;  %v1058_v28 = vmul.f32 %v6400_v43, %v1043_v39  ;;  %v1012_v40 = vadd.f32 %v1010_v55, %v964_v38  ;;  %v6401_v4 = vcombine.high %v6400_v43, %v6400_v43  ;;  %v6402_v53 = vld [vmem:[#allocation53_spill] sm:$0xff]  ;;  %v6403_v21 = vld [vmem:[#allocation54_spill] sm:$0xff]  ;;  %v6409_v6 = vld [vmem:[#allocation60_spill] sm:$0xff] }
 0x401   :  { %v1067_v1 = vsel %vm1066_vm15, %v6403_v21, %v6402_v53  ;;  %v1092_v39 = vsel %vm6200_vm13, %v6394_v0, %v6395_v15  ;;  %v1106_v38 = vmul.f32 %v4236_v3, %v1091_v61  ;;  %2444 = vrot.lane.b32.xlu0 %v3859_v49, %s6404_s27  ;;  %v6405_v55 = vld [vmem:[#allocation73_spill] sm:$0xff]  ;;  %vm1210_vm13 = vcmp.lt.s32.totalorder %v3997_v47, 96 }
 0x402   :  { %6397 = vst [vmem:[#allocation42_spill] sm:$0xff] %v4959_v16  ;;  %v1059_v48 = vmul.f32 %v6401_v4, %v1044_v8  ;;  %v4991_v8 = vmul.f32 %v6405_v55, %v1019_v42  ;;  %v6406_v63 = vcombine.high %v6405_v55, %v6405_v55  ;;  %v6407_v4 = vld [vmem:[#allocation19_spill] sm:$0xff]  ;;  %v1060_v61 = vadd.f32 %v1058_v28, %v1012_v40 }
 0x403   :  { %v307_v0 = vsel %vm306_vm0, %v6407_v4, %v303_v26  ;;  %v308_v15 = vsel %vm306_vm0, %v303_v26, %v6407_v4  ;;  %v6408_v16 = vld [vmem:[#allocation59_spill] sm:$0xff]  ;;  %2420 = vrot.lane.b32.xlu1 %v3874_v50, %s6389_s1  ;;  %v1068_v26 = vsel %vm1066_vm15, %v6402_v53, %v6403_v21  ;;  %v5017_v28 = vmul.f32 %v4223_v9, %v1067_v1  ;;  %v1789_v53 = vpop.permute.xlu1 %1788 }
 0x404   :  { %v4996_v51 = vmul.f32 %v6406_v63, %v1020_v62  ;;  %v1139_v42 = vsel %vm1138_vm1, %v6409_v6, %v6408_v16  ;;  %v321_v43 = vmul.f32 %v4649_v44, %v308_v15  ;;  %v322_v55 = vmul.f32 %v4694_v58, %v307_v0  ;;  %v1813_v62 = vpop.permute.xlu0 %1812  ;;  %v6413_v1 = vld [vmem:[#allocation75_spill] sm:$0xff] }
 0x405   :  { %v1061_v63 = vadd.f32 %v1059_v48, %v1013_v11  ;;  %v6410_v40 = vcombine.high %v4236_v3, %v4236_v3  ;;  %v1108_v15 = vadd.f32 %v1106_v38, %v1060_v61  ;;  %v1140_v0 = vsel %vm1138_vm1, %v6408_v16, %v6409_v6  ;;  %2466 = vrot.lane.b32.xlu0 %v3859_v49, %s6411_s16  ;;  %v6412_v48 = vld [vmem:[#allocation72_spill] sm:$0xff] }
 0x406   :  { %vm1234_vm14 = vcmp.lt.s32.totalorder %v3997_v47, 95  ;;  %v371_v11 = vadd.f32 %v4331_v56, %v321_v43  ;;  %v372_v21 = vadd.f32 %v4336_v10, %v322_v55  ;;  %v1154_v3 = vmul.f32 %v4276_v12, %v1139_v42  ;;  %v6414_v55 = vld [vmem:[#allocation57_spill] sm:$0xff] }
 0x407   :  { %v1107_v4 = vmul.f32 %v6410_v40, %v1092_v39  ;;  %v1187_v39 = vsel %vm6202_vm10, %v6413_v1, %v6412_v48  ;;  %v1792_v6 = vsel %vm306_vm0, %v1789_v53, %v1791_v60  ;;  %v1793_v16 = vsel %vm306_vm0, %v1791_v60, %v1789_v53  ;;  %2442 = vrot.lane.b32.xlu1 %v3874_v50, %s6404_s27  ;;  %v6415_v40 = vld [vmem:[#allocation58_spill] sm:$0xff] }
 0x408   :  { %v1188_v56 = vsel %vm6202_vm10, %v6412_v48, %v6413_v1  ;;  %v419_v10 = vadd.f32 %v4383_v2, %v371_v11  ;;  %v420_v38 = vadd.f32 %v4388_v46, %v372_v21  ;;  %v1807_v43 = vmul.f32 %v1792_v6, %v4694_v58  ;;  %v1835_v61 = vpop.permute.xlu0 %1834  ;;  %v6417_v58 = vld [vmem:[#allocation63_spill] sm:$0xff]  ;;  %v6418_v11 = vld [vmem:[#allocation66_spill] sm:$0xff]  ;;  %v1811_v1 = vpop.permute.xlu1 %1810 }
 0x409   :  { %v1109_v42 = vadd.f32 %v1107_v4, %v1061_v63  ;;  %v1115_v60 = vsel %vm1114_vm11, %v6415_v40, %v6414_v55  ;;  %v1116_v53 = vsel %vm1114_vm11, %v6414_v55, %v6415_v40  ;;  %v6416_v2 = vcombine.high %v4276_v12, %v4276_v12  ;;  %2488 = vrot.lane.b32.xlu0 %v3859_v49, %s6419_s29 }
 0x40a   :  { %v1163_v21 = vsel %vm1162_vm12, %v6418_v11, %v6417_v58  ;;  %v1202_v63 = vmul.f32 %v4328_v27, %v1187_v39  ;;  %v467_v4 = vadd.f32 %v4431_v18, %v419_v10  ;;  %v468_v48 = vadd.f32 %v4436_v22, %v420_v38 }
 0x40b   :  { %v1155_v46 = vmul.f32 %v6416_v2, %v1140_v0  ;;  %v1164_v12 = vsel %vm1162_vm12, %v6417_v58, %v6418_v11  ;;  %v6420_v0 = vcombine.high %v4328_v27, %v4328_v27  ;;  %v1814_v39 = vsel %vm329_vm2, %v1811_v1, %v1813_v62  ;;  %2464 = vrot.lane.b32.xlu1 %v3874_v50, %s6411_s16 }
 0x40c   :  { %v1815_v18 = vsel %vm329_vm2, %v1813_v62, %v1811_v1  ;;  %v6421_v22 = vcombine.high %v4223_v9, %v4223_v9  ;;  %v1156_v38 = vadd.f32 %v1154_v3, %v1108_v15  ;;  %vm1258_vm0 = vcmp.lt.s32.totalorder %v3997_v47, 94  ;;  %v1857_v27 = vpop.permute.xlu0 %1856 }
 0x40d   :  { %v1203_v6 = vmul.f32 %v6420_v0, %v1188_v56  ;;  %v515_v55 = vadd.f32 %v4483_v31, %v467_v4  ;;  %v516_v40 = vadd.f32 %v4488_v33, %v468_v48  ;;  %v5092_v56 = vmul.f32 %v4258_v20, %v1115_v60  ;;  %2510 = vrot.lane.b32.xlu0 %v3859_v49, %s6424_s30 }
 0x40e   :  { %v5084_v10 = vmul.f32 %v6421_v22, %v1068_v26  ;;  %v6422_v62 = vcombine.high %v4258_v20, %v4258_v20  ;;  %v1157_v26 = vadd.f32 %v1155_v46, %v1109_v42  ;;  %v5100_v15 = vmul.f32 %v4310_v25, %v1163_v21  ;;  %v1833_v20 = vpop.permute.xlu1 %1832 }
 0x40f   :  { %v6423_v31 = vcombine.high %v4310_v25, %v4310_v25  ;;  %v1204_v3 = vadd.f32 %v1202_v63, %v1156_v38  ;;  %vm6203_vm2 = vcmp.lt.s32.totalorder %v3997_v47, 93  ;;  %v563_v60 = vadd.f32 %v4531_v36, %v515_v55  ;;  %2486 = vrot.lane.b32.xlu1 %v3874_v50, %s6419_s29 }
 0x410   :  { %v5097_v9 = vmul.f32 %v6422_v62, %v1116_v53  ;;  %v564_v2 = vadd.f32 %v4536_v52, %v516_v40  ;;  %v1205_v42 = vadd.f32 %v1203_v6, %v1157_v26  ;;  %v1806_v53 = vmul.f32 %v4649_v44, %v1793_v16  ;;  %v1879_v63 = vpop.permute.xlu0 %1878  ;;  %v6426_v44 = vld [vmem:[#allocation76_spill] sm:$0xff]  ;;  %v6427_v16 = vld [vmem:[#allocation77_spill] sm:$0xff] }
 0x411   :  { %v5105_v33 = vmul.f32 %v6423_v31, %v1164_v12  ;;  %v1836_v46 = vsel %vm353_vm3, %v1833_v20, %v1835_v61  ;;  %v1837_v25 = vsel %vm353_vm3, %v1835_v61, %v1833_v20  ;;  %v611_v58 = vadd.f32 %v4583_v30, %v563_v60  ;;  %2532 = vrot.lane.b32.xlu0 %v3859_v49, %s6428_s23 }
 0x412   :  { %v612_v11 = vadd.f32 %v4588_v41, %v564_v2  ;;  %v1850_v36 = vmul.f32 %v4699_v24, %v1837_v25  ;;  %v6425_v52 = vcombine.high %v4699_v24, %v4699_v24  ;;  %v1211_v4 = vsel %vm1210_vm13, %v6427_v16, %v6426_v44  ;;  %v1855_v0 = vpop.permute.xlu1 %1854  ;;  %v6435_v25 = vld [vmem:[#allocation24_spill] sm:$0xff] }
 0x413   :  { %v1212_v30 = vsel %vm1210_vm13, %v6426_v44, %v6427_v16  ;;  %v1235_v41 = vsel %vm1234_vm14, %v4348_v23, %v4312_v54  ;;  %v1236_v24 = vsel %vm1234_vm14, %v4312_v54, %v4348_v23  ;;  %vm1306_vm3 = vcmp.lt.s32.totalorder %v3997_v47, 83  ;;  %2508 = vrot.lane.b32.xlu1 %v3874_v50, %s6424_s30  ;;  %v6438_v44 = vld [vmem:[#allocation82_spill] sm:$0xff] }
 0x414   :  { %v1851_v21 = vmul.f32 %v6425_v52, %v1836_v46  ;;  %vm1330_vm10 = vcmp.lt.s32.totalorder %v3997_v47, 82  ;;  %v659_v61 = vadd.f32 %v4626_v13, %v611_v58  ;;  %v660_v48 = vadd.f32 %v4631_v37, %v612_v11  ;;  %v1901_v40 = vpop.permute.xlu0 %1900  ;;  %v6439_v16 = vld [vmem:[#allocation34_spill] sm:$0xff] }
 0x415   :  { %v1852_v1 = vadd.f32 %v1850_v36, %v1806_v53  ;;  %v1828_v6 = vmul.f32 %v4677_v14, %v1815_v18  ;;  %v6429_v22 = vcombine.high %v4677_v14, %v4677_v14  ;;  %v1858_v23 = vsel %vm377_vm4, %v1855_v0, %v1857_v27  ;;  %2554 = vrot.lane.b32.xlu0 %v3859_v49, %s6433_s5  ;;  %v6434_v53 = vld [vmem:[#allocation28_spill] sm:$0xff] }
 0x416   :  { %v1853_v12 = vadd.f32 %v1851_v21, %v1807_v43  ;;  %v1859_v13 = vsel %vm377_vm4, %v1857_v27, %v1855_v0  ;;  %v707_v37 = vadd.f32 %v4680_v5, %v659_v61  ;;  %v708_v43 = vadd.f32 %v4685_v59, %v660_v48  ;;  %v1877_v2 = vpop.permute.xlu1 %1876  ;;  %v6437_v21 = vld [vmem:[#allocation80_spill] sm:$0xff]  ;;  %v6442_v61 = vld [vmem:[#allocation78_spill] sm:$0xff] }
 0x417   :  { %v1829_v54 = vmul.f32 %v6429_v22, %v1814_v39  ;;  %v1872_v38 = vmul.f32 %v4726_v7, %v1859_v13  ;;  %v6430_v55 = vcombine.high %v4726_v7, %v4726_v7  ;;  %v5164_v14 = vmul.f32 %v4366_v29, %v1211_v4  ;;  %2530 = vrot.lane.b32.xlu1 %v3874_v50, %s6428_s23 }
 0x418   :  { %v6431_v39 = vcombine.high %v4366_v29, %v4366_v29  ;;  %v1250_v5 = vmul.f32 %v4376_v34, %v1235_v41  ;;  %v6432_v59 = vcombine.high %v4376_v34, %v4376_v34  ;;  %v755_v7 = vadd.f32 %v4718_v57, %v707_v37  ;;  %v1923_v52 = vpop.permute.xlu0 %1922  ;;  %v6446_v37 = vld [vmem:[#allocation30_spill] sm:$0xff] }
 0x419   :  { %v1873_v18 = vmul.f32 %v6430_v55, %v1858_v23  ;;  %v756_v26 = vadd.f32 %v4731_v45, %v708_v43  ;;  %v1874_v31 = vadd.f32 %v1872_v38, %v1828_v6  ;;  %v1259_v29 = vsel %vm1258_vm0, %v4418_v32, %v4378_v35  ;;  %2576 = vrot.lane.b32.xlu0 %v3859_v49, %s6441_s20  ;;  %v6445_v23 = vld [vmem:[#allocation69_spill] sm:$0xff] }
 0x41a   :  { %v5169_v27 = vmul.f32 %v6431_v39, %v1212_v30  ;;  %v1251_v62 = vmul.f32 %v6432_v59, %v1236_v24  ;;  %v1260_v34 = vsel %vm1258_vm0, %v4378_v35, %v4418_v32  ;;  %v1880_v57 = vsel %vm401_vm5, %v1877_v2, %v1879_v63  ;;  %v6440_v30 = vld [vmem:[#allocation31_spill] sm:$0xff]  ;;  %v1899_v24 = vpop.permute.xlu1 %1898 }
 0x41b   :  { %v1875_v60 = vadd.f32 %v1873_v18, %v1829_v54  ;;  %v1881_v45 = vsel %vm401_vm5, %v1879_v63, %v1877_v2  ;;  %v803_v20 = vadd.f32 %v4777_v17, %v755_v7  ;;  %v804_v46 = vadd.f32 %v6434_v53, %v756_v26  ;;  %2552 = vrot.lane.b32.xlu1 %v3874_v50, %s6433_s5  ;;  %v6448_v39 = vld [vmem:[#allocation79_spill] sm:$0xff]  ;;  %v6452_v2 = vld [vmem:[#allocation88_spill] sm:$0xff] }
 0x41c   :  { %v1894_v58 = vmul.f32 %v6435_v25, %v1881_v45  ;;  %v6436_v11 = vcombine.high %v6435_v25, %v6435_v25  ;;  %v1252_v35 = vadd.f32 %v1250_v5, %v1204_v3  ;;  %v1253_v32 = vadd.f32 %v1251_v62, %v1205_v42  ;;  %v1945_v18 = vpop.permute.xlu0 %1944  ;;  %v6450_v62 = vld [vmem:[#allocation84_spill] sm:$0xff]  ;;  %v6451_v7 = vld [vmem:[#allocation87_spill] sm:$0xff] }
 0x41d   :  { %v1283_v63 = vsel %vm6203_vm2, %v6438_v44, %v6437_v21  ;;  %v1284_v17 = vsel %vm6203_vm2, %v6437_v21, %v6438_v44  ;;  %vm6204_vm4 = vcmp.lt.s32.totalorder %v3997_v47, 81  ;;  %vm1378_vm5 = vcmp.lt.s32.totalorder %v3997_v47, 80  ;;  %2598 = vrot.lane.b32.xlu0 %v3859_v49, %s6456_s6  ;;  %v6457_v21 = vld [vmem:[#allocation41_spill] sm:$0xff] }
 0x41e   :  { %v1895_v36 = vmul.f32 %v6436_v11, %v1880_v57  ;;  %v851_v4 = vadd.f32 %v6439_v16, %v803_v20  ;;  %v852_v41 = vadd.f32 %v6440_v30, %v804_v46  ;;  %v1896_v3 = vadd.f32 %v1894_v58, %v1852_v1  ;;  %v6444_v1 = vld [vmem:[#allocation67_spill] sm:$0xff]  ;;  %v6454_v57 = vld [vmem:[#allocation40_spill] sm:$0xff]  ;;  %v1921_v58 = vpop.permute.xlu1 %1920  ;;  %v6459_v16 = vld [vmem:[#allocation33_spill] sm:$0xff] }
 0x41f   :  { %v5214_v48 = vmul.f32 %v6442_v61, %v1259_v29  ;;  %v6443_v0 = vcombine.high %v6442_v61, %v6442_v61  ;;  %v1902_v22 = vsel %vm425_vm6, %v1899_v24, %v1901_v40  ;;  %v1903_v54 = vsel %vm425_vm6, %v1901_v40, %v1899_v24  ;;  %v6453_v29 = vld [vmem:[#allocation20_spill] sm:$0xff]  ;;  %v6455_v20 = vld [vmem:[#allocation43_spill] sm:$0xff]  ;;  %2574 = vrot.lane.b32.xlu1 %v3874_v50, %s6441_s20 }
 0x420   :  { %v1897_v42 = vadd.f32 %v1895_v36, %v1853_v12  ;;  %v892_v12 = vadd.f32 %v6444_v1, %v851_v4  ;;  %v893_v13 = vadd.f32 %v6445_v23, %v852_v41  ;;  %v1916_v43 = vmul.f32 %v6446_v37, %v1903_v54  ;;  %v1967_v24 = vpop.permute.xlu0 %1966  ;;  %v6462_v54 = vld [vmem:[#allocation83_spill] sm:$0xff] }
 0x421   :  { %v5219_v6 = vmul.f32 %v6443_v0, %v1260_v34  ;;  %v6447_v38 = vcombine.high %v6446_v37, %v6446_v37  ;;  %v1298_v5 = vmul.f32 %v6448_v39, %v1283_v63  ;;  %v6449_v59 = vcombine.high %v6448_v39, %v6448_v39  ;;  %v6458_v63 = vld [vmem:[#allocation42_spill] sm:$0xff]  ;;  %2620 = vrot.lane.b32.xlu0 %v3859_v49, %s6463_s15  ;;  %v6466_v39 = vld [vmem:[#allocation32_spill] sm:$0xff] }
 0x422   :  { %v1307_v26 = vsel %vm1306_vm3, %v6451_v7, %v6450_v62  ;;  %v1331_v34 = vsel %vm1330_vm10, %v6453_v29, %v6452_v2  ;;  %v940_v45 = vadd.f32 %v6454_v57, %v892_v12  ;;  %v941_v53 = vadd.f32 %v6455_v20, %v893_v13 }
 0x423   :  { %v1917_v55 = vmul.f32 %v6447_v38, %v1902_v22  ;;  %v1299_v40 = vmul.f32 %v6449_v59, %v1284_v17  ;;  %v1918_v46 = vadd.f32 %v1916_v43, %v1874_v31  ;;  %v1308_v11 = vsel %vm1306_vm3, %v6450_v62, %v6451_v7  ;;  %v6461_v22 = vld [vmem:[#allocation81_spill] sm:$0xff]  ;;  %v1943_v43 = vpop.permute.xlu1 %1942  ;;  %2596 = vrot.lane.b32.xlu1 %v3874_v50, %s6456_s6 }
 0x424   :  { %v1332_v36 = vsel %vm1330_vm10, %v6452_v2, %v6453_v29  ;;  %vm1402_vm6 = vcmp.lt.s32.totalorder %v3997_v47, 79  ;;  %v1924_v31 = vsel %vm449_vm8, %v1921_v58, %v1923_v52  ;;  %vm6207_vm2 = vcmp.lt.s32.totalorder %v3997_v47, 78  ;;  %v1989_v62 = vpop.permute.xlu0 %1988  ;;  %v6469_v2 = vld [vmem:[#allocation26_spill] sm:$0xff]  ;;  %v6471_v29 = vld [vmem:[#allocation23_spill] sm:$0xff] }
 0x425   :  { %v1919_v25 = vadd.f32 %v1917_v55, %v1875_v60  ;;  %v1925_v60 = vsel %vm449_vm8, %v1923_v52, %v1921_v58  ;;  %v988_v44 = vadd.f32 %v6457_v21, %v940_v45  ;;  %v989_v17 = vadd.f32 %v6458_v63, %v941_v53  ;;  %2642 = vrot.lane.b32.xlu0 %v3859_v49, %s6472_s7  ;;  %v6475_v21 = vld [vmem:[#allocation86_spill] sm:$0xff] }
 0x426   :  { %v1938_v4 = vmul.f32 %v6459_v16, %v1925_v60  ;;  %v6460_v30 = vcombine.high %v6459_v16, %v6459_v16  ;;  %v1300_v61 = vadd.f32 %v1298_v5, %v1252_v35  ;;  %v1301_v0 = vadd.f32 %v1299_v40, %v1253_v32  ;;  %v6476_v63 = vld [vmem:[#allocation38_spill] sm:$0xff] }
 0x427   :  { %v5272_v52 = vmul.f32 %v6461_v22, %v1307_v26  ;;  %v1346_v1 = vmul.f32 %v6462_v54, %v1331_v34  ;;  %v1036_v12 = vadd.f32 %v4991_v8, %v988_v44  ;;  %v1037_v23 = vadd.f32 %v4996_v51, %v989_v17  ;;  %v6468_v26 = vld [vmem:[#allocation25_spill] sm:$0xff]  ;;  %v1965_v53 = vpop.permute.xlu1 %1964  ;;  %2618 = vrot.lane.b32.xlu1 %v3874_v50, %s6463_s15 }
 0x428   :  { %v1939_v41 = vmul.f32 %v6460_v30, %v1924_v31  ;;  %v1940_v13 = vadd.f32 %v1938_v4, %v1896_v3  ;;  %v6464_v38 = vcombine.high %v6461_v22, %v6461_v22  ;;  %v6465_v32 = vcombine.high %v6462_v54, %v6462_v54  ;;  %v2011_v16 = vpop.permute.xlu0 %2010  ;;  %v6478_v4 = vld [vmem:[#allocation85_spill] sm:$0xff]  ;;  %v6482_v54 = vld [vmem:[#allocation27_spill] sm:$0xff] }
 0x429   :  { %v1946_v8 = vsel %vm473_vm7, %v1943_v43, %v1945_v18  ;;  %v1947_v51 = vsel %vm473_vm7, %v1945_v18, %v1943_v43  ;;  %vm6205_vm8 = vcmp.lt.s32.totalorder %v3997_v47, 77  ;;  %v1084_v3 = vadd.f32 %v5017_v28, %v1036_v12  ;;  %v6481_v22 = vld [vmem:[#allocation29_spill] sm:$0xff]  ;;  %2664 = vrot.lane.b32.xlu0 %v3859_v49, %s6483_s17 }
 0x42a   :  { %v1941_v37 = vadd.f32 %v1939_v41, %v1897_v42  ;;  %v5282_v35 = vmul.f32 %v6464_v38, %v1308_v11  ;;  %v1347_v55 = vmul.f32 %v6465_v32, %v1332_v36  ;;  %v1085_v42 = vadd.f32 %v5084_v10, %v1037_v23  ;;  %v6470_v10 = vld [vmem:[#allocation62_spill] sm:$0xff]  ;;  %v6484_v38 = vld [vmem:[#allocation64_spill] sm:$0xff]  ;;  %v6485_v32 = vld [vmem:[#allocation37_spill] sm:$0xff] }
 0x42b   :  { %v1960_v5 = vmul.f32 %v6466_v39, %v1947_v51  ;;  %v6467_v59 = vcombine.high %v6466_v39, %v6466_v39  ;;  %v1348_v7 = vadd.f32 %v1346_v1, %v1300_v61  ;;  %v1355_v18 = vsel %vm6204_vm4, %v6469_v2, %v6468_v26  ;;  %v6488_v51 = vld [vmem:[#allocation39_spill] sm:$0xff]  ;;  %2640 = vrot.lane.b32.xlu1 %v3874_v50, %s6472_s7 }
 0x42c   :  { %v1356_v28 = vsel %vm6204_vm4, %v6468_v26, %v6469_v2  ;;  %v1379_v34 = vsel %vm1378_vm5, %v6471_v29, %v6470_v10  ;;  %v1380_v57 = vsel %vm1378_vm5, %v6470_v10, %v6471_v29  ;;  %v1132_v58 = vadd.f32 %v5092_v56, %v1084_v3  ;;  %v2033_v39 = vpop.permute.xlu0 %2032  ;;  %v6491_v26 = vld [vmem:[#allocation89_spill] sm:$0xff]  ;;  %v6493_v29 = vld [vmem:[#allocation36_spill] sm:$0xff] }
 0x42d   :  { %v1961_v40 = vmul.f32 %v6467_v59, %v1946_v8  ;;  %v1962_v45 = vadd.f32 %v1960_v5, %v1918_v46  ;;  %v1349_v11 = vadd.f32 %v1347_v55, %v1301_v0  ;;  %vm6473_vm7 = vcmp.lt.s32.totalorder %v3997_v47, 34  ;;  %2686 = vrot.lane.b32.xlu0 %v3859_v49, %s6492_s8 }
 0x42e   :  { %v1968_v36 = vsel %vm6473_vm7, %v1965_v53, %v1967_v24  ;;  %vm6474_vm4 = vmmov %vm6473_vm7  ;;  %v1133_v60 = vadd.f32 %v5097_v9, %v1085_v42  ;;  %v1394_v44 = vmul.f32 %v6475_v21, %v1379_v34  ;;  %v1180_v56 = vadd.f32 %v5100_v15, %v1132_v58  ;;  %v1987_v15 = vpop.permute.xlu1 %1986  ;;  %v6494_v34 = vld [vmem:[#allocation44_spill] sm:$0xff]  ;;  %v6497_v58 = vld [vmem:[#allocation35_spill] sm:$0xff] }
 0x42f   :  { %v1963_v20 = vadd.f32 %v1961_v40, %v1919_v25  ;;  %v1969_v31 = vsel %vm6474_vm4, %v1967_v24, %v1965_v53  ;;  %v6477_v25 = vcombine.high %v6476_v63, %v6476_v63  ;;  %v1370_v30 = vmul.f32 %v6478_v4, %v1355_v18  ;;  %v6490_v40 = vld [vmem:[#allocation22_spill] sm:$0xff]  ;;  %2662 = vrot.lane.b32.xlu1 %v3874_v50, %s6483_s17 }
 0x430   :  { %v1982_v46 = vmul.f32 %v6476_v63, %v1969_v31  ;;  %v6479_v41 = vcombine.high %v6478_v4, %v6478_v4  ;;  %v6480_v24 = vcombine.high %v6475_v21, %v6475_v21  ;;  %v1181_v0 = vadd.f32 %v5105_v33, %v1133_v60  ;;  %v2055_v60 = vpop.permute.xlu0 %2054 }
 0x431   :  { %v1983_v17 = vmul.f32 %v6477_v25, %v1968_v36  ;;  %v1403_v1 = vsel %vm1402_vm6, %v6482_v54, %v6481_v22  ;;  %v1228_v43 = vadd.f32 %v5164_v14, %v1180_v56  ;;  %v1427_v55 = vsel %vm6207_vm2, %v6485_v32, %v6484_v38  ;;  %2708 = vrot.lane.b32.xlu0 %v3859_v49, %s6502_s9 }
 0x432   :  { %v1371_v9 = vmul.f32 %v6479_v41, %v1356_v28  ;;  %v1395_v61 = vmul.f32 %v6480_v24, %v1380_v57  ;;  %v1984_v12 = vadd.f32 %v1982_v46, %v1940_v13  ;;  %vm6486_vm4 = vcmp.lt.s32.totalorder %v3997_v47, 33 }
 0x433   :  { %v1985_v23 = vadd.f32 %v1983_v17, %v1941_v37  ;;  %v1990_v33 = vsel %vm6486_vm4, %v1987_v15, %v1989_v62  ;;  %vm6487_vm7 = vmmov %vm6486_vm4  ;;  %v1229_v13 = vadd.f32 %v5169_v27, %v1181_v0  ;;  %v1396_v37 = vadd.f32 %v1394_v44, %v1348_v7  ;;  %2684 = vrot.lane.b32.xlu1 %v3874_v50, %s6492_s8 }
 0x434   :  { %v1991_v8 = vsel %vm6487_vm7, %v1989_v62, %v1987_v15  ;;  %v6489_v42 = vcombine.high %v6488_v51, %v6488_v51  ;;  %v1276_v5 = vadd.f32 %v5214_v48, %v1228_v43  ;;  %v1404_v59 = vsel %vm1402_vm6, %v6481_v22, %v6482_v54  ;;  %v2009_v48 = vpop.permute.xlu1 %2008  ;;  %v2077_v43 = vpop.permute.xlu0 %2076 }
 0x435   :  { %v2004_v3 = vmul.f32 %v6488_v51, %v1991_v8  ;;  %v1418_v27 = vmul.f32 %v6490_v40, %v1403_v1  ;;  %v1428_v62 = vsel %vm6207_vm2, %v6484_v38, %v6485_v32  ;;  %v1277_v7 = vadd.f32 %v5219_v6, %v1229_v13  ;;  %v6506_v1 = vld [vmem:[#allocation65_spill] sm:$0xff]  ;;  %2730 = vrot.lane.b32.xlu0 %v3859_v49, %s6508_s11 }
 0x436   :  { %v2005_v14 = vmul.f32 %v6489_v42, %v1990_v33  ;;  %v1442_v2 = vmul.f32 %v6491_v26, %v1427_v55  ;;  %v1324_v10 = vadd.f32 %v5272_v52, %v1276_v5  ;;  %v1451_v57 = vsel %vm6205_vm8, %v6494_v34, %v6493_v29  ;;  %v3077_v55 = vld.sshfl [vmem:[%s6005_s2 + $0x34] sm:$0x33 pattern:$0x76325410] }
 0x437   :  { %v2006_v18 = vadd.f32 %v2004_v3, %v1962_v45  ;;  %vm6495_vm4 = vcmp.lt.s32.totalorder %v3997_v47, 32  ;;  %v1325_v45 = vadd.f32 %v5282_v35, %v1277_v7  ;;  %v6498_v36 = vcombine.high %v6497_v58, %v6497_v58  ;;  %2706 = vrot.lane.b32.xlu1 %v3874_v50, %s6502_s9  ;;  %v3079_v7 = vld.sshfl [vmem:[%s6005_s2 + $0x38] sm:$0x33 pattern:$0x76325410] }
 0x438   :  { %v2007_v28 = vadd.f32 %v2005_v14, %v1963_v20  ;;  %v2012_v53 = vsel %vm6495_vm4, %v2009_v48, %v2011_v16  ;;  %vm6496_vm7 = vmmov %vm6495_vm4  ;;  %v1452_v20 = vsel %vm6205_vm8, %v6493_v29, %v6494_v34  ;;  %v1372_v21 = vadd.f32 %v1370_v30, %v1324_v10  ;;  %v2031_v24 = vpop.permute.xlu1 %2030 }
 0x439   :  { %v2013_v6 = vsel %vm6496_vm7, %v2011_v16, %v2009_v48  ;;  %v2027_v31 = vmul.f32 %v6498_v36, %v2012_v53  ;;  %v1397_v44 = vadd.f32 %v1395_v61, %v1349_v11  ;;  %v6499_v35 = vcombine.high %v6490_v40, %v6490_v40  ;;  %v6501_v16 = vld [vmem:[#allocation21_spill] sm:$0xff]  ;;  %v2099_v40 = vpop.permute.xlu0 %2098  ;;  %2752 = vrot.lane.b32.xlu0 %v3859_v49, %s6512_s13 }
 0x43a   :  { %v2026_v52 = vmul.f32 %v6497_v58, %v2013_v6  ;;  %v6500_v46 = vcombine.high %v6491_v26, %v6491_v26  ;;  %v1373_v17 = vadd.f32 %v1371_v9, %v1325_v45  ;;  %v1466_v56 = vmul.f32 %v6501_v16, %v1451_v57  ;;  %v3081_v58 = vld.sshfl [vmem:[%s6005_s2 + $0x3c] sm:$0x33 pattern:$0x76325410] }
 0x43b   :  { %v1419_v63 = vmul.f32 %v6499_v35, %v1404_v59  ;;  %v2029_v41 = vadd.f32 %v2027_v31, %v1985_v23  ;;  %v1420_v0 = vadd.f32 %v1418_v27, %v1372_v21  ;;  %v6503_v11 = vcombine.high %v6501_v16, %v6501_v16  ;;  %2728 = vrot.lane.b32.xlu1 %v3874_v50, %s6508_s11 }
 0x43c   :  { %v1443_v25 = vmul.f32 %v6500_v46, %v1428_v62  ;;  %v2028_v4 = vadd.f32 %v2026_v52, %v1984_v12  ;;  %vm6504_vm4 = vcmp.lt.s32.totalorder %v3997_v47, 31  ;;  %v1444_v54 = vadd.f32 %v1442_v2, %v1396_v37  ;;  %v2053_v37 = vpop.permute.xlu1 %2052 }
 0x43d   :  { %v1467_v30 = vmul.f32 %v6503_v11, %v1452_v20  ;;  %v2034_v61 = vsel %vm6504_vm4, %v2031_v24, %v2033_v39  ;;  %vm6505_vm7 = vmmov %vm6504_vm4  ;;  %v1421_v9 = vadd.f32 %v1419_v63, %v1373_v17  ;;  %v6507_v23 = vcombine.high %v6506_v1, %v6506_v1  ;;  %v2121_v6 = vpop.permute.xlu0 %2120  ;;  %2774 = vrot.lane.b32.xlu0 %v3859_v49, %s6515_s0 }
 0x43e   :  { %v2035_v22 = vsel %vm6505_vm7, %v2033_v39, %v2031_v24  ;;  %v1468_v38 = vadd.f32 %v1466_v56, %v1420_v0  ;;  %v1445_v32 = vadd.f32 %v1443_v25, %v1397_v44  ;;  %vm6206_vm4 = vcmask 1041408  }
 0x43f   :  { %v2048_v12 = vmul.f32 %v6506_v1, %v2035_v22  ;;  %v2049_v15 = vmul.f32 %v6507_v23, %v2034_v61  ;;  %v1469_v33 = vadd.f32 %v1467_v30, %v1421_v9  ;;  %vm6509_vm7 = vcmp.lt.s32.totalorder %v3997_v47, 30  ;;  %2750 = vrot.lane.b32.xlu1 %v3874_v50, %s6512_s13 }
 0x440   :  { %v1470_v51 = vadd.f32 %v1468_v38, %v1444_v54  ;;  %v2056_v3 = vsel %vm6509_vm7, %v2053_v37, %v2055_v60  ;;  %vm6510_vm8 = vmmov %vm6509_vm7  ;;  %v6511_v5 = vcombine.high %v4954_v19, %v4954_v19  ;;  %v2089_v27 = vcombine.high %v3077_v55, %v3077_v55  ;;  %v3085_v38 = vld.sshfl [vmem:[%s6005_s2 + $0x44] sm:$0x33 pattern:$0x76325410] }
 0x441   :  { %v2050_v8 = vadd.f32 %v2048_v12, %v2006_v18  ;;  %v2051_v13 = vadd.f32 %v2049_v15, %v2007_v28  ;;  %v2057_v42 = vsel %vm6510_vm8, %v2055_v60, %v2053_v37  ;;  %v1471_v14 = vadd.f32 %v1469_v33, %v1445_v32  ;;  %v2143_v17 = vpop.permute.xlu0 %2142  ;;  %2796 = vrot.lane.b32.xlu0 %v3859_v49, %s3360_s24 }
 0x442   :  { %v2070_v39 = vmul.f32 %v4954_v19, %v2057_v42  ;;  %v2071_v59 = vmul.f32 %v6511_v5, %v2056_v3  ;;  %v1473_v62 = vsel %vm6206_vm4, %v1470_v51, 0.0  ;;  %v2075_v19 = vpop.permute.xlu1 %2074  ;;  %vm6513_vm8 = vcmp.lt.s32.totalorder %v3997_v47, 29 }
 0x443   :  { %v1474_v26 = vrot.slane %v1473_v62, 4  ;;  %v1480_v2 = vsel %vm6206_vm4, %v1471_v14, 0.0  ;;  %v2078_v10 = vsel %vm6513_vm8, %v2075_v19, %v2077_v43  ;;  %vm6514_vm7 = vmmov %vm6513_vm8  ;;  %v2111_v45 = vcombine.high %v3079_v7, %v3079_v7  ;;  %2772 = vrot.lane.b32.xlu1 %v3874_v50, %s6515_s0 }
 0x444   :  { %v2072_v18 = vadd.f32 %v2070_v39, %v2028_v4  ;;  %v2073_v28 = vadd.f32 %v2071_v59, %v2029_v41  ;;  %v1481_v48 = vrot.slane %v1480_v2, 4  ;;  %v2079_v29 = vsel %vm6514_vm7, %v2077_v43, %v2075_v19  ;;  %v3083_v4 = vld.sshfl [vmem:[%s6005_s2 + $0x40] sm:$0x33 pattern:$0x76325410] }
 0x445   :  { %v1475_v34 = vadd.f32 %v1474_v26, %v1473_v62  ;;  %v2092_v57 = vmul.f32 %v3077_v55, %v2079_v29  ;;  %v2093_v53 = vmul.f32 %v2089_v27, %v2078_v10  ;;  %vm6516_vm8 = vcmp.lt.s32.totalorder %v3997_v47, 19  ;;  %v2165_v23 = vpop.permute.xlu0 %2164  ;;  %2818 = vrot.lane.b32.xlu0 %v3859_v49, %s3361_s26  ;;  %v3089_v10 = vld.sshfl [vmem:[%s6005_s2 + $0x4c] sm:$0x33 pattern:$0x76325410] }
 0x446   :  { %v1482_v20 = vadd.f32 %v1481_v48, %v1480_v2  ;;  %v2097_v60 = vpop.permute.xlu1 %2096  ;;  %vm6517_vm7 = vmmov %vm6516_vm8  ;;  %v2133_v16 = vcombine.high %v3081_v58, %v3081_v58  ;;  %v5465_v61 = vstv %s6006_s3  ;;  %v2155_v15 = vcombine.high %v3083_v4, %v3083_v4 }
 0x447   :  { %v1476_v52 = vrot.slane %v1475_v34, 2  ;;  %v2094_v36 = vadd.f32 %v2092_v57, %v2050_v8  ;;  %v2095_v31 = vadd.f32 %v2093_v53, %v2051_v13  ;;  %v2100_v44 = vsel %vm6516_vm8, %v2097_v60, %v2099_v40  ;;  %6518 = vst [vmem:[#allocation47_spill] sm:$0xff] %v5465_v61  ;;  %2794 = vrot.lane.b32.xlu1 %v3874_v50, %s3360_s24 }
 0x448   :  { %v1483_v21 = vrot.slane %v1482_v20, 2  ;;  %v2101_v35 = vsel %vm6517_vm7, %v2099_v40, %v2097_v60  ;;  %v2115_v25 = vmul.f32 %v2111_v45, %v2100_v44  ;;  %vm6519_vm8 = vcmp.lt.s32.totalorder %v3997_v47, 18  ;;  %v3087_v40 = vld.sshfl [vmem:[%s6005_s2 + $0x48] sm:$0x33 pattern:$0x76325410] }
 0x449   :  { %v1477_v63 = vadd.f32 %v1476_v52, %v1475_v34  ;;  %v2114_v46 = vmul.f32 %v3079_v7, %v2101_v35  ;;  %vm6520_vm7 = vmmov %vm6519_vm8  ;;  %v2187_v39 = vpop.permute.xlu0 %2186  ;;  %v2177_v5 = vcombine.high %v3085_v38, %v3085_v38  ;;  %2840 = vrot.lane.b32.xlu0 %v3859_v49, %s3362_s25  ;;  %v2199_v48 = vcombine.high %v3087_v40, %v3087_v40 }
 0x44a   :  { %v1484_v56 = vadd.f32 %v1483_v21, %v1482_v20  ;;  %v2117_v0 = vadd.f32 %v2115_v25, %v2073_v28  ;;  %v2119_v11 = vpop.permute.xlu1 %2118  ;;  %vm6525_vm4 = vcmp.lt.s32.totalorder %v3997_v47, 15  ;;  %v2221_v52 = vcombine.high %v3089_v10, %v3089_v10 }
 0x44b   :  { %v1478_v41 = vrot.slane %v1477_v63, 1  ;;  %v2116_v24 = vadd.f32 %v2114_v46, %v2072_v18  ;;  %v2122_v22 = vsel %vm6519_vm8, %v2119_v11, %v2121_v6  ;;  %v2123_v9 = vsel %vm6520_vm7, %v2121_v6, %v2119_v11  ;;  %2816 = vrot.lane.b32.xlu1 %v3874_v50, %s3361_s26 }
 0x44c   :  { %v1485_v30 = vrot.slane %v1484_v56, 1  ;;  %v2136_v1 = vmul.f32 %v3081_v58, %v2123_v9  ;;  %v2137_v12 = vmul.f32 %v2133_v16, %v2122_v22  ;;  %vm6521_vm8 = vcmp.lt.s32.totalorder %v3997_v47, 17  ;;  %v3093_v16 = vld.sshfl [vmem:[%s6005_s2 + $0x54] sm:$0x33 pattern:$0x76325410] }
 0x44d   :  { %v1479_v54 = vadd.f32 %v1478_v41, %v1477_v63  ;;  %vm6522_vm7 = vmmov %vm6521_vm8  ;;  %v2209_v19 = vpop.permute.xlu0 %2208 }
 0x44e   :  { %v1486_v43 = vadd.f32 %v1485_v30, %v1484_v56  ;;  %v2138_v55 = vadd.f32 %v2136_v1, %v2094_v36  ;;  %v2139_v33 = vadd.f32 %v2137_v12, %v2095_v31  ;;  %v2141_v8 = vpop.permute.xlu1 %2140  ;;  %v3091_v36 = vld.sshfl [vmem:[%s6005_s2 + $0x50] sm:$0x33 pattern:$0x76325410]  ;;  %v2265_v12 = vcombine.high %v3093_v16, %v3093_v16 }
 0x44f   :  { %v1488_v32 = vadd.f32 %v5465_v61, %v1479_v54  ;;  %v2144_v37 = vsel %vm6521_vm8, %v2141_v8, %v2143_v17  ;;  %v2145_v51 = vsel %vm6522_vm7, %v2143_v17, %v2141_v8  ;;  %vm6523_vm8 = vcmp.lt.s32.totalorder %v3997_v47, 16  ;;  %2838 = vrot.lane.b32.xlu1 %v3874_v50, %s3362_s25 }
 0x450   :  { %v1489_v13 = vadd.f32 %v5465_v61, %v1486_v43  ;;  %v2158_v42 = vmul.f32 %v3083_v4, %v2145_v51  ;;  %v2159_v14 = vmul.f32 %v2155_v15, %v2144_v37  ;;  %vm6524_vm7 = vmmov %vm6523_vm8  ;;  %v2243_v17 = vcombine.high %v3091_v36, %v3091_v36  ;;  %v3095_v15 = vld.sshfl [vmem:[%s6005_s2 + $0x58] sm:$0x33 pattern:$0x76325410] }
 0x451   :  { %v3024_v3 = vmul.f32 -1.442695, %v1488_v32  ;;  %v2231_v58 = vpop.permute.xlu0 %2230  ;;  %v2287_v51 = vcombine.high %v3095_v15, %v3095_v15 }
 0x452   :  { %v3025_v59 = vmul.f32 -1.442695, %v1489_v13  ;;  %v2160_v27 = vadd.f32 %v2158_v42, %v2116_v24  ;;  %v2161_v62 = vadd.f32 %v2159_v14, %v2117_v0  ;;  %v2163_v7 = vpop.permute.xlu1 %2162 }
 0x453   :  { %3295 = vpow2.f32 %v3024_v3  ;;  %v2166_v26 = vsel %vm6523_vm8, %v2163_v7, %v2165_v23  ;;  %v2167_v2 = vsel %vm6524_vm7, %v2165_v23, %v2163_v7  ;;  %vm6526_vm8 = vmmov %vm6525_vm4  ;;  %vm6527_vm7 = vcmp.lt.s32.totalorder %v3997_v47, 14  ;;  %v3097_v3 = vld.sshfl [vmem:[%s6005_s2 + $0x5c] sm:$0x33 pattern:$0x76325410] }
 0x454   :  { %3297 = vpow2.f32 %v3025_v59  ;;  %v2180_v18 = vmul.f32 %v3085_v38, %v2167_v2  ;;  %v2181_v28 = vmul.f32 %v2177_v5, %v2166_v26  ;;  %v2309_v7 = vcombine.high %v3097_v3, %v3097_v3  ;;  %v3101_v26 = vld.sshfl [vmem:[%s6005_s2 + $0x64] sm:$0x33 pattern:$0x76325410] }
 0x455   :  { %v2253_v25 = vpop.permute.xlu0 %2252 }
 0x456   :  { %v2182_v29 = vadd.f32 %v2180_v18, %v2138_v55  ;;  %v2183_v34 = vadd.f32 %v2181_v28, %v2139_v33  ;;  %v2185_v57 = vpop.permute.xlu1 %2184 }
 0x457   :  { %v2188_v53 = vsel %vm6525_vm4, %v2185_v57, %v2187_v39  ;;  %v2189_v6 = vsel %vm6526_vm8, %v2187_v39, %v2185_v57  ;;  %vm6528_vm4 = vmmov %vm6527_vm7  ;;  %vm6529_vm8 = vcmp.lt.s32.totalorder %v3997_v47, 13 }
 0x458   :  { %v2202_v45 = vmul.f32 %v3087_v40, %v2189_v6  ;;  %v2203_v20 = vmul.f32 %v2199_v48, %v2188_v53 }
 0x459   :  { %v2275_v1 = vpop.permute.xlu0 %2274 }
 0x45a   :  { %v2204_v31 = vadd.f32 %v2202_v45, %v2160_v27  ;;  %v2205_v60 = vadd.f32 %v2203_v20, %v2161_v62  ;;  %v2207_v21 = vpop.permute.xlu1 %2206  ;;  %v2347_v45 = vcombine.high %v3101_v26, %v3101_v26 }
 0x45b   :  { %v2210_v44 = vsel %vm6527_vm7, %v2207_v21, %v2209_v19  ;;  %v2211_v35 = vsel %vm6528_vm4, %v2209_v19, %v2207_v21  ;;  %vm6530_vm7 = vmmov %vm6529_vm8  ;;  %vm6531_vm4 = vcmp.lt.s32.totalorder %v3997_v47, 3  ;;  %v6535_v19 = vld [vmem:[#allocation61_spill] sm:$0xff] }
 0x45c   :  { %v2224_v63 = vmul.f32 %v3089_v10, %v2211_v35  ;;  %v2225_v46 = vmul.f32 %v2221_v52, %v2210_v44  ;;  %v2329_v48 = vmul.f32 %v3859_v49, %v6535_v19  ;;  %v6540_v35 = vld [vmem:[#allocation10_spill] sm:$0xff] }
 0x45d   :  { %v2297_v37 = vpop.permute.xlu0 %2296 }
 0x45e   :  { %v2226_v4 = vadd.f32 %v2224_v63, %v2182_v29  ;;  %v2227_v41 = vadd.f32 %v2225_v46, %v2183_v34  ;;  %v2229_v24 = vpop.permute.xlu1 %2228  ;;  %v3103_v34 = vld.sshfl [vmem:[%s6005_s2 + $0x68] sm:$0x33 pattern:$0x76325410] }
 0x45f   :  { %v2232_v11 = vsel %vm6529_vm8, %v2229_v24, %v2231_v58  ;;  %v2233_v30 = vsel %vm6530_vm7, %v2231_v58, %v2229_v24  ;;  %vm6532_vm8 = vmmov %vm6531_vm4  ;;  %vm6533_vm7 = vcmp.lt.s32.totalorder %v3997_v47, 2  ;;  %v2369_v49 = vcombine.high %v3103_v34, %v3103_v34  ;;  %v6541_v46 = vld [vmem:[#allocation8_spill] sm:$0xff]  ;;  %v6543_v24 = vld [vmem:[#allocation7_spill] sm:$0xff] }
 0x460   :  { %v3296_v56 = vpop.eup %3295  ;;  %v2246_v9 = vmul.f32 %v3091_v36, %v2233_v30  ;;  %v2247_v54 = vmul.f32 %v2243_v17, %v2232_v11  ;;  %vm6534_vm2 = vmmov %vm6533_vm7  ;;  %v3105_v11 = vld.sshfl [vmem:[%s6005_s2 + $0x6c] sm:$0x33 pattern:$0x76325410]  ;;  %v6544_v30 = vld [vmem:[#allocation5_spill] sm:$0xff] }
 0x461   :  { %v3298_v0 = vpop.eup %3297  ;;  %v1496_v22 = vadd.f32 1.0, %v3296_v56  ;;  %v2335_v62 = vpop.permute.xlu0 %2334 }
 0x462   :  { %v1497_v23 = vadd.f32 1.0, %v3298_v0  ;;  %v2248_v43 = vadd.f32 %v2246_v9, %v2204_v31  ;;  %v2249_v38 = vadd.f32 %v2247_v54, %v2205_v60  ;;  %v2251_v32 = vpop.permute.xlu1 %2250  ;;  %v6545_v9 = vld [vmem:[#allocation6_spill] sm:$0xff] }
 0x463   :  { %3299 = vrcp.f32 %v1496_v22  ;;  %v2254_v55 = vsel %vm6531_vm4, %v2251_v32, %v2253_v25  ;;  %v2255_v33 = vsel %vm6532_vm8, %v2253_v25, %v2251_v32  ;;  %vm6536_vm4 = vcmp.lt.s32.totalorder %v3997_v47, 1  ;;  %v3311_v32 = vld.sshfl [vmem:[%s6005_s2 + $0x60] sm:$0x33 pattern:$0x76325410] }
 0x464   :  { %3301 = vrcp.f32 %v1497_v23  ;;  %v2268_v8 = vmul.f32 %v3093_v16, %v2255_v33  ;;  %v2269_v13 = vmul.f32 %v2265_v12, %v2254_v55  ;;  %vm6537_vm8 = vmmov %vm6536_vm4  ;;  %v6547_v23 = vld [vmem:[#allocation4_spill] sm:$0xff]  ;;  %v2328_v55 = vmul.f32 %v3311_v32, %v3874_v50 }
 0x465   :  { %v2357_v6 = vpop.permute.xlu0 %2356 }
 0x466   :  { %v2270_v42 = vadd.f32 %v2268_v8, %v2226_v4  ;;  %v2271_v14 = vadd.f32 %v2269_v13, %v2227_v41  ;;  %v2273_v39 = vpop.permute.xlu1 %2272  ;;  %v6542_v4 = vld [vmem:[#allocation9_spill] sm:$0xff] }
 0x467   :  { %v2276_v5 = vsel %vm6533_vm7, %v2273_v39, %v2275_v1  ;;  %v2277_v59 = vsel %vm6534_vm2, %v2275_v1, %v2273_v39  ;;  %vm6538_vm2 = vcmp.lt.s32.totalorder %v3997_v47, 127  ;;  %v6546_v1 = vld [vmem:[#allocation3_spill] sm:$0xff] }
 0x468   :  { %v2290_v40 = vmul.f32 %v3095_v15, %v2277_v59  ;;  %v2291_v27 = vmul.f32 %v2287_v51, %v2276_v5  ;;  %vm6539_vm7 = vmmov %vm6538_vm2 }
 0x469   :  { %v2379_v56 = vpop.permute.xlu0 %2378 }
 0x46a   :  { %v2292_v2 = vadd.f32 %v2290_v40, %v2248_v43  ;;  %v2293_v18 = vadd.f32 %v2291_v27, %v2249_v38  ;;  %v2295_v28 = vpop.permute.xlu1 %2294 }
 0x46b   :  { %v2298_v10 = vsel %vm6536_vm4, %v2295_v28, %v2297_v37  ;;  %v2299_v29 = vsel %vm6537_vm8, %v2297_v37, %v2295_v28  ;;  %vm6551_vm8 = vcmp.lt.s32.totalorder %v3997_v47, 115 }
 0x46c   :  { %v2312_v57 = vmul.f32 %v3097_v3, %v2299_v29  ;;  %v2313_v53 = vmul.f32 %v2309_v7, %v2298_v10  ;;  %v2331_v20 = vadd.f32 %v2329_v48, %v2293_v18  ;;  %v2330_v50 = vadd.f32 %v2328_v55, %v2292_v2 }
 0x46d   :  { %v2401_v3 = vpop.permute.xlu0 %2400 }
 0x46e   :  { %v2314_v52 = vadd.f32 %v2312_v57, %v2270_v42  ;;  %v2315_v36 = vadd.f32 %v2313_v53, %v2271_v14  ;;  %v2333_v31 = vpop.permute.xlu1 %2332  ;;  %v2391_v42 = vcombine.high %v3105_v11, %v3105_v11 }
 0x46f   :  { %v2336_v21 = vsel %vm6538_vm2, %v2333_v31, %v2335_v62  ;;  %v2337_v44 = vsel %vm6539_vm7, %v2335_v62, %v2333_v31  ;;  %vm6552_vm2 = vmmov %vm6551_vm8  ;;  %vm6553_vm7 = vcmp.lt.s32.totalorder %v3997_v47, 114 }
 0x470   :  { %v3300_v58 = vpop.eup %3299  ;;  %v2350_v17 = vmul.f32 %v3101_v26, %v2336_v21  ;;  %v2351_v16 = vmul.f32 %v2347_v45, %v2337_v44 }
 0x471   :  { %v3302_v60 = vpop.eup %3301  ;;  %v1510_v63 = vmul.f32 %v3300_v58, %v6540_v35  ;;  %v1512_v25 = vmul.f32 %v3300_v58, %v6541_v46  ;;  %v1514_v22 = vmul.f32 %v3300_v58, %v6544_v30  ;;  %v1516_v12 = vmul.f32 %v3300_v58, %v6546_v1  ;;  %v2423_v7 = vpop.permute.xlu0 %2422  ;;  %v3109_v46 = vld.sshfl [vmem:[%s6005_s2 + $0x74] sm:$0x33 pattern:$0x76325410] }
 0x472   :  { %v1511_v41 = vmul.f32 %v3302_v60, %v6542_v4  ;;  %v1513_v0 = vmul.f32 %v3302_v60, %v6543_v24  ;;  %v1515_v54 = vmul.f32 %v3302_v60, %v6545_v9  ;;  %v1517_v15 = vmul.f32 %v3302_v60, %v6547_v23  ;;  %v2355_v33 = vpop.permute.xlu1 %2354  ;;  %v5661_v4 = vld.sshfl [vmem:[%s6005_s2 + $0x84] sm:$0x33 pattern:$0x76325410] }
 0x473   :  { %1518 = vst [vmem:[%s6007_s4] sm:$0xff] %v1510_v63  ;;  %1520 = vst [vmem:[%s6007_s4 + $0x10] sm:$0xff] %v1512_v25  ;;  %v2352_v43 = vadd.f32 %v2350_v17, %v2314_v52  ;;  %v2353_v38 = vadd.f32 %v2351_v16, %v2315_v36  ;;  %v2358_v8 = vsel %vm922_vm9, %v2355_v33, %v2357_v6  ;;  %v3107_v63 = vld.sshfl [vmem:[%s6005_s2 + $0x70] sm:$0x33 pattern:$0x76325410] }
 0x474   :  { %1519 = vst [vmem:[%s6007_s4 + $0x8] sm:$0xff] %v1511_v41  ;;  %1521 = vst [vmem:[%s6007_s4 + $0x18] sm:$0xff] %v1513_v0  ;;  %v2359_v13 = vsel %vm922_vm9, %v2357_v6, %v2355_v33  ;;  %v2372_v37 = vmul.f32 %v3103_v34, %v2358_v8  ;;  %vm6548_vm9 = vcmp.lt.s32.totalorder %v3997_v47, 125  ;;  %v2413_v9 = vcombine.high %v3107_v63, %v3107_v63 }
 0x475   :  { %1522 = vst [vmem:[%s6007_s4 + $0x20] sm:$0xff] %v1514_v22  ;;  %1523 = vst [vmem:[%s6007_s4 + $0x28] sm:$0xff] %v1515_v54  ;;  %v2373_v51 = vmul.f32 %v2369_v49, %v2359_v13  ;;  %v5605_v28 = vpop.permute.xlu0 %2444  ;;  %v3111_v25 = vld.sshfl [vmem:[%s6005_s2 + $0x78] sm:$0x33 pattern:$0x76325410]  ;;  %v2523_v33 = vcombine.high %v5661_v4, %v5661_v4 }
 0x476   :  { %1524 = vst [vmem:[%s6007_s4 + $0x30] sm:$0xff] %v1516_v12  ;;  %1525 = vst [vmem:[%s6007_s4 + $0x38] sm:$0xff] %v1517_v15  ;;  %v5593_v14 = vadd.f32 %v2372_v37, %v2330_v50  ;;  %v2377_v5 = vpop.permute.xlu1 %2376  ;;  %v3113_v17 = vld.sshfl [vmem:[%s6005_s2 + $0x7c] sm:$0x33 pattern:$0x76325410]  ;;  %v2435_v12 = vcombine.high %v3109_v46, %v3109_v46  ;;  %v2457_v23 = vcombine.high %v3111_v25, %v3111_v25 }
 0x477   :  { %v5595_v39 = vadd.f32 %v2373_v51, %v2331_v20  ;;  %v2380_v59 = vsel %vm6548_vm9, %v2377_v5, %v2379_v56  ;;  %vm6549_vm4 = vmmov %vm6548_vm9  ;;  %v5654_v16 = vld.sshfl [vmem:[%s6005_s2 + $0x80] sm:$0x33 pattern:$0x76325410]  ;;  %v2479_v15 = vcombine.high %v3113_v17, %v3113_v17 }
 0x478   :  { %v2381_v40 = vsel %vm6549_vm4, %v2379_v56, %v2377_v5  ;;  %v2394_v27 = vmul.f32 %v3105_v11, %v2380_v59  ;;  %v5666_v41 = vld.sshfl [vmem:[%s6005_s2 + $0x88] sm:$0x33 pattern:$0x76325410]  ;;  %vm6554_vm9 = vmmov %vm6553_vm7  ;;  %vm6556_vm4 = vcmp.lt.s32.totalorder %v3997_v47, 113 }
 0x479   :  { %v2395_v62 = vmul.f32 %v2391_v42, %v2381_v40  ;;  %v5607_v48 = vpop.permute.xlu0 %2466  ;;  %v5671_v24 = vld.sshfl [vmem:[%s6005_s2 + $0x8c] sm:$0x33 pattern:$0x76325410]  ;;  %v2545_v8 = vcombine.high %v5666_v41, %v5666_v41 }
 0x47a   :  { %v5601_v26 = vadd.f32 %v2394_v27, %v2352_v43  ;;  %v2399_v18 = vpop.permute.xlu1 %2398  ;;  %v5676_v0 = vld.sshfl [vmem:[%s6005_s2 + $0x90] sm:$0x33 pattern:$0x76325410]  ;;  %v2501_v43 = vcombine.high %v5654_v16, %v5654_v16  ;;  %v2567_v42 = vcombine.high %v5671_v24, %v5671_v24 }
 0x47b   :  { %v5603_v2 = vadd.f32 %v2395_v62, %v2353_v38  ;;  %v5683_v30 = vld.sshfl [vmem:[%s6005_s2 + $0x94] sm:$0x33 pattern:$0x76325410]  ;;  %v2402_v32 = vsel %vm6551_vm8, %v2399_v18, %v2401_v3  ;;  %v2403_v55 = vsel %vm6552_vm2, %v2401_v3, %v2399_v18  ;;  %vm6557_vm8 = vmmov %vm6556_vm4  ;;  %vm6558_vm2 = vcmp.lt.s32.totalorder %v3997_v47, 112 }
 0x47c   :  { %v5688_v22 = vld.sshfl [vmem:[%s6005_s2 + $0x98] sm:$0x33 pattern:$0x76325410]  ;;  %v2416_v5 = vmul.f32 %v3107_v63, %v2402_v32  ;;  %v2417_v61 = vmul.f32 %v2413_v9, %v2403_v55 }
 0x47d   :  { %v5609_v29 = vpop.permute.xlu0 %2488  ;;  %v5693_v54 = vld.sshfl [vmem:[%s6005_s2 + $0x9c] sm:$0x33 pattern:$0x76325410] }
 0x47e   :  { %v2421_v19 = vpop.permute.xlu1 %2420  ;;  %v5702_v38 = vld.sshfl [vmem:[%s6005_s2 + $0xa0] sm:$0x33 pattern:$0x76325410] }
 0x47f   :  { %v5717_v50 = vld.sshfl [vmem:[%s6005_s2 + $0xa4] sm:$0x33 pattern:$0x76325410]  ;;  %v2424_v51 = vsel %vm6553_vm7, %v2421_v19, %v2423_v7  ;;  %v2425_v3 = vsel %vm6554_vm9, %v2423_v7, %v2421_v19  ;;  %vm6559_vm7 = vmmov %vm6558_vm2  ;;  %vm6560_vm9 = vcmp.lt.s32.totalorder %v3997_v47, 110 }
 0x480   :  { %v5722_v37 = vld.sshfl [vmem:[%s6005_s2 + $0xa8] sm:$0x33 pattern:$0x76325410]  ;;  %v2438_v27 = vmul.f32 %v3109_v46, %v2424_v51  ;;  %v2699_v9 = vcombine.high %v5717_v50, %v5717_v50 }
 0x481   :  { %v5611_v57 = vpop.permute.xlu0 %2510  ;;  %v5735_v59 = vld.sshfl [vmem:[%s6005_s2 + $0xac] sm:$0x33 pattern:$0x76325410]  ;;  %v2721_v32 = vcombine.high %v5722_v37, %v5722_v37 }
 0x482   :  { %v2443_v10 = vpop.permute.xlu1 %2442  ;;  %v5750_v19 = vld.sshfl [vmem:[%s6005_s2 + $0xb0] sm:$0x33 pattern:$0x76325410] }
 0x483   :  { %v2446_v40 = vsel %vm6556_vm4, %v2443_v10, %v5605_v28  ;;  %v2447_v62 = vsel %vm6557_vm8, %v5605_v28, %v2443_v10  ;;  %v2743_v28 = vcombine.high %v5735_v59, %v5735_v59  ;;  %v2765_v10 = vcombine.high %v5750_v19, %v5750_v19  ;;  %vm6561_vm4 = vmmov %vm6560_vm9 }
 0x484   :  { %v2460_v46 = vmul.f32 %v3111_v25, %v2446_v40  ;;  %v2418_v40 = vadd.f32 %v2416_v5, %v5593_v14 }
 0x485   :  { %v5615_v6 = vpop.permute.xlu0 %2532 }
 0x486   :  { %v2465_v34 = vpop.permute.xlu1 %2464 }
 0x487   :  { %v2468_v7 = vsel %vm6558_vm2, %v2465_v34, %v5607_v48 }
 0x488   :  { %v2482_v51 = vmul.f32 %v3113_v17, %v2468_v7 }
 0x489   :  { %v5619_v20 = vpop.permute.xlu0 %2554 }
 0x48a   :  { %v5613_v53 = vpop.permute.xlu1 %2486 }
 0x48d   :  { %v5623_v52 = vpop.permute.xlu0 %2576 }
 0x48e   :  { %v5617_v45 = vpop.permute.xlu1 %2508 }
 0x48f   :  { %v2512_v25 = vsel %vm6560_vm9, %v5617_v45, %v5611_v57 }
 0x491   :  { %v5627_v31 = vpop.permute.xlu0 %2598 }
 0x492   :  { %v5621_v58 = vpop.permute.xlu1 %2530 }
 0x493   :  { %v2535_v14 = vsel %vm1114_vm11, %v5615_v6, %v5621_v58 }
 0x495   :  { %v5631_v60 = vpop.permute.xlu0 %2620 }
 0x496   :  { %v5625_v36 = vpop.permute.xlu1 %2552 }
 0x499   :  { %v5635_v44 = vpop.permute.xlu0 %2642 }
 0x49a   :  { %v5629_v49 = vpop.permute.xlu1 %2574 }
 0x49d   :  { %v5656_v56 = vpop.permute.xlu0 %2664 }
 0x49e   :  { %v5633_v21 = vpop.permute.xlu1 %2596 }
 0x4a1   :  { %v5695_v1 = vpop.permute.xlu0 %2686 }
 0x4a2   :  { %v5637_v35 = vpop.permute.xlu1 %2618  ;;  %6550 = vst [vmem:[#allocation48_spill] sm:$0xff] %v5695_v1  ;;  %v2439_v1 = vmul.f32 %v2435_v12, %v2425_v3  ;;  %v2461_v12 = vmul.f32 %v2457_v23, %v2447_v62  ;;  %v2513_v23 = vsel %vm6561_vm4, %v5611_v57, %v5617_v45  ;;  %v2419_v62 = vadd.f32 %v2417_v61, %v5595_v39 }
 0x4a3   :  { %v2526_v61 = vmul.f32 %v5661_v4, %v2512_v25  ;;  %v2527_v39 = vmul.f32 %v2523_v33, %v2513_v23  ;;  %v2462_v45 = vadd.f32 %v2460_v46, %v2418_v40  ;;  %v2578_v4 = vsel %vm1162_vm12, %v5629_v49, %v5623_v52  ;;  %v5868_v23 = vld.sshfl [vmem:[%s6005_s2 + $0xb8] sm:$0x33 pattern:$0x76325410] }
 0x4a4   :  { %v2579_v33 = vsel %vm1162_vm12, %v5623_v52, %v5629_v49  ;;  %v2592_v52 = vmul.f32 %v5676_v0, %v2578_v4  ;;  %v6564_v49 = vcombine.high %v5676_v0, %v5676_v0  ;;  %v6565_v0 = vcombine.high %v5683_v30, %v5683_v30 }
 0x4a5   :  { %v5745_v18 = vpop.permute.xlu0 %2708  ;;  %vm6570_vm12 = vcmp.lt.s32.totalorder %v3997_v47, 93 }
 0x4a6   :  { %v5678_v11 = vpop.permute.xlu1 %2640  ;;  %6555 = vst [vmem:[#allocation68_spill] sm:$0xff] %v5745_v18  ;;  %v2469_v18 = vsel %vm6559_vm7, %v5607_v48, %v2465_v34  ;;  %v2490_v48 = vsel %vm1066_vm15, %v5613_v53, %v5609_v29  ;;  %v2491_v34 = vsel %vm1066_vm15, %v5609_v29, %v5613_v53  ;;  %v2440_v29 = vadd.f32 %v2438_v27, %v5601_v26 }
 0x4a7   :  { %v2483_v3 = vmul.f32 %v2479_v15, %v2469_v18  ;;  %v2441_v53 = vadd.f32 %v2439_v1, %v5603_v2  ;;  %v2504_v15 = vmul.f32 %v5654_v16, %v2490_v48  ;;  %v2505_v7 = vmul.f32 %v2501_v43, %v2491_v34 }
 0x4a8   :  { %v2534_v18 = vsel %vm1114_vm11, %v5621_v58, %v5615_v6  ;;  %v2556_v26 = vsel %vm1138_vm1, %v5625_v36, %v5619_v20  ;;  %v2557_v2 = vsel %vm1138_vm1, %v5619_v20, %v5625_v36  ;;  %v2463_v16 = vadd.f32 %v2461_v12, %v2419_v62 }
 0x4a9   :  { %v5782_v55 = vpop.permute.xlu0 %2730  ;;  %v2484_v1 = vadd.f32 %v2482_v51, %v2440_v29  ;;  %v2485_v43 = vadd.f32 %v2483_v3, %v2441_v53  ;;  %v2548_v6 = vmul.f32 %v5666_v41, %v2534_v18  ;;  %v2549_v58 = vmul.f32 %v2545_v8, %v2535_v14  ;;  %v3145_v18 = vld.sshfl [vmem:[%s6005_s2 + $0xbc] sm:$0x33 pattern:$0x76325410]  ;;  %v6569_v4 = vld [vmem:[#allocation48_spill] sm:$0xff] }
 0x4aa   :  { %v5712_v13 = vpop.permute.xlu1 %2662  ;;  %v2570_v36 = vmul.f32 %v5671_v24, %v2556_v26  ;;  %v2571_v5 = vmul.f32 %v2567_v42, %v2557_v2  ;;  %vm6562_vm11 = vcmp.lt.s32.totalorder %v3997_v47, 97  ;;  %v2506_v27 = vadd.f32 %v2504_v15, %v2462_v45 }
 0x4ab   :  { %v2600_v41 = vsel %vm6562_vm11, %v5633_v21, %v5627_v31  ;;  %vm6563_vm15 = vmmov %vm6562_vm11  ;;  %v2507_v46 = vadd.f32 %v2505_v7, %v2463_v16  ;;  %v2528_v12 = vadd.f32 %v2526_v61, %v2484_v1  ;;  %v2529_v48 = vadd.f32 %v2527_v39, %v2485_v43 }
 0x4ac   :  { %v2601_v8 = vsel %vm6563_vm15, %v5627_v31, %v5633_v21  ;;  %v2593_v24 = vmul.f32 %v6564_v49, %v2579_v33  ;;  %v2622_v42 = vsel %vm1210_vm13, %v5637_v35, %v5631_v60  ;;  %v2623_v31 = vsel %vm1210_vm13, %v5631_v60, %v5637_v35  ;;  %v5851_v21 = vld.sshfl [vmem:[%s6005_s2 + $0xb4] sm:$0x33 pattern:$0x76325410]  ;;  %vm6571_vm13 = vmmov %vm6570_vm12 }
 0x4ad   :  { %v5816_v57 = vpop.permute.xlu0 %2752  ;;  %v2614_v51 = vmul.f32 %v5683_v30, %v2600_v41  ;;  %v2615_v3 = vmul.f32 %v6565_v0, %v2601_v8  ;;  %v2644_v25 = vsel %vm1234_vm14, %v5678_v11, %v5635_v44  ;;  %v2645_v60 = vsel %vm1234_vm14, %v5635_v44, %v5678_v11 }
 0x4ae   :  { %v5764_v63 = vpop.permute.xlu1 %2684  ;;  %v2550_v40 = vadd.f32 %v2548_v6, %v2506_v27  ;;  %v2551_v62 = vadd.f32 %v2549_v58, %v2507_v46  ;;  %v2572_v30 = vadd.f32 %v2570_v36, %v2528_v12  ;;  %v2573_v29 = vadd.f32 %v2571_v5, %v2529_v48 }
 0x4af   :  { %v2636_v53 = vmul.f32 %v5688_v22, %v2622_v42  ;;  %v6566_v15 = vcombine.high %v5688_v22, %v5688_v22  ;;  %v2666_v44 = vsel %vm1258_vm0, %v5712_v13, %v5656_v56  ;;  %v2667_v11 = vsel %vm1258_vm0, %v5656_v56, %v5712_v13  ;;  %v5896_v56 = vld.sshfl [vmem:[%s6005_s2 + $0xc0] sm:$0x33 pattern:$0x76325410] }
 0x4b0   :  { %v2658_v14 = vmul.f32 %v5693_v54, %v2644_v25  ;;  %v6567_v22 = vcombine.high %v5693_v54, %v5693_v54  ;;  %v2787_v39 = vcombine.high %v5851_v21, %v5851_v21  ;;  %v2809_v26 = vcombine.high %v5868_v23, %v5868_v23 }
 0x4b1   :  { %v2775_v34 = vpop.permute.xlu0 %2774  ;;  %v2637_v7 = vmul.f32 %v6566_v15, %v2623_v31  ;;  %v2594_v13 = vadd.f32 %v2592_v52, %v2550_v40  ;;  %v2595_v2 = vadd.f32 %v2593_v24, %v2551_v62  ;;  %v2616_v45 = vadd.f32 %v2614_v51, %v2572_v30 }
 0x4b2   :  { %v5796_v17 = vpop.permute.xlu1 %2706  ;;  %v2659_v61 = vmul.f32 %v6567_v22, %v2645_v60  ;;  %v2617_v16 = vadd.f32 %v2615_v3, %v2573_v29  ;;  %v2680_v54 = vmul.f32 %v5702_v38, %v2666_v44  ;;  %v6568_v6 = vcombine.high %v5702_v38, %v5702_v38  ;;  %v6572_v38 = vld [vmem:[#allocation68_spill] sm:$0xff] }
 0x4b3   :  { %v2688_v33 = vsel %vm6570_vm12, %v5764_v63, %v6569_v4  ;;  %v2689_v36 = vsel %vm6571_vm13, %v6569_v4, %v5764_v63  ;;  %v2638_v5 = vadd.f32 %v2636_v53, %v2594_v13  ;;  %v2639_v41 = vadd.f32 %v2637_v7, %v2595_v2 }
 0x4b4   :  { %v2681_v58 = vmul.f32 %v6568_v6, %v2667_v11  ;;  %v2831_v8 = vcombine.high %v3145_v18, %v3145_v18  ;;  %v2853_v27 = vcombine.high %v5896_v56, %v5896_v56  ;;  %v2660_v46 = vadd.f32 %v2658_v14, %v2616_v45 }
 0x4b5   :  { %v2797_v1 = vpop.permute.xlu0 %2796  ;;  %v2661_v12 = vadd.f32 %v2659_v61, %v2617_v16  ;;  %v2710_v48 = vsel %vm1306_vm3, %v5796_v17, %v6572_v38  ;;  %v2711_v52 = vsel %vm1306_vm3, %v6572_v38, %v5796_v17  ;;  %v2702_v63 = vmul.f32 %v5717_v50, %v2688_v33 }
 0x4b6   :  { %v2729_v20 = vpop.permute.xlu1 %2728  ;;  %v2703_v49 = vmul.f32 %v2699_v9, %v2689_v36  ;;  %v2682_v51 = vadd.f32 %v2680_v54, %v2638_v5  ;;  %v2683_v0 = vadd.f32 %v2681_v58, %v2639_v41  ;;  %vm6573_vm14 = vcmp.lt.s32.totalorder %v3997_v47, 81 }
 0x4b7   :  { %v2732_v24 = vsel %vm1330_vm10, %v2729_v20, %v5782_v55  ;;  %v2733_v42 = vsel %vm1330_vm10, %v5782_v55, %v2729_v20  ;;  %vm6574_vm1 = vmmov %vm6573_vm14  ;;  %v2724_v9 = vmul.f32 %v5722_v37, %v2710_v48  ;;  %v2725_v3 = vmul.f32 %v2721_v32, %v2711_v52 }
 0x4b8   :  { %v2746_v60 = vmul.f32 %v5735_v59, %v2732_v24  ;;  %v2747_v40 = vmul.f32 %v2743_v28, %v2733_v42  ;;  %v2704_v32 = vadd.f32 %v2702_v63, %v2660_v46  ;;  %vm6575_vm10 = vcmp.lt.s32.totalorder %v3997_v47, 78  ;;  %v6581_v42 = vld [vmem:[#allocation47_spill] sm:$0xff] }
 0x4b9   :  { %v2819_v25 = vpop.permute.xlu0 %2818  ;;  %vm6576_vm0 = vmmov %vm6575_vm10  ;;  %v2726_v15 = vadd.f32 %v2724_v9, %v2682_v51  ;;  %v2727_v7 = vadd.f32 %v2725_v3, %v2683_v0  ;;  %vm6577_vm3 = vcmp.lt.s32.totalorder %v3997_v47, 77 }
 0x4ba   :  { %v2751_v35 = vpop.permute.xlu1 %2750  ;;  %v2748_v14 = vadd.f32 %v2746_v60, %v2704_v32  ;;  %v6582_v60 = vld [vmem:[#allocation18_spill] sm:$0xff]  ;;  %v6584_v32 = vld [vmem:[#allocation13_spill] sm:$0xff] }
 0x4bb   :  { %v2754_v17 = vsel %vm6573_vm14, %v2751_v35, %v5816_v57  ;;  %v2755_v50 = vsel %vm6574_vm1, %v5816_v57, %v2751_v35  ;;  %v2705_v35 = vadd.f32 %v2703_v49, %v2661_v12 }
 0x4bc   :  { %v2768_v62 = vmul.f32 %v5750_v19, %v2754_v17 }
 0x4bd   :  { %v2749_v22 = vadd.f32 %v2747_v40, %v2705_v35 }
 0x4be   :  { %v2773_v43 = vpop.permute.xlu1 %2772  ;;  %v2770_v61 = vadd.f32 %v2768_v62, %v2726_v15  ;;  %v6585_v62 = vld [vmem:[#allocation11_spill] sm:$0xff] }
 0x4bf   :  { %v2776_v55 = vsel %vm1378_vm5, %v2773_v43, %v2775_v34  ;;  %v2777_v20 = vsel %vm1378_vm5, %v2775_v34, %v2773_v43  ;;  %v2769_v34 = vmul.f32 %v2765_v10, %v2755_v50  ;;  %v2841_v10 = vpop.permute.xlu0 %2840  ;;  %vm6578_vm5 = vmmov %vm6577_vm3 }
 0x4c0   :  { %v2790_v29 = vmul.f32 %v5851_v21, %v2776_v55  ;;  %v2791_v53 = vmul.f32 %v2787_v39, %v2777_v20 }
 0x4c1   :  { %v2771_v19 = vadd.f32 %v2769_v34, %v2727_v7  ;;  %v6589_v7 = vld [vmem:[#allocation12_spill] sm:$0xff] }
 0x4c2   :  { %v2795_v31 = vpop.permute.xlu1 %2794  ;;  %v2792_v39 = vadd.f32 %v2790_v29, %v2748_v14  ;;  %v2793_v45 = vadd.f32 %v2791_v53, %v2749_v22  ;;  %v6587_v53 = vld [vmem:[#allocation15_spill] sm:$0xff] }
 0x4c3   :  { %v2798_v57 = vsel %vm1402_vm6, %v2795_v31, %v2797_v1  ;;  %v2799_v37 = vsel %vm1402_vm6, %v2797_v1, %v2795_v31  ;;  %vm6579_vm6 = vcmask 1041408  }
 0x4c4   :  { %v2812_v44 = vmul.f32 %v5868_v23, %v2798_v57  ;;  %v2813_v11 = vmul.f32 %v2809_v26, %v2799_v37  ;;  %vm6580_vm8 = vmmov %vm6579_vm6  ;;  %v6583_v57 = vld [vmem:[#allocation16_spill] sm:$0xff] }
 0x4c6   :  { %v2817_v30 = vpop.permute.xlu1 %2816  ;;  %v2814_v43 = vadd.f32 %v2812_v44, %v2770_v61  ;;  %v2815_v54 = vadd.f32 %v2813_v11, %v2771_v19 }
 0x4c7   :  { %v2820_v59 = vsel %vm6575_vm10, %v2817_v30, %v2819_v25  ;;  %v2821_v28 = vsel %vm6576_vm0, %v2819_v25, %v2817_v30  ;;  %v6586_v30 = vld [vmem:[#allocation17_spill] sm:$0xff] }
 0x4c8   :  { %v2834_v13 = vmul.f32 %v3145_v18, %v2820_v59  ;;  %v2835_v2 = vmul.f32 %v2831_v8, %v2821_v28  ;;  %v6588_v28 = vld [vmem:[#allocation14_spill] sm:$0xff] }
 0x4ca   :  { %v2839_v21 = vpop.permute.xlu1 %2838  ;;  %v2836_v6 = vadd.f32 %v2834_v13, %v2792_v39  ;;  %v2837_v58 = vadd.f32 %v2835_v2, %v2793_v45 }
 0x4cb   :  { %v2842_v16 = vsel %vm6577_vm3, %v2839_v21, %v2841_v10  ;;  %v2843_v1 = vsel %vm6578_vm5, %v2841_v10, %v2839_v21 }
 0x4cc   :  { %v2856_v23 = vmul.f32 %v5896_v56, %v2842_v16  ;;  %v2857_v26 = vmul.f32 %v2853_v27, %v2843_v1 }
 0x4ce   :  { %v2858_v4 = vadd.f32 %v2856_v23, %v2814_v43  ;;  %v2859_v33 = vadd.f32 %v2857_v26, %v2815_v54 }
 0x4d0   :  { %v2860_v18 = vadd.f32 %v2858_v4, %v2836_v6  ;;  %v2861_v36 = vadd.f32 %v2859_v33, %v2837_v58 }
 0x4d2   :  { %v2862_v5 = vsel %vm6579_vm6, %v2860_v18, 0.0  ;;  %v2869_v41 = vsel %vm6580_vm8, %v2861_v36, 0.0 }
 0x4d3   :  { %v2863_v8 = vrot.slane %v2862_v5, 4  ;;  %v2870_v46 = vrot.slane %v2869_v41, 4 }
 0x4d5   :  { %v2864_v12 = vadd.f32 %v2863_v8, %v2862_v5  ;;  %v2871_v47 = vadd.f32 %v2870_v46, %v2869_v41 }
 0x4d7   :  { %v2865_v38 = vrot.slane %v2864_v12, 2  ;;  %v2872_v48 = vrot.slane %v2871_v47, 2 }
 0x4d9   :  { %v2866_v52 = vadd.f32 %v2865_v38, %v2864_v12  ;;  %v2873_v63 = vadd.f32 %v2872_v48, %v2871_v47 }
 0x4db   :  { %v2867_v56 = vrot.slane %v2866_v52, 1  ;;  %v2874_v27 = vrot.slane %v2873_v63, 1 }
 0x4dd   :  { %v2868_v49 = vadd.f32 %v2867_v56, %v2866_v52  ;;  %v2875_v24 = vadd.f32 %v2874_v27, %v2873_v63 }
 0x4df   :  { %v2876_v31 = vadd.f32 %v2868_v49, %v6581_v42  ;;  %v2877_v51 = vadd.f32 %v2875_v24, %v6581_v42 }
 0x4e1   :  { %v3148_v0 = vmul.f32 -1.442695, %v2876_v31  ;;  %v3149_v17 = vmul.f32 -1.442695, %v2877_v51 }
 0x4e3   :  { %3303 = vpow2.f32 %v3148_v0 }
 0x4e4   :  { %3305 = vpow2.f32 %v3149_v17 }
 0x4f0   :  { %v3304_v50 = vpop.eup %3303 }
 0x4f1   :  { %v3306_v9 = vpop.eup %3305  ;;  %v2884_v3 = vadd.f32 1.0, %v3304_v50 }
 0x4f2   :  { %v2885_v55 = vadd.f32 1.0, %v3306_v9 }
 0x4f3   :  { %3307 = vrcp.f32 %v2884_v3 }
 0x4f4   :  { %3309 = vrcp.f32 %v2885_v55 }
 0x500   :  { %v3308_v20 = vpop.eup %3307 }
 0x501   :  { %v3310_v25 = vpop.eup %3309  ;;  %v2898_v40 = vmul.f32 %v3308_v20, %v6582_v60  ;;  %v2900_v37 = vmul.f32 %v3308_v20, %v6583_v57  ;;  %v2902_v35 = vmul.f32 %v3308_v20, %v6584_v32  ;;  %v2904_v34 = vmul.f32 %v3308_v20, %v6585_v62 }
 0x502   :  { %v2899_v29 = vmul.f32 %v3310_v25, %v6586_v30  ;;  %v2901_v59 = vmul.f32 %v3310_v25, %v6587_v53  ;;  %v2903_v15 = vmul.f32 %v3310_v25, %v6588_v28  ;;  %v2905_v44 = vmul.f32 %v3310_v25, %v6589_v7 }
 0x503   :  { %3158 = vst [vmem:[%s6007_s4 + $0x40] sm:$0xff] %v2898_v40  ;;  %3160 = vst [vmem:[%s6007_s4 + $0x50] sm:$0xff] %v2900_v37 }
 0x504   :  { %3162 = vst [vmem:[%s6007_s4 + $0x60] sm:$0xff] %v2902_v35  ;;  %3164 = vst [vmem:[%s6007_s4 + $0x70] sm:$0xff] %v2904_v34 }
 0x505   :  { %3159 = vst [vmem:[%s6007_s4 + $0x48] sm:$0xff] %v2899_v29  ;;  %3161 = vst [vmem:[%s6007_s4 + $0x58] sm:$0xff] %v2901_v59 }
 0x506   :  { %3163 = vst [vmem:[%s6007_s4 + $0x68] sm:$0xff] %v2903_v15  ;;  %3165 = vst [vmem:[%s6007_s4 + $0x78] sm:$0xff] %v2905_v44 }

</bundles_post_ra>
